<compile_context>
chip_gen: v7x
topology: tpu7x:2x2x1
jax: 0.10.0
libtpu: 0.0.40
codegen_flags: <defaults>
</compile_context>

<pallas_src>
import functools

import jax
import jax.numpy as jnp
from jax import lax
from jax.experimental import pallas as pl
from jax.experimental.pallas import tpu as pltpu

_LANE = 128


# ----------------------------- Pallas kernels ------------------------------


def _matmul_bias_kernel(a_ref, b_ref, bias_ref, o_ref, *, apply_relu):
    # a/b are bf16 MXU operands; accumulate and run the epilogue in f32.
    acc = jnp.dot(a_ref[...], b_ref[...], preferred_element_type=jnp.float32)
    acc = acc + bias_ref[...]            # bias is (1, Np), broadcasts over rows
    if apply_relu:
        acc = jnp.maximum(acc, 0.0)
    o_ref[...] = acc.astype(o_ref.dtype)


def _fc_logsoftmax_kernel(a_ref, b_ref, bias_ref, o_ref, *, valid_n):
    # FC matmul + bias with fused, numerically-stable log_softmax epilogue.
    acc = jnp.dot(a_ref[...], b_ref[...], preferred_element_type=jnp.float32)
    acc = acc + bias_ref[...]
    # Columns >= valid_n are lane padding: exclude them from the softmax.
    col = lax.broadcasted_iota(jnp.int32, acc.shape, 1)
    acc = jnp.where(col < valid_n, acc, -1e30)
    m = jnp.max(acc, axis=-1, keepdims=True)
    s = acc - m
    lse = jnp.log(jnp.sum(jnp.exp(s), axis=-1, keepdims=True))
    o_ref[...] = (s - lse).astype(o_ref.dtype)


# ----------------------------- kernel wrappers ------------------------------


def _round_up(x, m):
    return ((x + m - 1) // m) * m


def _choose_tm(mp):
    """Row-tile size: >=2 parallel tiles when possible (megacore / v7x TCs),
    capped at 512 rows so double-buffered bf16 A tiles stay small in VMEM."""
    if mp <= 8:
        return mp
    half = _round_up((mp + 1) // 2, 8)
    return min(512, half)


def matmul_bias(a, w, bias, relu=False):
    """(M,K) @ (K,N) + bias(N,), optional fused relu. Returns (M,N) f32.

    N is padded to a multiple of 128 internally (lane-dense stores); operands
    are fed to the MXU as bf16 with f32 accumulation. M is tiled with a
    'parallel' grid; the last (possibly ragged) block is masked by Pallas.
    """
    M, K = a.shape
    K2, N = w.shape
    assert K == K2
    Np = _round_up(N, _LANE)
    Mp = _round_up(M, 8)

    a = a.astype(jnp.bfloat16)
    if Mp != M:                                 # only tiny/odd M (e.g. FC batch)
        a = jnp.pad(a, ((0, Mp - M), (0, 0)))
    wp = jnp.pad(w.astype(jnp.bfloat16), ((0, 0), (0, Np - N)))
    bp = jnp.pad(bias.reshape(1, N).astype(jnp.float32), ((0, 0), (0, Np - N)))

    tm = _choose_tm(Mp)
    grid_m = pl.cdiv(Mp, tm)
    kern = functools.partial(_matmul_bias_kernel, apply_relu=relu)
    out = pl.pallas_call(
        kern,
        out_shape=jax.ShapeDtypeStruct((Mp, Np), jnp.float32),
        grid=(grid_m,),
        in_specs=[
            pl.BlockSpec((tm, K), lambda i: (i, 0)),
            pl.BlockSpec((K, Np), lambda i: (0, 0)),
            pl.BlockSpec((1, Np), lambda i: (0, 0)),
        ],
        out_specs=pl.BlockSpec((tm, Np), lambda i: (i, 0)),
        compiler_params=pltpu.CompilerParams(dimension_semantics=("parallel",)),
    )(a, wp, bp)
    return out[:M, :N]


def fc_log_softmax(x, w, bias):
    """Linear (torch layout w:(out,in)) + log_softmax(dim=1), one Pallas call."""
    M, K = x.shape
    N = w.shape[0]
    Np = _round_up(N, _LANE)
    Mp = _round_up(M, 8)

    a = x.astype(jnp.bfloat16)
    if Mp != M:
        a = jnp.pad(a, ((0, Mp - M), (0, 0)))
    wm = jnp.pad(w.T.astype(jnp.bfloat16), ((0, 0), (0, Np - N)))
    bm = jnp.pad(bias.reshape(1, N).astype(jnp.float32), ((0, 0), (0, Np - N)))

    kern = functools.partial(_fc_logsoftmax_kernel, valid_n=N)
    out = pl.pallas_call(
        kern,
        out_shape=jax.ShapeDtypeStruct((Mp, Np), jnp.float32),
        grid=(1,),
        in_specs=[
            pl.BlockSpec((Mp, K), lambda i: (0, 0)),
            pl.BlockSpec((K, Np), lambda i: (0, 0)),
            pl.BlockSpec((1, Np), lambda i: (0, 0)),
        ],
        out_specs=pl.BlockSpec((Mp, Np), lambda i: (0, 0)),
    )(a, wm, bm)
    return out[:M, :N]


# ----------------------------- plain-JAX glue ------------------------------


def _im2col(x, kh, kw, pad):
    """x: (B, C, H, W) -> patches (B*OH*OW, C*kh*kw), matching PyTorch weight layout."""
    # TODO(synk): for training-scale batches, fuse im2col into the matmul kernel
    # (pl.Element row gather / manual DMA of windows) instead of materializing
    # the 9-25x expanded patch matrix in HBM.
    B, C, H, W = x.shape
    xp = jnp.pad(x, ((0, 0), (0, 0), (pad, pad), (pad, pad)))
    OH = H + 2 * pad - kh + 1
    OW = W + 2 * pad - kw + 1
    patches = []
    for i in range(kh):
        for j in range(kw):
            patches.append(xp[:, :, i:i + OH, j:j + OW])
    p = jnp.stack(patches, axis=2)                       # (B, C, kh*kw, OH, OW)
    p = p.reshape(B, C * kh * kw, OH, OW)
    p = p.transpose(0, 2, 3, 1).reshape(B * OH * OW, C * kh * kw)
    return p, OH, OW


def conv2d(x, w, b, pad=0, relu=False):
    """NCHW conv, stride 1, via (im2col or reshape) + Pallas matmul kernel."""
    B, C, H, W = x.shape
    OC, IC, KH, KW = w.shape
    if KH == 1 and KW == 1 and pad == 0:
        cols = x.transpose(0, 2, 3, 1).reshape(B * H * W, C)   # no im2col for 1x1
        OH, OW = H, W
    else:
        cols, OH, OW = _im2col(x, KH, KW, pad)
    wmat = w.reshape(OC, IC * KH * KW).T                 # (C*KH*KW, OC)
    out = matmul_bias(cols, wmat, b, relu=relu)
    return out.reshape(B, OH, OW, OC).transpose(0, 3, 1, 2)


def max_pool2(x):
    # nn.MaxPool2d(2): 2x2, stride 2 (spatial dims here are always even).
    B, C, H, W = x.shape
    return x.reshape(B, C, H // 2, 2, W // 2, 2).max(axis=(3, 5))


def avg_pool3(x):
    # F.avg_pool2d(x, 3, stride=1, padding=1), count_include_pad=True -> /9 everywhere.
    s = lax.reduce_window(x, 0.0, lax.add, (1, 1, 3, 3), (1, 1, 1, 1),
                          padding=((0, 0), (0, 0), (1, 1), (1, 1)))
    return s / 9.0


# ----------------------------- parameters ------------------------------


def _conv_params(key, oc, ic, kh, kw):
    k1, k2 = jax.random.split(key)
    fan_in = ic * kh * kw
    bound = 1.0 / float(fan_in) ** 0.5
    w = jax.random.uniform(k1, (oc, ic, kh, kw), jnp.float32, -bound, bound)
    b = jax.random.uniform(k2, (oc,), jnp.float32, -bound, bound)
    return w, b


def _linear_params(key, out_f, in_f):
    k1, k2 = jax.random.split(key)
    bound = 1.0 / float(in_f) ** 0.5
    w = jax.random.uniform(k1, (out_f, in_f), jnp.float32, -bound, bound)
    b = jax.random.uniform(k2, (out_f,), jnp.float32, -bound, bound)
    return w, b


def _inception_params(key, in_ch):
    ks = jax.random.split(key, 7)
    return {
        "b1x1":   _conv_params(ks[0], 16, in_ch, 1, 1),
        "b5x5_1": _conv_params(ks[1], 16, in_ch, 1, 1),
        "b5x5_2": _conv_params(ks[2], 24, 16, 5, 5),
        "b3x3_1": _conv_params(ks[3], 16, in_ch, 1, 1),
        "b3x3_2": _conv_params(ks[4], 24, 16, 3, 3),
        "b3x3_3": _conv_params(ks[5], 24, 24, 3, 3),
        "bpool":  _conv_params(ks[6], 24, in_ch, 1, 1),
    }


def init_params(key):
    ks = jax.random.split(key, 5)
    return {
        "conv1":   _conv_params(ks[0], 10, 1, 5, 5),
        "conv2":   _conv_params(ks[1], 20, 88, 5, 5),
        "incept1": _inception_params(ks[2], 10),
        "incept2": _inception_params(ks[3], 20),
        "fc":      _linear_params(ks[4], 10, 1408),
    }


# ----------------------------- forward pass ------------------------------


def inception_a(x, p):
    B, C, H, W = x.shape
    M = B * H * W

    # --- stage 1: all four 1x1 convolutions in ONE Pallas matmul ----------
    # b1x1 / b5x5_1 / b3x3_1 share input x -> their (C,16) weights are
    # concatenated along N. The pool branch's 1x1 sees avg_pool3(x), so its
    # rows are stacked below (2M rows total); we read only the columns that
    # belong to each row-group afterwards.
    x_rows = x.transpose(0, 2, 3, 1).reshape(M, C)
    xp_rows = avg_pool3(x).transpose(0, 2, 3, 1).reshape(M, C)
    a = jnp.concatenate([x_rows, xp_rows], axis=0)                     # (2M, C)

    (w1, c1), (w5, c5) = p["b1x1"], p["b5x5_1"]
    (w3, c3), (wp, cp) = p["b3x3_1"], p["bpool"]
    w_cat = jnp.concatenate(
        [w1.reshape(16, C).T, w5.reshape(16, C).T,
         w3.reshape(16, C).T, wp.reshape(24, C).T], axis=1)            # (C, 72)
    b_cat = jnp.concatenate([c1, c5, c3, cp])                          # (72,)
    out = matmul_bias(a, w_cat, b_cat)                                 # (2M, 72)

    def to_nchw(rows, c):
        return rows.reshape(B, H, W, c).transpose(0, 3, 1, 2)

    b1 = to_nchw(out[:M, 0:16], 16)     # branch1x1
    b5 = to_nchw(out[:M, 16:32], 16)    # branch5x5 stage 1
    b3 = to_nchw(out[:M, 32:48], 16)    # branch3x3dbl stage 1
    bp = to_nchw(out[M:, 48:72], 24)    # branch_pool (avg-pooled rows)

    # --- stage 2: remaining 5x5 / 3x3 convolutions -------------------------
    b5 = conv2d(b5, *p["b5x5_2"], pad=2)
    b3 = conv2d(b3, *p["b3x3_2"], pad=1)
    b3 = conv2d(b3, *p["b3x3_3"], pad=1)
    return jnp.concatenate([b1, b5, b3, bp], axis=1)     # 16+24+24+24 = 88


def net_forward(params, x):
    B = x.shape[0]
    # relu(maxpool(conv1(x))): relu fused into the conv matmul kernel
    # (order commutes with max, both monotone).
    h = conv2d(x, *params["conv1"], pad=0, relu=True)    # (B,10,24,24)
    h = max_pool2(h)                                     # (B,10,12,12)
    h = inception_a(h, params["incept1"])                # (B,88,12,12)
    h = conv2d(h, *params["conv2"], pad=0, relu=True)    # (B,20,8,8)
    h = max_pool2(h)                                     # (B,20,4,4)
    h = inception_a(h, params["incept2"])                # (B,88,4,4)
    h = h.reshape(B, -1)                                 # (B,1408) — NCHW flatten, matches torch.view
    w, b = params["fc"]
    return fc_log_softmax(h, w, b)                       # (B,10), log_softmax fused


if __name__ == "__main__":
    key = jax.random.PRNGKey(0)
    kx, kp = jax.random.split(key)
    x = jax.random.normal(kx, (2, 1, 28, 28), jnp.float32)   # MNIST-shaped input (NCHW)
    params = init_params(kp)
    fwd = jax.jit(net_forward)
    out = jax.block_until_ready(fwd(params, x))
    assert out.shape == (2, 10)
    assert bool(jnp.all(jnp.isfinite(out)))
    print("KERNEL_OK")
</pallas_src>

<mosaic_0001>
module attributes {stable_mosaic.version = 11 : i64} {
  func.func @_matmul_bias_kernel(%arg0: i32, %arg1: memref<512x25xbf16, #tpu.memory_space<vmem>>, %arg2: memref<25x128xbf16, #tpu.memory_space<vmem>>, %arg3: memref<1x128xf32, #tpu.memory_space<vmem>>, %arg4: memref<512x128xf32, #tpu.memory_space<vmem>>) attributes {dimension_semantics = [#tpu.dimension_semantics<parallel>], iteration_bounds = array<i64: 3>, scalar_prefetch = 0 : i64, scratch_operands = 0 : i64, tpu.core_type = #tpu.core_type<tc>, window_params = [{transform_indices = @transform_0, window_bounds = array<i64: 512, 25>}, {pipeline_mode = #tpu.pipeline_mode<synchronous>, transform_indices = @transform_1, window_bounds = array<i64: 25, 128>}, {pipeline_mode = #tpu.pipeline_mode<synchronous>, transform_indices = @transform_2, window_bounds = array<i64: 1, 128>}, {transform_indices = @transform_3, window_bounds = array<i64: 512, 128>}]} {
    %c0 = arith.constant 0 : index
    %c0_0 = arith.constant 0 : index
    %0 = vector.load %arg1[%c0, %c0_0] : memref<512x25xbf16, #tpu.memory_space<vmem>>, vector<512x25xbf16>
    %c0_1 = arith.constant 0 : index
    %c0_2 = arith.constant 0 : index
    %1 = vector.load %arg2[%c0_1, %c0_2] : memref<25x128xbf16, #tpu.memory_space<vmem>>, vector<25x128xbf16>
    %cst = arith.constant dense<0.000000e+00> : vector<512x128xf32>
    %2 = tpu.matmul %0, %1, %cst {dimension_numbers = #tpu.dot_dimension_numbers<[1], [0], [0], [1], [0, 0, 1, 1], [], []>} : vector<512x25xbf16>, vector<25x128xbf16>, vector<512x128xf32> -> vector<512x128xf32>
    %c0_3 = arith.constant 0 : index
    %c0_4 = arith.constant 0 : index
    %3 = vector.load %arg3[%c0_3, %c0_4] : memref<1x128xf32, #tpu.memory_space<vmem>>, vector<1x128xf32>
    %4 = vector.broadcast %3 : vector<1x128xf32> to vector<512x128xf32>
    %5 = arith.addf %2, %4 : vector<512x128xf32>
    %cst_5 = arith.constant 0.000000e+00 : f32
    %6 = vector.broadcast %cst_5 : f32 to vector<512x128xf32>
    %7 = arith.maximumf %5, %6 : vector<512x128xf32>
    %c0_6 = arith.constant 0 : index
    %c0_7 = arith.constant 0 : index
    %8 = vector.load %arg4[%c0_6, %c0_7] : memref<512x128xf32, #tpu.memory_space<vmem>>, vector<512x128xf32>
    tpu.vector_store %arg4[%c0_6, %c0_7], %7 {strides = array<i32>} : memref<512x128xf32, #tpu.memory_space<vmem>>, vector<512x128xf32>,
    return
  }
  func.func @transform_0(%arg0: i32) -> (i32, i32) {
    %c0_i32 = arith.constant 0 : i32
    %c0_i32_0 = arith.constant 0 : i32
    return %arg0, %c0_i32 : i32, i32
  }
  func.func @transform_1(%arg0: i32) -> (i32, i32) {
    %c0_i32 = arith.constant 0 : i32
    %c0_i32_0 = arith.constant 0 : i32
    %c0_i32_1 = arith.constant 0 : i32
    return %c0_i32, %c0_i32_0 : i32, i32
  }
  func.func @transform_2(%arg0: i32) -> (i32, i32) {
    %c0_i32 = arith.constant 0 : i32
    %c0_i32_0 = arith.constant 0 : i32
    %c0_i32_1 = arith.constant 0 : i32
    return %c0_i32, %c0_i32_0 : i32, i32
  }
  func.func @transform_3(%arg0: i32) -> (i32, i32) {
    %c0_i32 = arith.constant 0 : i32
    %c0_i32_0 = arith.constant 0 : i32
    return %arg0, %c0_i32 : i32, i32
  }
}

module attributes {stable_mosaic.version = 11 : i64} {
  func.func @_matmul_bias_kernel(%arg0: i32, %arg1: memref<288x10xbf16, #tpu.memory_space<vmem>>, %arg2: memref<10x128xbf16, #tpu.memory_space<vmem>>, %arg3: memref<1x128xf32, #tpu.memory_space<vmem>>, %arg4: memref<288x128xf32, #tpu.memory_space<vmem>>) attributes {dimension_semantics = [#tpu.dimension_semantics<parallel>], iteration_bounds = array<i64: 2>, scalar_prefetch = 0 : i64, scratch_operands = 0 : i64, tpu.core_type = #tpu.core_type<tc>, window_params = [{transform_indices = @transform_0, window_bounds = array<i64: 288, 10>}, {pipeline_mode = #tpu.pipeline_mode<synchronous>, transform_indices = @transform_1, window_bounds = array<i64: 10, 128>}, {pipeline_mode = #tpu.pipeline_mode<synchronous>, transform_indices = @transform_2, window_bounds = array<i64: 1, 128>}, {transform_indices = @transform_3, window_bounds = array<i64: 288, 128>}]} {
    %c0 = arith.constant 0 : index
    %c0_0 = arith.constant 0 : index
    %0 = vector.load %arg1[%c0, %c0_0] : memref<288x10xbf16, #tpu.memory_space<vmem>>, vector<288x10xbf16>
    %c0_1 = arith.constant 0 : index
    %c0_2 = arith.constant 0 : index
    %1 = vector.load %arg2[%c0_1, %c0_2] : memref<10x128xbf16, #tpu.memory_space<vmem>>, vector<10x128xbf16>
    %cst = arith.constant dense<0.000000e+00> : vector<288x128xf32>
    %2 = tpu.matmul %0, %1, %cst {dimension_numbers = #tpu.dot_dimension_numbers<[1], [0], [0], [1], [0, 0, 1, 1], [], []>} : vector<288x10xbf16>, vector<10x128xbf16>, vector<288x128xf32> -> vector<288x128xf32>
    %c0_3 = arith.constant 0 : index
    %c0_4 = arith.constant 0 : index
    %3 = vector.load %arg3[%c0_3, %c0_4] : memref<1x128xf32, #tpu.memory_space<vmem>>, vector<1x128xf32>
    %4 = vector.broadcast %3 : vector<1x128xf32> to vector<288x128xf32>
    %5 = arith.addf %2, %4 : vector<288x128xf32>
    %c0_5 = arith.constant 0 : index
    %c0_6 = arith.constant 0 : index
    %6 = vector.load %arg4[%c0_5, %c0_6] : memref<288x128xf32, #tpu.memory_space<vmem>>, vector<288x128xf32>
    tpu.vector_store %arg4[%c0_5, %c0_6], %5 {strides = array<i32>} : memref<288x128xf32, #tpu.memory_space<vmem>>, vector<288x128xf32>,
    return
  }
  func.func @transform_0(%arg0: i32) -> (i32, i32) {
    %c0_i32 = arith.constant 0 : i32
    %c0_i32_0 = arith.constant 0 : i32
    return %arg0, %c0_i32 : i32, i32
  }
  func.func @transform_1(%arg0: i32) -> (i32, i32) {
    %c0_i32 = arith.constant 0 : i32
    %c0_i32_0 = arith.constant 0 : i32
    %c0_i32_1 = arith.constant 0 : i32
    return %c0_i32, %c0_i32_0 : i32, i32
  }
  func.func @transform_2(%arg0: i32) -> (i32, i32) {
    %c0_i32 = arith.constant 0 : i32
    %c0_i32_0 = arith.constant 0 : i32
    %c0_i32_1 = arith.constant 0 : i32
    return %c0_i32, %c0_i32_0 : i32, i32
  }
  func.func @transform_3(%arg0: i32) -> (i32, i32) {
    %c0_i32 = arith.constant 0 : i32
    %c0_i32_0 = arith.constant 0 : i32
    return %arg0, %c0_i32 : i32, i32
  }
}

module attributes {stable_mosaic.version = 11 : i64} {
  func.func @_matmul_bias_kernel(%arg0: i32, %arg1: memref<144x144xbf16, #tpu.memory_space<vmem>>, %arg2: memref<144x128xbf16, #tpu.memory_space<vmem>>, %arg3: memref<1x128xf32, #tpu.memory_space<vmem>>, %arg4: memref<144x128xf32, #tpu.memory_space<vmem>>) attributes {dimension_semantics = [#tpu.dimension_semantics<parallel>], iteration_bounds = array<i64: 2>, scalar_prefetch = 0 : i64, scratch_operands = 0 : i64, tpu.core_type = #tpu.core_type<tc>, window_params = [{transform_indices = @transform_0, window_bounds = array<i64: 144, 144>}, {pipeline_mode = #tpu.pipeline_mode<synchronous>, transform_indices = @transform_1, window_bounds = array<i64: 144, 128>}, {pipeline_mode = #tpu.pipeline_mode<synchronous>, transform_indices = @transform_2, window_bounds = array<i64: 1, 128>}, {transform_indices = @transform_3, window_bounds = array<i64: 144, 128>}]} {
    %c0 = arith.constant 0 : index
    %c0_0 = arith.constant 0 : index
    %0 = vector.load %arg1[%c0, %c0_0] : memref<144x144xbf16, #tpu.memory_space<vmem>>, vector<144x144xbf16>
    %c0_1 = arith.constant 0 : index
    %c0_2 = arith.constant 0 : index
    %1 = vector.load %arg2[%c0_1, %c0_2] : memref<144x128xbf16, #tpu.memory_space<vmem>>, vector<144x128xbf16>
    %cst = arith.constant dense<0.000000e+00> : vector<144x128xf32>
    %2 = tpu.matmul %0, %1, %cst {dimension_numbers = #tpu.dot_dimension_numbers<[1], [0], [0], [1], [0, 0, 1, 1], [], []>} : vector<144x144xbf16>, vector<144x128xbf16>, vector<144x128xf32> -> vector<144x128xf32>
    %c0_3 = arith.constant 0 : index
    %c0_4 = arith.constant 0 : index
    %3 = vector.load %arg3[%c0_3, %c0_4] : memref<1x128xf32, #tpu.memory_space<vmem>>, vector<1x128xf32>
    %4 = vector.broadcast %3 : vector<1x128xf32> to vector<144x128xf32>
    %5 = arith.addf %2, %4 : vector<144x128xf32>
    %c0_5 = arith.constant 0 : index
    %c0_6 = arith.constant 0 : index
    %6 = vector.load %arg4[%c0_5, %c0_6] : memref<144x128xf32, #tpu.memory_space<vmem>>, vector<144x128xf32>
    tpu.vector_store %arg4[%c0_5, %c0_6], %5 {strides = array<i32>} : memref<144x128xf32, #tpu.memory_space<vmem>>, vector<144x128xf32>,
    return
  }
  func.func @transform_0(%arg0: i32) -> (i32, i32) {
    %c0_i32 = arith.constant 0 : i32
    %c0_i32_0 = arith.constant 0 : i32
    return %arg0, %c0_i32 : i32, i32
  }
  func.func @transform_1(%arg0: i32) -> (i32, i32) {
    %c0_i32 = arith.constant 0 : i32
    %c0_i32_0 = arith.constant 0 : i32
    %c0_i32_1 = arith.constant 0 : i32
    return %c0_i32, %c0_i32_0 : i32, i32
  }
  func.func @transform_2(%arg0: i32) -> (i32, i32) {
    %c0_i32 = arith.constant 0 : i32
    %c0_i32_0 = arith.constant 0 : i32
    %c0_i32_1 = arith.constant 0 : i32
    return %c0_i32, %c0_i32_0 : i32, i32
  }
  func.func @transform_3(%arg0: i32) -> (i32, i32) {
    %c0_i32 = arith.constant 0 : i32
    %c0_i32_0 = arith.constant 0 : i32
    return %arg0, %c0_i32 : i32, i32
  }
}

module attributes {stable_mosaic.version = 11 : i64} {
  func.func @_matmul_bias_kernel(%arg0: i32, %arg1: memref<144x216xbf16, #tpu.memory_space<vmem>>, %arg2: memref<216x128xbf16, #tpu.memory_space<vmem>>, %arg3: memref<1x128xf32, #tpu.memory_space<vmem>>, %arg4: memref<144x128xf32, #tpu.memory_space<vmem>>) attributes {dimension_semantics = [#tpu.dimension_semantics<parallel>], iteration_bounds = array<i64: 2>, scalar_prefetch = 0 : i64, scratch_operands = 0 : i64, tpu.core_type = #tpu.core_type<tc>, window_params = [{transform_indices = @transform_0, window_bounds = array<i64: 144, 216>}, {pipeline_mode = #tpu.pipeline_mode<synchronous>, transform_indices = @transform_1, window_bounds = array<i64: 216, 128>}, {pipeline_mode = #tpu.pipeline_mode<synchronous>, transform_indices = @transform_2, window_bounds = array<i64: 1, 128>}, {transform_indices = @transform_3, window_bounds = array<i64: 144, 128>}]} {
    %c0 = arith.constant 0 : index
    %c0_0 = arith.constant 0 : index
    %0 = vector.load %arg1[%c0, %c0_0] : memref<144x216xbf16, #tpu.memory_space<vmem>>, vector<144x216xbf16>
    %c0_1 = arith.constant 0 : index
    %c0_2 = arith.constant 0 : index
    %1 = vector.load %arg2[%c0_1, %c0_2] : memref<216x128xbf16, #tpu.memory_space<vmem>>, vector<216x128xbf16>
    %cst = arith.constant dense<0.000000e+00> : vector<144x128xf32>
    %2 = tpu.matmul %0, %1, %cst {dimension_numbers = #tpu.dot_dimension_numbers<[1], [0], [0], [1], [0, 0, 1, 1], [], []>} : vector<144x216xbf16>, vector<216x128xbf16>, vector<144x128xf32> -> vector<144x128xf32>
    %c0_3 = arith.constant 0 : index
    %c0_4 = arith.constant 0 : index
    %3 = vector.load %arg3[%c0_3, %c0_4] : memref<1x128xf32, #tpu.memory_space<vmem>>, vector<1x128xf32>
    %4 = vector.broadcast %3 : vector<1x128xf32> to vector<144x128xf32>
    %5 = arith.addf %2, %4 : vector<144x128xf32>
    %c0_5 = arith.constant 0 : index
    %c0_6 = arith.constant 0 : index
    %6 = vector.load %arg4[%c0_5, %c0_6] : memref<144x128xf32, #tpu.memory_space<vmem>>, vector<144x128xf32>
    tpu.vector_store %arg4[%c0_5, %c0_6], %5 {strides = array<i32>} : memref<144x128xf32, #tpu.memory_space<vmem>>, vector<144x128xf32>,
    return
  }
  func.func @transform_0(%arg0: i32) -> (i32, i32) {
    %c0_i32 = arith.constant 0 : i32
    %c0_i32_0 = arith.constant 0 : i32
    return %arg0, %c0_i32 : i32, i32
  }
  func.func @transform_1(%arg0: i32) -> (i32, i32) {
    %c0_i32 = arith.constant 0 : i32
    %c0_i32_0 = arith.constant 0 : i32
    %c0_i32_1 = arith.constant 0 : i32
    return %c0_i32, %c0_i32_0 : i32, i32
  }
  func.func @transform_2(%arg0: i32) -> (i32, i32) {
    %c0_i32 = arith.constant 0 : i32
    %c0_i32_0 = arith.constant 0 : i32
    %c0_i32_1 = arith.constant 0 : i32
    return %c0_i32, %c0_i32_0 : i32, i32
  }
  func.func @transform_3(%arg0: i32) -> (i32, i32) {
    %c0_i32 = arith.constant 0 : i32
    %c0_i32_0 = arith.constant 0 : i32
    return %arg0, %c0_i32 : i32, i32
  }
}

module attributes {stable_mosaic.version = 11 : i64} {
  func.func @_matmul_bias_kernel(%arg0: i32, %arg1: memref<144x400xbf16, #tpu.memory_space<vmem>>, %arg2: memref<400x128xbf16, #tpu.memory_space<vmem>>, %arg3: memref<1x128xf32, #tpu.memory_space<vmem>>, %arg4: memref<144x128xf32, #tpu.memory_space<vmem>>) attributes {dimension_semantics = [#tpu.dimension_semantics<parallel>], iteration_bounds = array<i64: 2>, scalar_prefetch = 0 : i64, scratch_operands = 0 : i64, tpu.core_type = #tpu.core_type<tc>, window_params = [{transform_indices = @transform_0, window_bounds = array<i64: 144, 400>}, {pipeline_mode = #tpu.pipeline_mode<synchronous>, transform_indices = @transform_1, window_bounds = array<i64: 400, 128>}, {pipeline_mode = #tpu.pipeline_mode<synchronous>, transform_indices = @transform_2, window_bounds = array<i64: 1, 128>}, {transform_indices = @transform_3, window_bounds = array<i64: 144, 128>}]} {
    %c0 = arith.constant 0 : index
    %c0_0 = arith.constant 0 : index
    %0 = vector.load %arg1[%c0, %c0_0] : memref<144x400xbf16, #tpu.memory_space<vmem>>, vector<144x400xbf16>
    %c0_1 = arith.constant 0 : index
    %c0_2 = arith.constant 0 : index
    %1 = vector.load %arg2[%c0_1, %c0_2] : memref<400x128xbf16, #tpu.memory_space<vmem>>, vector<400x128xbf16>
    %cst = arith.constant dense<0.000000e+00> : vector<144x128xf32>
    %2 = tpu.matmul %0, %1, %cst {dimension_numbers = #tpu.dot_dimension_numbers<[1], [0], [0], [1], [0, 0, 1, 1], [], []>} : vector<144x400xbf16>, vector<400x128xbf16>, vector<144x128xf32> -> vector<144x128xf32>
    %c0_3 = arith.constant 0 : index
    %c0_4 = arith.constant 0 : index
    %3 = vector.load %arg3[%c0_3, %c0_4] : memref<1x128xf32, #tpu.memory_space<vmem>>, vector<1x128xf32>
    %4 = vector.broadcast %3 : vector<1x128xf32> to vector<144x128xf32>
    %5 = arith.addf %2, %4 : vector<144x128xf32>
    %c0_5 = arith.constant 0 : index
    %c0_6 = arith.constant 0 : index
    %6 = vector.load %arg4[%c0_5, %c0_6] : memref<144x128xf32, #tpu.memory_space<vmem>>, vector<144x128xf32>
    tpu.vector_store %arg4[%c0_5, %c0_6], %5 {strides = array<i32>} : memref<144x128xf32, #tpu.memory_space<vmem>>, vector<144x128xf32>,
    return
  }
  func.func @transform_0(%arg0: i32) -> (i32, i32) {
    %c0_i32 = arith.constant 0 : i32
    %c0_i32_0 = arith.constant 0 : i32
    return %arg0, %c0_i32 : i32, i32
  }
  func.func @transform_1(%arg0: i32) -> (i32, i32) {
    %c0_i32 = arith.constant 0 : i32
    %c0_i32_0 = arith.constant 0 : i32
    %c0_i32_1 = arith.constant 0 : i32
    return %c0_i32, %c0_i32_0 : i32, i32
  }
  func.func @transform_2(%arg0: i32) -> (i32, i32) {
    %c0_i32 = arith.constant 0 : i32
    %c0_i32_0 = arith.constant 0 : i32
    %c0_i32_1 = arith.constant 0 : i32
    return %c0_i32, %c0_i32_0 : i32, i32
  }
  func.func @transform_3(%arg0: i32) -> (i32, i32) {
    %c0_i32 = arith.constant 0 : i32
    %c0_i32_0 = arith.constant 0 : i32
    return %arg0, %c0_i32 : i32, i32
  }
}

module attributes {stable_mosaic.version = 11 : i64} {
  func.func @_matmul_bias_kernel(%arg0: i32, %arg1: memref<64x2200xbf16, #tpu.memory_space<vmem>>, %arg2: memref<2200x128xbf16, #tpu.memory_space<vmem>>, %arg3: memref<1x128xf32, #tpu.memory_space<vmem>>, %arg4: memref<64x128xf32, #tpu.memory_space<vmem>>) attributes {dimension_semantics = [#tpu.dimension_semantics<parallel>], iteration_bounds = array<i64: 2>, scalar_prefetch = 0 : i64, scratch_operands = 0 : i64, tpu.core_type = #tpu.core_type<tc>, window_params = [{transform_indices = @transform_0, window_bounds = array<i64: 64, 2200>}, {pipeline_mode = #tpu.pipeline_mode<synchronous>, transform_indices = @transform_1, window_bounds = array<i64: 2200, 128>}, {pipeline_mode = #tpu.pipeline_mode<synchronous>, transform_indices = @transform_2, window_bounds = array<i64: 1, 128>}, {transform_indices = @transform_3, window_bounds = array<i64: 64, 128>}]} {
    %c0 = arith.constant 0 : index
    %c0_0 = arith.constant 0 : index
    %0 = vector.load %arg1[%c0, %c0_0] : memref<64x2200xbf16, #tpu.memory_space<vmem>>, vector<64x2200xbf16>
    %c0_1 = arith.constant 0 : index
    %c0_2 = arith.constant 0 : index
    %1 = vector.load %arg2[%c0_1, %c0_2] : memref<2200x128xbf16, #tpu.memory_space<vmem>>, vector<2200x128xbf16>
    %cst = arith.constant dense<0.000000e+00> : vector<64x128xf32>
    %2 = tpu.matmul %0, %1, %cst {dimension_numbers = #tpu.dot_dimension_numbers<[1], [0], [0], [1], [0, 0, 1, 1], [], []>} : vector<64x2200xbf16>, vector<2200x128xbf16>, vector<64x128xf32> -> vector<64x128xf32>
    %c0_3 = arith.constant 0 : index
    %c0_4 = arith.constant 0 : index
    %3 = vector.load %arg3[%c0_3, %c0_4] : memref<1x128xf32, #tpu.memory_space<vmem>>, vector<1x128xf32>
    %4 = vector.broadcast %3 : vector<1x128xf32> to vector<64x128xf32>
    %5 = arith.addf %2, %4 : vector<64x128xf32>
    %cst_5 = arith.constant 0.000000e+00 : f32
    %6 = vector.broadcast %cst_5 : f32 to vector<64x128xf32>
    %7 = arith.maximumf %5, %6 : vector<64x128xf32>
    %c0_6 = arith.constant 0 : index
    %c0_7 = arith.constant 0 : index
    %8 = vector.load %arg4[%c0_6, %c0_7] : memref<64x128xf32, #tpu.memory_space<vmem>>, vector<64x128xf32>
    tpu.vector_store %arg4[%c0_6, %c0_7], %7 {strides = array<i32>} : memref<64x128xf32, #tpu.memory_space<vmem>>, vector<64x128xf32>,
    return
  }
  func.func @transform_0(%arg0: i32) -> (i32, i32) {
    %c0_i32 = arith.constant 0 : i32
    %c0_i32_0 = arith.constant 0 : i32
    return %arg0, %c0_i32 : i32, i32
  }
  func.func @transform_1(%arg0: i32) -> (i32, i32) {
    %c0_i32 = arith.constant 0 : i32
    %c0_i32_0 = arith.constant 0 : i32
    %c0_i32_1 = arith.constant 0 : i32
    return %c0_i32, %c0_i32_0 : i32, i32
  }
  func.func @transform_2(%arg0: i32) -> (i32, i32) {
    %c0_i32 = arith.constant 0 : i32
    %c0_i32_0 = arith.constant 0 : i32
    %c0_i32_1 = arith.constant 0 : i32
    return %c0_i32, %c0_i32_0 : i32, i32
  }
  func.func @transform_3(%arg0: i32) -> (i32, i32) {
    %c0_i32 = arith.constant 0 : i32
    %c0_i32_0 = arith.constant 0 : i32
    return %arg0, %c0_i32 : i32, i32
  }
}

module attributes {stable_mosaic.version = 11 : i64} {
  func.func @_matmul_bias_kernel(%arg0: i32, %arg1: memref<32x20xbf16, #tpu.memory_space<vmem>>, %arg2: memref<20x128xbf16, #tpu.memory_space<vmem>>, %arg3: memref<1x128xf32, #tpu.memory_space<vmem>>, %arg4: memref<32x128xf32, #tpu.memory_space<vmem>>) attributes {dimension_semantics = [#tpu.dimension_semantics<parallel>], iteration_bounds = array<i64: 2>, scalar_prefetch = 0 : i64, scratch_operands = 0 : i64, tpu.core_type = #tpu.core_type<tc>, window_params = [{transform_indices = @transform_0, window_bounds = array<i64: 32, 20>}, {pipeline_mode = #tpu.pipeline_mode<synchronous>, transform_indices = @transform_1, window_bounds = array<i64: 20, 128>}, {pipeline_mode = #tpu.pipeline_mode<synchronous>, transform_indices = @transform_2, window_bounds = array<i64: 1, 128>}, {transform_indices = @transform_3, window_bounds = array<i64: 32, 128>}]} {
    %c0 = arith.constant 0 : index
    %c0_0 = arith.constant 0 : index
    %0 = vector.load %arg1[%c0, %c0_0] : memref<32x20xbf16, #tpu.memory_space<vmem>>, vector<32x20xbf16>
    %c0_1 = arith.constant 0 : index
    %c0_2 = arith.constant 0 : index
    %1 = vector.load %arg2[%c0_1, %c0_2] : memref<20x128xbf16, #tpu.memory_space<vmem>>, vector<20x128xbf16>
    %cst = arith.constant dense<0.000000e+00> : vector<32x128xf32>
    %2 = tpu.matmul %0, %1, %cst {dimension_numbers = #tpu.dot_dimension_numbers<[1], [0], [0], [1], [0, 0, 1, 1], [], []>} : vector<32x20xbf16>, vector<20x128xbf16>, vector<32x128xf32> -> vector<32x128xf32>
    %c0_3 = arith.constant 0 : index
    %c0_4 = arith.constant 0 : index
    %3 = vector.load %arg3[%c0_3, %c0_4] : memref<1x128xf32, #tpu.memory_space<vmem>>, vector<1x128xf32>
    %4 = vector.broadcast %3 : vector<1x128xf32> to vector<32x128xf32>
    %5 = arith.addf %2, %4 : vector<32x128xf32>
    %c0_5 = arith.constant 0 : index
    %c0_6 = arith.constant 0 : index
    %6 = vector.load %arg4[%c0_5, %c0_6] : memref<32x128xf32, #tpu.memory_space<vmem>>, vector<32x128xf32>
    tpu.vector_store %arg4[%c0_5, %c0_6], %5 {strides = array<i32>} : memref<32x128xf32, #tpu.memory_space<vmem>>, vector<32x128xf32>,
    return
  }
  func.func @transform_0(%arg0: i32) -> (i32, i32) {
    %c0_i32 = arith.constant 0 : i32
    %c0_i32_0 = arith.constant 0 : i32
    return %arg0, %c0_i32 : i32, i32
  }
  func.func @transform_1(%arg0: i32) -> (i32, i32) {
    %c0_i32 = arith.constant 0 : i32
    %c0_i32_0 = arith.constant 0 : i32
    %c0_i32_1 = arith.constant 0 : i32
    return %c0_i32, %c0_i32_0 : i32, i32
  }
  func.func @transform_2(%arg0: i32) -> (i32, i32) {
    %c0_i32 = arith.constant 0 : i32
    %c0_i32_0 = arith.constant 0 : i32
    %c0_i32_1 = arith.constant 0 : i32
    return %c0_i32, %c0_i32_0 : i32, i32
  }
  func.func @transform_3(%arg0: i32) -> (i32, i32) {
    %c0_i32 = arith.constant 0 : i32
    %c0_i32_0 = arith.constant 0 : i32
    return %arg0, %c0_i32 : i32, i32
  }
}

module attributes {stable_mosaic.version = 11 : i64} {
  func.func @_matmul_bias_kernel(%arg0: i32, %arg1: memref<16x144xbf16, #tpu.memory_space<vmem>>, %arg2: memref<144x128xbf16, #tpu.memory_space<vmem>>, %arg3: memref<1x128xf32, #tpu.memory_space<vmem>>, %arg4: memref<16x128xf32, #tpu.memory_space<vmem>>) attributes {dimension_semantics = [#tpu.dimension_semantics<parallel>], iteration_bounds = array<i64: 2>, scalar_prefetch = 0 : i64, scratch_operands = 0 : i64, tpu.core_type = #tpu.core_type<tc>, window_params = [{transform_indices = @transform_0, window_bounds = array<i64: 16, 144>}, {pipeline_mode = #tpu.pipeline_mode<synchronous>, transform_indices = @transform_1, window_bounds = array<i64: 144, 128>}, {pipeline_mode = #tpu.pipeline_mode<synchronous>, transform_indices = @transform_2, window_bounds = array<i64: 1, 128>}, {transform_indices = @transform_3, window_bounds = array<i64: 16, 128>}]} {
    %c0 = arith.constant 0 : index
    %c0_0 = arith.constant 0 : index
    %0 = vector.load %arg1[%c0, %c0_0] : memref<16x144xbf16, #tpu.memory_space<vmem>>, vector<16x144xbf16>
    %c0_1 = arith.constant 0 : index
    %c0_2 = arith.constant 0 : index
    %1 = vector.load %arg2[%c0_1, %c0_2] : memref<144x128xbf16, #tpu.memory_space<vmem>>, vector<144x128xbf16>
    %cst = arith.constant dense<0.000000e+00> : vector<16x128xf32>
    %2 = tpu.matmul %0, %1, %cst {dimension_numbers = #tpu.dot_dimension_numbers<[1], [0], [0], [1], [0, 0, 1, 1], [], []>} : vector<16x144xbf16>, vector<144x128xbf16>, vector<16x128xf32> -> vector<16x128xf32>
    %c0_3 = arith.constant 0 : index
    %c0_4 = arith.constant 0 : index
    %3 = vector.load %arg3[%c0_3, %c0_4] : memref<1x128xf32, #tpu.memory_space<vmem>>, vector<1x128xf32>
    %4 = vector.broadcast %3 : vector<1x128xf32> to vector<16x128xf32>
    %5 = arith.addf %2, %4 : vector<16x128xf32>
    %c0_5 = arith.constant 0 : index
    %c0_6 = arith.constant 0 : index
    %6 = vector.load %arg4[%c0_5, %c0_6] : memref<16x128xf32, #tpu.memory_space<vmem>>, vector<16x128xf32>
    tpu.vector_store %arg4[%c0_5, %c0_6], %5 {strides = array<i32>} : memref<16x128xf32, #tpu.memory_space<vmem>>, vector<16x128xf32>,
    return
  }
  func.func @transform_0(%arg0: i32) -> (i32, i32) {
    %c0_i32 = arith.constant 0 : i32
    %c0_i32_0 = arith.constant 0 : i32
    return %arg0, %c0_i32 : i32, i32
  }
  func.func @transform_1(%arg0: i32) -> (i32, i32) {
    %c0_i32 = arith.constant 0 : i32
    %c0_i32_0 = arith.constant 0 : i32
    %c0_i32_1 = arith.constant 0 : i32
    return %c0_i32, %c0_i32_0 : i32, i32
  }
  func.func @transform_2(%arg0: i32) -> (i32, i32) {
    %c0_i32 = arith.constant 0 : i32
    %c0_i32_0 = arith.constant 0 : i32
    %c0_i32_1 = arith.constant 0 : i32
    return %c0_i32, %c0_i32_0 : i32, i32
  }
  func.func @transform_3(%arg0: i32) -> (i32, i32) {
    %c0_i32 = arith.constant 0 : i32
    %c0_i32_0 = arith.constant 0 : i32
    return %arg0, %c0_i32 : i32, i32
  }
}

module attributes {stable_mosaic.version = 11 : i64} {
  func.func @_matmul_bias_kernel(%arg0: i32, %arg1: memref<16x216xbf16, #tpu.memory_space<vmem>>, %arg2: memref<216x128xbf16, #tpu.memory_space<vmem>>, %arg3: memref<1x128xf32, #tpu.memory_space<vmem>>, %arg4: memref<16x128xf32, #tpu.memory_space<vmem>>) attributes {dimension_semantics = [#tpu.dimension_semantics<parallel>], iteration_bounds = array<i64: 2>, scalar_prefetch = 0 : i64, scratch_operands = 0 : i64, tpu.core_type = #tpu.core_type<tc>, window_params = [{transform_indices = @transform_0, window_bounds = array<i64: 16, 216>}, {pipeline_mode = #tpu.pipeline_mode<synchronous>, transform_indices = @transform_1, window_bounds = array<i64: 216, 128>}, {pipeline_mode = #tpu.pipeline_mode<synchronous>, transform_indices = @transform_2, window_bounds = array<i64: 1, 128>}, {transform_indices = @transform_3, window_bounds = array<i64: 16, 128>}]} {
    %c0 = arith.constant 0 : index
    %c0_0 = arith.constant 0 : index
    %0 = vector.load %arg1[%c0, %c0_0] : memref<16x216xbf16, #tpu.memory_space<vmem>>, vector<16x216xbf16>
    %c0_1 = arith.constant 0 : index
    %c0_2 = arith.constant 0 : index
    %1 = vector.load %arg2[%c0_1, %c0_2] : memref<216x128xbf16, #tpu.memory_space<vmem>>, vector<216x128xbf16>
    %cst = arith.constant dense<0.000000e+00> : vector<16x128xf32>
    %2 = tpu.matmul %0, %1, %cst {dimension_numbers = #tpu.dot_dimension_numbers<[1], [0], [0], [1], [0, 0, 1, 1], [], []>} : vector<16x216xbf16>, vector<216x128xbf16>, vector<16x128xf32> -> vector<16x128xf32>
    %c0_3 = arith.constant 0 : index
    %c0_4 = arith.constant 0 : index
    %3 = vector.load %arg3[%c0_3, %c0_4] : memref<1x128xf32, #tpu.memory_space<vmem>>, vector<1x128xf32>
    %4 = vector.broadcast %3 : vector<1x128xf32> to vector<16x128xf32>
    %5 = arith.addf %2, %4 : vector<16x128xf32>
    %c0_5 = arith.constant 0 : index
    %c0_6 = arith.constant 0 : index
    %6 = vector.load %arg4[%c0_5, %c0_6] : memref<16x128xf32, #tpu.memory_space<vmem>>, vector<16x128xf32>
    tpu.vector_store %arg4[%c0_5, %c0_6], %5 {strides = array<i32>} : memref<16x128xf32, #tpu.memory_space<vmem>>, vector<16x128xf32>,
    return
  }
  func.func @transform_0(%arg0: i32) -> (i32, i32) {
    %c0_i32 = arith.constant 0 : i32
    %c0_i32_0 = arith.constant 0 : i32
    return %arg0, %c0_i32 : i32, i32
  }
  func.func @transform_1(%arg0: i32) -> (i32, i32) {
    %c0_i32 = arith.constant 0 : i32
    %c0_i32_0 = arith.constant 0 : i32
    %c0_i32_1 = arith.constant 0 : i32
    return %c0_i32, %c0_i32_0 : i32, i32
  }
  func.func @transform_2(%arg0: i32) -> (i32, i32) {
    %c0_i32 = arith.constant 0 : i32
    %c0_i32_0 = arith.constant 0 : i32
    %c0_i32_1 = arith.constant 0 : i32
    return %c0_i32, %c0_i32_0 : i32, i32
  }
  func.func @transform_3(%arg0: i32) -> (i32, i32) {
    %c0_i32 = arith.constant 0 : i32
    %c0_i32_0 = arith.constant 0 : i32
    return %arg0, %c0_i32 : i32, i32
  }
}

module attributes {stable_mosaic.version = 11 : i64} {
  func.func @_matmul_bias_kernel(%arg0: i32, %arg1: memref<16x400xbf16, #tpu.memory_space<vmem>>, %arg2: memref<400x128xbf16, #tpu.memory_space<vmem>>, %arg3: memref<1x128xf32, #tpu.memory_space<vmem>>, %arg4: memref<16x128xf32, #tpu.memory_space<vmem>>) attributes {dimension_semantics = [#tpu.dimension_semantics<parallel>], iteration_bounds = array<i64: 2>, scalar_prefetch = 0 : i64, scratch_operands = 0 : i64, tpu.core_type = #tpu.core_type<tc>, window_params = [{transform_indices = @transform_0, window_bounds = array<i64: 16, 400>}, {pipeline_mode = #tpu.pipeline_mode<synchronous>, transform_indices = @transform_1, window_bounds = array<i64: 400, 128>}, {pipeline_mode = #tpu.pipeline_mode<synchronous>, transform_indices = @transform_2, window_bounds = array<i64: 1, 128>}, {transform_indices = @transform_3, window_bounds = array<i64: 16, 128>}]} {
    %c0 = arith.constant 0 : index
    %c0_0 = arith.constant 0 : index
    %0 = vector.load %arg1[%c0, %c0_0] : memref<16x400xbf16, #tpu.memory_space<vmem>>, vector<16x400xbf16>
    %c0_1 = arith.constant 0 : index
    %c0_2 = arith.constant 0 : index
    %1 = vector.load %arg2[%c0_1, %c0_2] : memref<400x128xbf16, #tpu.memory_space<vmem>>, vector<400x128xbf16>
    %cst = arith.constant dense<0.000000e+00> : vector<16x128xf32>
    %2 = tpu.matmul %0, %1, %cst {dimension_numbers = #tpu.dot_dimension_numbers<[1], [0], [0], [1], [0, 0, 1, 1], [], []>} : vector<16x400xbf16>, vector<400x128xbf16>, vector<16x128xf32> -> vector<16x128xf32>
    %c0_3 = arith.constant 0 : index
    %c0_4 = arith.constant 0 : index
    %3 = vector.load %arg3[%c0_3, %c0_4] : memref<1x128xf32, #tpu.memory_space<vmem>>, vector<1x128xf32>
    %4 = vector.broadcast %3 : vector<1x128xf32> to vector<16x128xf32>
    %5 = arith.addf %2, %4 : vector<16x128xf32>
    %c0_5 = arith.constant 0 : index
    %c0_6 = arith.constant 0 : index
    %6 = vector.load %arg4[%c0_5, %c0_6] : memref<16x128xf32, #tpu.memory_space<vmem>>, vector<16x128xf32>
    tpu.vector_store %arg4[%c0_5, %c0_6], %5 {strides = array<i32>} : memref<16x128xf32, #tpu.memory_space<vmem>>, vector<16x128xf32>,
    return
  }
  func.func @transform_0(%arg0: i32) -> (i32, i32) {
    %c0_i32 = arith.constant 0 : i32
    %c0_i32_0 = arith.constant 0 : i32
    return %arg0, %c0_i32 : i32, i32
  }
  func.func @transform_1(%arg0: i32) -> (i32, i32) {
    %c0_i32 = arith.constant 0 : i32
    %c0_i32_0 = arith.constant 0 : i32
    %c0_i32_1 = arith.constant 0 : i32
    return %c0_i32, %c0_i32_0 : i32, i32
  }
  func.func @transform_2(%arg0: i32) -> (i32, i32) {
    %c0_i32 = arith.constant 0 : i32
    %c0_i32_0 = arith.constant 0 : i32
    %c0_i32_1 = arith.constant 0 : i32
    return %c0_i32, %c0_i32_0 : i32, i32
  }
  func.func @transform_3(%arg0: i32) -> (i32, i32) {
    %c0_i32 = arith.constant 0 : i32
    %c0_i32_0 = arith.constant 0 : i32
    return %arg0, %c0_i32 : i32, i32
  }
}

module attributes {stable_mosaic.version = 11 : i64} {
  func.func @_fc_logsoftmax_kernel(%arg0: i32, %arg1: memref<8x1408xbf16, #tpu.memory_space<vmem>>, %arg2: memref<1408x128xbf16, #tpu.memory_space<vmem>>, %arg3: memref<1x128xf32, #tpu.memory_space<vmem>>, %arg4: memref<8x128xf32, #tpu.memory_space<vmem>>) attributes {dimension_semantics = [#tpu.dimension_semantics<arbitrary>], iteration_bounds = array<i64: 1>, scalar_prefetch = 0 : i64, scratch_operands = 0 : i64, tpu.core_type = #tpu.core_type<tc>, window_params = [{pipeline_mode = #tpu.pipeline_mode<synchronous>, transform_indices = @transform_0, window_bounds = array<i64: 8, 1408>}, {pipeline_mode = #tpu.pipeline_mode<synchronous>, transform_indices = @transform_1, window_bounds = array<i64: 1408, 128>}, {pipeline_mode = #tpu.pipeline_mode<synchronous>, transform_indices = @transform_2, window_bounds = array<i64: 1, 128>}, {pipeline_mode = #tpu.pipeline_mode<synchronous>, transform_indices = @transform_3, window_bounds = array<i64: 8, 128>}]} {
    %c0 = arith.constant 0 : index
    %c0_0 = arith.constant 0 : index
    %0 = vector.load %arg1[%c0, %c0_0] : memref<8x1408xbf16, #tpu.memory_space<vmem>>, vector<8x1408xbf16>
    %c0_1 = arith.constant 0 : index
    %c0_2 = arith.constant 0 : index
    %1 = vector.load %arg2[%c0_1, %c0_2] : memref<1408x128xbf16, #tpu.memory_space<vmem>>, vector<1408x128xbf16>
    %cst = arith.constant dense<0.000000e+00> : vector<8x128xf32>
    %2 = tpu.matmul %0, %1, %cst {dimension_numbers = #tpu.dot_dimension_numbers<[1], [0], [0], [1], [0, 0, 1, 1], [], []>} : vector<8x1408xbf16>, vector<1408x128xbf16>, vector<8x128xf32> -> vector<8x128xf32>
    %c0_3 = arith.constant 0 : index
    %c0_4 = arith.constant 0 : index
    %3 = vector.load %arg3[%c0_3, %c0_4] : memref<1x128xf32, #tpu.memory_space<vmem>>, vector<1x128xf32>
    %4 = vector.broadcast %3 : vector<1x128xf32> to vector<8x128xf32>
    %5 = arith.addf %2, %4 : vector<8x128xf32>
    %6 = tpu.iota {dimensions = array<i32: 1>} : vector<8x128xi32>
    %c10_i32 = arith.constant 10 : i32
    %7 = vector.broadcast %c10_i32 : i32 to vector<8x128xi32>
    %8 = arith.cmpi slt, %6, %7 : vector<8x128xi32>
    %cst_5 = arith.constant -1.000000e+30 : f32
    %9 = vector.broadcast %cst_5 : f32 to vector<8x128xf32>
    %10 = arith.select %8, %5, %9 : vector<8x128xi1>, vector<8x128xf32>
    %cst_6 = arith.constant dense<0xFF800000> : vector<8xf32>
    %11 = vector.multi_reduction <maximumf>, %10, %cst_6 [1] : vector<8x128xf32> to vector<8xf32>
    %12 = vector.shape_cast %11 : vector<8xf32> to vector<8x1xf32>
    %13 = vector.broadcast %12 : vector<8x1xf32> to vector<8x128xf32>
    %14 = arith.subf %10, %13 : vector<8x128xf32>
    %15 = math.exp %14 : vector<8x128xf32>
    %cst_7 = arith.constant dense<0.000000e+00> : vector<8xf32>
    %16 = vector.multi_reduction <add>, %15, %cst_7 [1] : vector<8x128xf32> to vector<8xf32>
    %17 = vector.shape_cast %16 : vector<8xf32> to vector<8x1xf32>
    %18 = math.log %17 : vector<8x1xf32>
    %19 = vector.broadcast %18 : vector<8x1xf32> to vector<8x128xf32>
    %20 = arith.subf %14, %19 : vector<8x128xf32>
    %c0_8 = arith.constant 0 : index
    %c0_9 = arith.constant 0 : index
    %21 = vector.load %arg4[%c0_8, %c0_9] : memref<8x128xf32, #tpu.memory_space<vmem>>, vector<8x128xf32>
    tpu.vector_store %arg4[%c0_8, %c0_9], %20 {strides = array<i32>} : memref<8x128xf32, #tpu.memory_space<vmem>>, vector<8x128xf32>,
    return
  }
  func.func @transform_0(%arg0: i32) -> (i32, i32) {
    %c0_i32 = arith.constant 0 : i32
    %c0_i32_0 = arith.constant 0 : i32
    %c0_i32_1 = arith.constant 0 : i32
    return %c0_i32, %c0_i32_0 : i32, i32
  }
  func.func @transform_1(%arg0: i32) -> (i32, i32) {
    %c0_i32 = arith.constant 0 : i32
    %c0_i32_0 = arith.constant 0 : i32
    %c0_i32_1 = arith.constant 0 : i32
    return %c0_i32, %c0_i32_0 : i32, i32
  }
  func.func @transform_2(%arg0: i32) -> (i32, i32) {
    %c0_i32 = arith.constant 0 : i32
    %c0_i32_0 = arith.constant 0 : i32
    %c0_i32_1 = arith.constant 0 : i32
    return %c0_i32, %c0_i32_0 : i32, i32
  }
  func.func @transform_3(%arg0: i32) -> (i32, i32) {
    %c0_i32 = arith.constant 0 : i32
    %c0_i32_0 = arith.constant 0 : i32
    %c0_i32_1 = arith.constant 0 : i32
    return %c0_i32, %c0_i32_0 : i32, i32
  }
}

</mosaic_0001>

<bundles_post_ra>
// kernel: net_forward.11
= control target key start
LH: loop header
LB: loop body
LE: loop exit
PB: predicated region body
PF: predicated region fallthrough
CT: control target
= control target key end

     0   :  { %s1859_s12 = smov 0   ;;  %s1861_s13 = smov 0   ;;  %s2310_s0 = inlined_call_operand.vmem [shape: bf16[1152,25], index: 0, kind: input, shape index: {}]   ;;  %s2311_s1 = inlined_call_operand.vmem [shape: bf16[25,128], index: 1, kind: input, shape index: {}]   ;;  %s2312_s2 = inlined_call_operand.vmem [shape: f32[1,128], index: 2, kind: input, shape index: {}]   ;;  %s2313_s3 = inlined_call_operand.vmem [shape: f32[1152,128], index: 3, kind: output, shape index: {}]  }
   0x1   :  { %s1863_s14 = smov 0  }
   0x2 LB: > { %s1872_s15 = sadd.s32 4294967295, %s1804_s14   ;;  %s1874_s16 = sadd.s32 1, %s1804_s14   ;;  %s1804_s14 = sphi %s1863_s14, %s2322_s14   ;;  %s1800_s13 = sphi %s1861_s13, %s2321_s13   ;;  %s1796_s12 = sphi %s1859_s12, %s2320_s12  }
   0x3   : > { %s85_s17 = ssub.s32 %s1804_s14, %s1874_s16  ;;  %s88_s18 = sadd.s32 1, %s1800_s13 }
   0x4   : > { %p86_p0 = scmp.eq.s32.totalorder %s85_s17, 0  ;;  %p98_p1 = scmp.ne.s32.totalorder %s1800_s13, %s1796_s12 }
   0x5   : > { %p99_p2 = scmp.eq.s32.totalorder %s1872_s15, 2  ;;  %p1430_p3 = scmp.ge.s32.totalorder %s1804_s14, 1 }
   0x6   : > { %s1882_s19 = scalar_select %p86_p0, %s1800_s13, %s88_s18  }
   0x7   : > { %p1884_p4 = por %p99_p2, %p98_p1  ;;  %p146_p5 = scmp.lt.s32.totalorder %s1804_s14, 4 }
   0x9   : > { %p147_p6 = pnand %p1430_p3, %p146_p5 }
   0xa   : > { %v1716_v0 = vld [vmem:[%s2311_s1] sm:$0xff] (!%p147_p6)   ;;  %vm536_vm0 = vcmask (!%p147_p6), 1043456   ;;  %v1717_v1 = vld [vmem:[%s2311_s1 + $0x8] sm:$0x1f] (!%p147_p6)   ;;  %vm537_vm1 = vcmask (!%p147_p6), 1044480   ;;  %s1895_s25 = sshll.u32 (!%p147_p6), %s1872_s15, 6 }
   0xb   : > { %150 = sbr.rel (%p147_p6) target bundleno = 373 (0x175), region = 32  ;;  %1555 = vmatprep.subr.bf16.mxu0 (!%p147_p6), %v1716_v0  ;;  %1623 = vmatprep.subr.bf16.mxu1 (!%p147_p6), %v1716_v0  ;;  %v1838_v2 = vmov (!%p147_p6), 65535   ;;  %p178_p7 = scmp.lt.s32.totalorder (!%p147_p6), %s1895_s25, 143  ;;  %vm439_vm2 = vcmask (!%p147_p6), 203776   ;;  %v1972_v38 = vld [vmem:[%s2312_s2] ss:$0 sm:$0xff] (!%p147_p6) }
   0xc   : > { %1556 = vmatpush3.bf16.msra.mxu0 (!%p147_p6), %v1716_v0  ;;  %1625 = vmatpush3.bf16.msra.mxu1 (!%p147_p6), %v1716_v0  ;;  %v538_v3 = vsel (!%p147_p6), %vm536_vm0, 4294967295, %v1838_v2  ;;  %s170_s4 = sand.u32 (!%p147_p6), 1, %s1796_s12  }
   0xd   : > { %v539_v4 = vsel (!%p147_p6), %vm537_vm1, %v538_v3, 0  ;;  %s1431_s7 = sshll.u32 (!%p147_p6), %s170_s4, 9 }
   0xe   : > { %v541_v5 = vand.u32 (!%p147_p6), %v1717_v1, %v539_v4  ;;  %s1981_s8 = scalar_lea.vmem (!%p147_p6), [#allocation2], %s1431_s7  }
  0x10   : > { %1557 = vmatprep.subr.bf16.mxu0 (!%p147_p6), %v541_v5  ;;  %1624 = vmatprep.subr.bf16.mxu1 (!%p147_p6), %v541_v5 }
  0x11   : > { %1558 = vmatpush3.bf16.msra.mxu0 (!%p147_p6), %v541_v5  ;;  %1626 = vmatpush3.bf16.msra.mxu1 (!%p147_p6), %v541_v5 }
  0x12   : > { %s179_s26 = scalar_select %p178_p7, %s1895_s25, 143 }
  0x13   : > { %s968_s9 = ssub.s32 (%p1884_p4), 144, %s1895_s25  ;;  %s1518_s10 = sshll.u32 (%p1884_p4), %s1872_s15, 9 }
  0x14   : > { %s1433_s27 = sshll.u32 %s179_s26, 2  ;;  %p969_p8 = scmp.lt.s32.totalorder (%p1884_p4), %s968_s9, 64 }
  0x15   : > { %s1902_s30 = scalar_lea.vmem %s2310_s0, %s1433_s27  ;;  %s2111_s14 = scalar_lea.vmem (%p1884_p4), %s2313_s3, %s1518_s10  }
  0x16   : > { %v1718_v6 = vld [vmem:[%s1902_s30] sm:$0xff]   ;;  %v1720_v8 = vld [vmem:[%s1902_s30 + $0x8] sm:$0xff]   ;;  %v1722_v10 = vld [vmem:[%s1902_s30 + $0x10] sm:$0xff]  }
  0x17   : > { %v1719_v7 = vld [vmem:[%s1902_s30 + $0x80] sm:$0xff]   ;;  %1559 = vmatprep.mubr.msk.bf16.mxu0 %vm439_vm2, %v1718_v6  ;;  %v1721_v9 = vld [vmem:[%s1902_s30 + $0x88] sm:$0xff]   ;;  %v1723_v11 = vld [vmem:[%s1902_s30 + $0x90] sm:$0xff]  }
  0x18   : > { %1591 = vmatprep.mubr.msk.bf16.mxu1 %vm439_vm2, %v1719_v7  ;;  %1560 = vmatmul.mubr.msk.bf16.vlgmr.msra.gmra.mrb[0].mxu0 %vm439_vm2, %v1720_v8  ;;  %v1724_v12 = vld [vmem:[%s1902_s30 + $0x18] sm:$0xff]   ;;  %v1726_v14 = vld [vmem:[%s1902_s30 + $0x20] sm:$0xff]   ;;  %v1728_v16 = vld [vmem:[%s1902_s30 + $0x28] sm:$0xff]  }
  0x19   : > { %1592 = vmatmul.mubr.msk.bf16.vlgmr.msra.gmra.mrb[0].mxu1 %vm439_vm2, %v1721_v9  ;;  %1563 = vmatprep.mubr.msk.bf16.mxu0 %vm439_vm2, %v1722_v10  ;;  %v1725_v13 = vld [vmem:[%s1902_s30 + $0x98] sm:$0xff]   ;;  %v1727_v15 = vld [vmem:[%s1902_s30 + $0xa0] sm:$0xff]   ;;  %v1729_v17 = vld [vmem:[%s1902_s30 + $0xa8] sm:$0xff]  }
  0x1a   : > { %1595 = vmatprep.mubr.msk.bf16.mxu1 %vm439_vm2, %v1723_v11  ;;  %v1730_v18 = vld [vmem:[%s1902_s30 + $0x30] sm:$0xff]   ;;  %v1732_v20 = vld [vmem:[%s1902_s30 + $0x38] sm:$0xff]   ;;  %v1734_v22 = vld [vmem:[%s1902_s30 + $0x40] sm:$0xff]  }
  0x1b   : > { %v1731_v19 = vld [vmem:[%s1902_s30 + $0xb0] sm:$0xff]   ;;  %v1733_v21 = vld [vmem:[%s1902_s30 + $0xb8] sm:$0xff]   ;;  %v1735_v23 = vld [vmem:[%s1902_s30 + $0xc0] sm:$0xff]  }
  0x1c   : > { %v1736_v24 = vld [vmem:[%s1902_s30 + $0x48] sm:$0xff]   ;;  %v1738_v26 = vld [vmem:[%s1902_s30 + $0x50] sm:$0xff]   ;;  %v1740_v28 = vld [vmem:[%s1902_s30 + $0x58] sm:$0xff]  }
  0x1d   : > { %v1737_v25 = vld [vmem:[%s1902_s30 + $0xc8] sm:$0xff]   ;;  %v1739_v27 = vld [vmem:[%s1902_s30 + $0xd0] sm:$0xff]   ;;  %v1741_v29 = vld [vmem:[%s1902_s30 + $0xd8] sm:$0xff]  }
  0x1e   : > { %v1742_v30 = vld [vmem:[%s1902_s30 + $0x60] sm:$0xff]   ;;  %v1744_v32 = vld [vmem:[%s1902_s30 + $0x68] sm:$0xff]   ;;  %v1746_v34 = vld [vmem:[%s1902_s30 + $0x70] sm:$0xff]  }
  0x1f   : > { %v1743_v31 = vld [vmem:[%s1902_s30 + $0xe0] sm:$0xff]   ;;  %v1745_v33 = vld [vmem:[%s1902_s30 + $0xe8] sm:$0xff]   ;;  %v1747_v35 = vld [vmem:[%s1902_s30 + $0xf0] sm:$0xff]  }
  0x20   : > { %1564 = vmatmul.mubr.msk.bf16.gmra.mrb[4].mxu0 %vm439_vm2, %v1724_v12  ;;  %v1748_v36 = vld [vmem:[%s1902_s30 + $0x78] sm:$0xff]  }
  0x21   : > { %1596 = vmatmul.mubr.msk.bf16.gmra.mrb[4].mxu1 %vm439_vm2, %v1725_v13  ;;  %1567 = vmatprep.mubr.msk.bf16.mxu0 %vm439_vm2, %v1726_v14  ;;  %v1749_v37 = vld [vmem:[%s1902_s30 + $0xf8] sm:$0xff]  }
  0x22   : > { %1599 = vmatprep.mubr.msk.bf16.mxu1 %vm439_vm2, %v1727_v15 }
  0x28   : > { %1568 = vmatmul.mubr.msk.bf16.gmra.mrb[8].mxu0 %vm439_vm2, %v1728_v16 }
  0x29   : > { %1600 = vmatmul.mubr.msk.bf16.gmra.mrb[8].mxu1 %vm439_vm2, %v1729_v17  ;;  %1571 = vmatprep.mubr.msk.bf16.mxu0 %vm439_vm2, %v1730_v18 }
  0x2a   : > { %1603 = vmatprep.mubr.msk.bf16.mxu1 %vm439_vm2, %v1731_v19 }
  0x30   : > { %1572 = vmatmul.mubr.msk.bf16.gmra.mrb[12].mxu0 %vm439_vm2, %v1732_v20 }
  0x31   : > { %1604 = vmatmul.mubr.msk.bf16.gmra.mrb[12].mxu1 %vm439_vm2, %v1733_v21  ;;  %1575 = vmatprep.mubr.msk.bf16.mxu0 %vm439_vm2, %v1734_v22 }
  0x32   : > { %1607 = vmatprep.mubr.msk.bf16.mxu1 %vm439_vm2, %v1735_v23 }
  0x38   : > { %1576 = vmatmul.mubr.msk.bf16.gmra.mrb[16].mxu0 %vm439_vm2, %v1736_v24 }
  0x39   : > { %1608 = vmatmul.mubr.msk.bf16.gmra.mrb[16].mxu1 %vm439_vm2, %v1737_v25  ;;  %1579 = vmatprep.mubr.msk.bf16.mxu0 %vm439_vm2, %v1738_v26 }
  0x3a   : > { %1611 = vmatprep.mubr.msk.bf16.mxu1 %vm439_vm2, %v1739_v27 }
  0x40   : > { %1580 = vmatmul.mubr.msk.bf16.gmra.mrb[20].mxu0 %vm439_vm2, %v1740_v28 }
  0x41   : > { %1612 = vmatmul.mubr.msk.bf16.gmra.mrb[20].mxu1 %vm439_vm2, %v1741_v29  ;;  %1583 = vmatprep.mubr.msk.bf16.mxu0 %vm439_vm2, %v1742_v30 }
  0x42   : > { %1615 = vmatprep.mubr.msk.bf16.mxu1 %vm439_vm2, %v1743_v31 }
  0x48   : > { %1584 = vmatmul.mubr.msk.bf16.gmra.mrb[24].mxu0 %vm439_vm2, %v1744_v32 }
  0x49   : > { %1616 = vmatmul.mubr.msk.bf16.gmra.mrb[24].mxu1 %vm439_vm2, %v1745_v33  ;;  %1587 = vmatprep.mubr.msk.bf16.mxu0 %vm439_vm2, %v1746_v34 }
  0x4a   : > { %1619 = vmatprep.mubr.msk.bf16.mxu1 %vm439_vm2, %v1747_v35 }
  0x50   : > { %1588 = vmatmul.mubr.msk.bf16.gmra.mrb[28].mxu0 %vm439_vm2, %v1748_v36 }
  0x51   : > { %1620 = vmatmul.mubr.msk.bf16.gmra.mrb[28].mxu1 %vm439_vm2, %v1749_v37 }
  0xeb   : > { %v1561_v39 = vpop.f32.mrb[0].mxu0 }
  0xec   : > { %v586_v40 = vadd.f32 %v1561_v39, %v1972_v38  ;;  %v1593_v41 = vpop.f32.mrb[0].mxu1  ;;  %v577_v42 = vpop.f32.mrb[1].mxu0 }
  0xed   : > { %v714_v43 = vadd.f32 %v1593_v41, %v1972_v38  ;;  %v578_v44 = vadd.f32 %v1972_v38, %v577_v42  ;;  %v705_v45 = vpop.f32.mrb[1].mxu1  ;;  %v1562_v46 = vpop.f32.mrb[2].mxu0 }
  0xee   : > { %v834_v47 = vmax.f32 %v586_v40, 0.0  ;;  %v706_v48 = vadd.f32 %v1972_v38, %v705_v45  ;;  %v589_v49 = vadd.f32 %v1562_v46, %v1972_v38  ;;  %v1594_v50 = vpop.f32.mrb[2].mxu1  ;;  %v580_v51 = vpop.f32.mrb[3].mxu0 }
  0xef   : > { %v866_v52 = vmax.f32 %v714_v43, 0.0  ;;  %v832_v53 = vmax.f32 %v578_v44, 0.0  ;;  %v717_v54 = vadd.f32 %v1594_v50, %v1972_v38  ;;  %v581_v55 = vadd.f32 %v1972_v38, %v580_v51  ;;  %v708_v56 = vpop.f32.mrb[3].mxu1 }
  0xf0   : > { %898 = vst [vmem:[%s1981_s8 + $0x10] sm:$0xff] %v834_v47  ;;  %v864_v57 = vmax.f32 %v706_v48, 0.0  ;;  %v835_v58 = vmax.f32 %v589_v49, 0.0  ;;  %v709_v59 = vadd.f32 %v1972_v38, %v708_v56 }
  0xf1   : > { %930 = vst [vmem:[%s1981_s8 + $0x110] sm:$0xff] %v866_v52  ;;  %896 = vst [vmem:[%s1981_s8] sm:$0xff] %v832_v53  ;;  %v867_v60 = vmax.f32 %v717_v54, 0.0  ;;  %v833_v61 = vmax.f32 %v581_v55, 0.0 }
  0xf2   : > { %928 = vst [vmem:[%s1981_s8 + $0x100] sm:$0xff] %v864_v57  ;;  %899 = vst [vmem:[%s1981_s8 + $0x18] sm:$0xff] %v835_v58  ;;  %v865_v62 = vmax.f32 %v709_v59, 0.0 }
  0xf3   : > { %931 = vst [vmem:[%s1981_s8 + $0x118] sm:$0xff] %v867_v60  ;;  %897 = vst [vmem:[%s1981_s8 + $0x8] sm:$0xff] %v833_v61  ;;  %v1565_v63 = vpop.f32.mrb[4].mxu0 }
  0xf4   : > { %929 = vst [vmem:[%s1981_s8 + $0x108] sm:$0xff] %v865_v62  ;;  %v602_v0 = vadd.f32 %v1565_v63, %v1972_v38  ;;  %v1597_v1 = vpop.f32.mrb[4].mxu1  ;;  %v593_v2 = vpop.f32.mrb[5].mxu0 }
  0xf5   : > { %v730_v3 = vadd.f32 %v1597_v1, %v1972_v38  ;;  %v594_v4 = vadd.f32 %v1972_v38, %v593_v2  ;;  %v721_v5 = vpop.f32.mrb[5].mxu1  ;;  %v1566_v6 = vpop.f32.mrb[6].mxu0 }
  0xf6   : > { %v838_v7 = vmax.f32 %v602_v0, 0.0  ;;  %v722_v8 = vadd.f32 %v1972_v38, %v721_v5  ;;  %v605_v9 = vadd.f32 %v1566_v6, %v1972_v38  ;;  %v1598_v10 = vpop.f32.mrb[6].mxu1  ;;  %v596_v11 = vpop.f32.mrb[7].mxu0 }
  0xf7   : > { %v870_v12 = vmax.f32 %v730_v3, 0.0  ;;  %v836_v13 = vmax.f32 %v594_v4, 0.0  ;;  %v733_v14 = vadd.f32 %v1598_v10, %v1972_v38  ;;  %v597_v15 = vadd.f32 %v1972_v38, %v596_v11  ;;  %v724_v16 = vpop.f32.mrb[7].mxu1 }
  0xf8   : > { %902 = vst [vmem:[%s1981_s8 + $0x30] sm:$0xff] %v838_v7  ;;  %v868_v17 = vmax.f32 %v722_v8, 0.0  ;;  %v839_v18 = vmax.f32 %v605_v9, 0.0  ;;  %v725_v19 = vadd.f32 %v1972_v38, %v724_v16 }
  0xf9   : > { %934 = vst [vmem:[%s1981_s8 + $0x130] sm:$0xff] %v870_v12  ;;  %900 = vst [vmem:[%s1981_s8 + $0x20] sm:$0xff] %v836_v13  ;;  %v871_v20 = vmax.f32 %v733_v14, 0.0  ;;  %v837_v21 = vmax.f32 %v597_v15, 0.0 }
  0xfa   : > { %932 = vst [vmem:[%s1981_s8 + $0x120] sm:$0xff] %v868_v17  ;;  %903 = vst [vmem:[%s1981_s8 + $0x38] sm:$0xff] %v839_v18  ;;  %v869_v22 = vmax.f32 %v725_v19, 0.0 }
  0xfb   : > { %935 = vst [vmem:[%s1981_s8 + $0x138] sm:$0xff] %v871_v20  ;;  %901 = vst [vmem:[%s1981_s8 + $0x28] sm:$0xff] %v837_v21  ;;  %v1569_v23 = vpop.f32.mrb[8].mxu0 }
  0xfc   : > { %933 = vst [vmem:[%s1981_s8 + $0x128] sm:$0xff] %v869_v22  ;;  %v618_v24 = vadd.f32 %v1569_v23, %v1972_v38  ;;  %v1601_v25 = vpop.f32.mrb[8].mxu1  ;;  %v609_v26 = vpop.f32.mrb[9].mxu0 }
  0xfd   : > { %v746_v27 = vadd.f32 %v1601_v25, %v1972_v38  ;;  %v610_v28 = vadd.f32 %v1972_v38, %v609_v26  ;;  %v737_v29 = vpop.f32.mrb[9].mxu1  ;;  %v1570_v30 = vpop.f32.mrb[10].mxu0 }
  0xfe   : > { %v842_v31 = vmax.f32 %v618_v24, 0.0  ;;  %v738_v32 = vadd.f32 %v1972_v38, %v737_v29  ;;  %v621_v33 = vadd.f32 %v1570_v30, %v1972_v38  ;;  %v1602_v34 = vpop.f32.mrb[10].mxu1  ;;  %v612_v35 = vpop.f32.mrb[11].mxu0 }
  0xff   : > { %v874_v36 = vmax.f32 %v746_v27, 0.0  ;;  %v840_v37 = vmax.f32 %v610_v28, 0.0  ;;  %v749_v39 = vadd.f32 %v1602_v34, %v1972_v38  ;;  %v613_v40 = vadd.f32 %v1972_v38, %v612_v35  ;;  %v740_v41 = vpop.f32.mrb[11].mxu1 }
 0x100   : > { %906 = vst [vmem:[%s1981_s8 + $0x50] sm:$0xff] %v842_v31  ;;  %v872_v42 = vmax.f32 %v738_v32, 0.0  ;;  %v843_v43 = vmax.f32 %v621_v33, 0.0  ;;  %v741_v44 = vadd.f32 %v1972_v38, %v740_v41 }
 0x101   : > { %938 = vst [vmem:[%s1981_s8 + $0x150] sm:$0xff] %v874_v36  ;;  %904 = vst [vmem:[%s1981_s8 + $0x40] sm:$0xff] %v840_v37  ;;  %v875_v45 = vmax.f32 %v749_v39, 0.0  ;;  %v841_v46 = vmax.f32 %v613_v40, 0.0 }
 0x102   : > { %936 = vst [vmem:[%s1981_s8 + $0x140] sm:$0xff] %v872_v42  ;;  %907 = vst [vmem:[%s1981_s8 + $0x58] sm:$0xff] %v843_v43  ;;  %v873_v47 = vmax.f32 %v741_v44, 0.0 }
 0x103   : > { %939 = vst [vmem:[%s1981_s8 + $0x158] sm:$0xff] %v875_v45  ;;  %905 = vst [vmem:[%s1981_s8 + $0x48] sm:$0xff] %v841_v46  ;;  %v1573_v48 = vpop.f32.mrb[12].mxu0 }
 0x104   : > { %937 = vst [vmem:[%s1981_s8 + $0x148] sm:$0xff] %v873_v47  ;;  %v634_v49 = vadd.f32 %v1573_v48, %v1972_v38  ;;  %v1605_v50 = vpop.f32.mrb[12].mxu1  ;;  %v625_v51 = vpop.f32.mrb[13].mxu0 }
 0x105   : > { %v762_v52 = vadd.f32 %v1605_v50, %v1972_v38  ;;  %v626_v53 = vadd.f32 %v1972_v38, %v625_v51  ;;  %v753_v54 = vpop.f32.mrb[13].mxu1  ;;  %v1574_v55 = vpop.f32.mrb[14].mxu0 }
 0x106   : > { %v846_v56 = vmax.f32 %v634_v49, 0.0  ;;  %v754_v57 = vadd.f32 %v1972_v38, %v753_v54  ;;  %v637_v58 = vadd.f32 %v1574_v55, %v1972_v38  ;;  %v1606_v59 = vpop.f32.mrb[14].mxu1  ;;  %v628_v60 = vpop.f32.mrb[15].mxu0 }
 0x107   : > { %v878_v61 = vmax.f32 %v762_v52, 0.0  ;;  %v844_v62 = vmax.f32 %v626_v53, 0.0  ;;  %v765_v63 = vadd.f32 %v1606_v59, %v1972_v38  ;;  %v629_v0 = vadd.f32 %v1972_v38, %v628_v60  ;;  %v756_v1 = vpop.f32.mrb[15].mxu1 }
 0x108   : > { %910 = vst [vmem:[%s1981_s8 + $0x70] sm:$0xff] %v846_v56  ;;  %v876_v2 = vmax.f32 %v754_v57, 0.0  ;;  %v847_v3 = vmax.f32 %v637_v58, 0.0  ;;  %v757_v4 = vadd.f32 %v1972_v38, %v756_v1 }
 0x109   : > { %942 = vst [vmem:[%s1981_s8 + $0x170] sm:$0xff] %v878_v61  ;;  %908 = vst [vmem:[%s1981_s8 + $0x60] sm:$0xff] %v844_v62  ;;  %v879_v5 = vmax.f32 %v765_v63, 0.0  ;;  %v845_v6 = vmax.f32 %v629_v0, 0.0 }
 0x10a   : > { %940 = vst [vmem:[%s1981_s8 + $0x160] sm:$0xff] %v876_v2  ;;  %911 = vst [vmem:[%s1981_s8 + $0x78] sm:$0xff] %v847_v3  ;;  %v877_v7 = vmax.f32 %v757_v4, 0.0 }
 0x10b   : > { %943 = vst [vmem:[%s1981_s8 + $0x178] sm:$0xff] %v879_v5  ;;  %909 = vst [vmem:[%s1981_s8 + $0x68] sm:$0xff] %v845_v6  ;;  %v1577_v8 = vpop.f32.mrb[16].mxu0 }
 0x10c   : > { %941 = vst [vmem:[%s1981_s8 + $0x168] sm:$0xff] %v877_v7  ;;  %v650_v9 = vadd.f32 %v1577_v8, %v1972_v38  ;;  %v1609_v10 = vpop.f32.mrb[16].mxu1  ;;  %v641_v11 = vpop.f32.mrb[17].mxu0 }
 0x10d   : > { %v778_v12 = vadd.f32 %v1609_v10, %v1972_v38  ;;  %v642_v13 = vadd.f32 %v1972_v38, %v641_v11  ;;  %v769_v14 = vpop.f32.mrb[17].mxu1  ;;  %v1578_v15 = vpop.f32.mrb[18].mxu0 }
 0x10e   : > { %v850_v16 = vmax.f32 %v650_v9, 0.0  ;;  %v770_v17 = vadd.f32 %v1972_v38, %v769_v14  ;;  %v653_v18 = vadd.f32 %v1578_v15, %v1972_v38  ;;  %v1610_v19 = vpop.f32.mrb[18].mxu1  ;;  %v644_v20 = vpop.f32.mrb[19].mxu0 }
 0x10f   : > { %v882_v21 = vmax.f32 %v778_v12, 0.0  ;;  %v848_v22 = vmax.f32 %v642_v13, 0.0  ;;  %v781_v23 = vadd.f32 %v1610_v19, %v1972_v38  ;;  %v645_v24 = vadd.f32 %v1972_v38, %v644_v20  ;;  %v772_v25 = vpop.f32.mrb[19].mxu1 }
 0x110   : > { %914 = vst [vmem:[%s1981_s8 + $0x90] sm:$0xff] %v850_v16  ;;  %v880_v26 = vmax.f32 %v770_v17, 0.0  ;;  %v851_v27 = vmax.f32 %v653_v18, 0.0  ;;  %v773_v28 = vadd.f32 %v1972_v38, %v772_v25 }
 0x111   : > { %946 = vst [vmem:[%s1981_s8 + $0x190] sm:$0xff] %v882_v21  ;;  %912 = vst [vmem:[%s1981_s8 + $0x80] sm:$0xff] %v848_v22  ;;  %v883_v29 = vmax.f32 %v781_v23, 0.0  ;;  %v849_v30 = vmax.f32 %v645_v24, 0.0 }
 0x112   : > { %944 = vst [vmem:[%s1981_s8 + $0x180] sm:$0xff] %v880_v26  ;;  %915 = vst [vmem:[%s1981_s8 + $0x98] sm:$0xff] %v851_v27  ;;  %v881_v31 = vmax.f32 %v773_v28, 0.0 }
 0x113   : > { %947 = vst [vmem:[%s1981_s8 + $0x198] sm:$0xff] %v883_v29  ;;  %913 = vst [vmem:[%s1981_s8 + $0x88] sm:$0xff] %v849_v30  ;;  %v1581_v32 = vpop.f32.mrb[20].mxu0 }
 0x114   : > { %945 = vst [vmem:[%s1981_s8 + $0x188] sm:$0xff] %v881_v31  ;;  %v666_v33 = vadd.f32 %v1581_v32, %v1972_v38  ;;  %v1613_v34 = vpop.f32.mrb[20].mxu1  ;;  %v657_v35 = vpop.f32.mrb[21].mxu0 }
 0x115   : > { %v794_v36 = vadd.f32 %v1613_v34, %v1972_v38  ;;  %v658_v37 = vadd.f32 %v1972_v38, %v657_v35  ;;  %v785_v39 = vpop.f32.mrb[21].mxu1  ;;  %v1582_v40 = vpop.f32.mrb[22].mxu0 }
 0x116   : > { %v854_v41 = vmax.f32 %v666_v33, 0.0  ;;  %v786_v42 = vadd.f32 %v1972_v38, %v785_v39  ;;  %v669_v43 = vadd.f32 %v1582_v40, %v1972_v38  ;;  %v1614_v44 = vpop.f32.mrb[22].mxu1  ;;  %v660_v45 = vpop.f32.mrb[23].mxu0 }
 0x117   : > { %v886_v46 = vmax.f32 %v794_v36, 0.0  ;;  %v852_v47 = vmax.f32 %v658_v37, 0.0  ;;  %v797_v48 = vadd.f32 %v1614_v44, %v1972_v38  ;;  %v661_v49 = vadd.f32 %v1972_v38, %v660_v45  ;;  %v788_v50 = vpop.f32.mrb[23].mxu1 }
 0x118   : > { %918 = vst [vmem:[%s1981_s8 + $0xb0] sm:$0xff] %v854_v41  ;;  %v884_v51 = vmax.f32 %v786_v42, 0.0  ;;  %v855_v52 = vmax.f32 %v669_v43, 0.0  ;;  %v789_v53 = vadd.f32 %v1972_v38, %v788_v50 }
 0x119   : > { %950 = vst [vmem:[%s1981_s8 + $0x1b0] sm:$0xff] %v886_v46  ;;  %916 = vst [vmem:[%s1981_s8 + $0xa0] sm:$0xff] %v852_v47  ;;  %v887_v54 = vmax.f32 %v797_v48, 0.0  ;;  %v853_v55 = vmax.f32 %v661_v49, 0.0 }
 0x11a   : > { %948 = vst [vmem:[%s1981_s8 + $0x1a0] sm:$0xff] %v884_v51  ;;  %919 = vst [vmem:[%s1981_s8 + $0xb8] sm:$0xff] %v855_v52  ;;  %v885_v56 = vmax.f32 %v789_v53, 0.0 }
 0x11b   : > { %951 = vst [vmem:[%s1981_s8 + $0x1b8] sm:$0xff] %v887_v54  ;;  %917 = vst [vmem:[%s1981_s8 + $0xa8] sm:$0xff] %v853_v55  ;;  %v1585_v57 = vpop.f32.mrb[24].mxu0 }
 0x11c   : > { %949 = vst [vmem:[%s1981_s8 + $0x1a8] sm:$0xff] %v885_v56  ;;  %v682_v58 = vadd.f32 %v1585_v57, %v1972_v38  ;;  %v1617_v59 = vpop.f32.mrb[24].mxu1  ;;  %v673_v60 = vpop.f32.mrb[25].mxu0 }
 0x11d   : > { %v810_v61 = vadd.f32 %v1617_v59, %v1972_v38  ;;  %v674_v62 = vadd.f32 %v1972_v38, %v673_v60  ;;  %v801_v63 = vpop.f32.mrb[25].mxu1  ;;  %v1586_v0 = vpop.f32.mrb[26].mxu0 }
 0x11e   : > { %v858_v1 = vmax.f32 %v682_v58, 0.0  ;;  %v802_v2 = vadd.f32 %v1972_v38, %v801_v63  ;;  %v685_v3 = vadd.f32 %v1586_v0, %v1972_v38  ;;  %v1618_v4 = vpop.f32.mrb[26].mxu1  ;;  %v676_v5 = vpop.f32.mrb[27].mxu0 }
 0x11f   : > { %v890_v6 = vmax.f32 %v810_v61, 0.0  ;;  %v856_v7 = vmax.f32 %v674_v62, 0.0  ;;  %v813_v8 = vadd.f32 %v1618_v4, %v1972_v38  ;;  %v677_v9 = vadd.f32 %v1972_v38, %v676_v5  ;;  %v804_v10 = vpop.f32.mrb[27].mxu1 }
 0x120   : > { %922 = vst [vmem:[%s1981_s8 + $0xd0] sm:$0xff] %v858_v1  ;;  %v888_v11 = vmax.f32 %v802_v2, 0.0  ;;  %v859_v12 = vmax.f32 %v685_v3, 0.0  ;;  %v805_v13 = vadd.f32 %v1972_v38, %v804_v10 }
 0x121   : > { %954 = vst [vmem:[%s1981_s8 + $0x1d0] sm:$0xff] %v890_v6  ;;  %920 = vst [vmem:[%s1981_s8 + $0xc0] sm:$0xff] %v856_v7  ;;  %v891_v14 = vmax.f32 %v813_v8, 0.0  ;;  %v857_v15 = vmax.f32 %v677_v9, 0.0 }
 0x122   : > { %952 = vst [vmem:[%s1981_s8 + $0x1c0] sm:$0xff] %v888_v11  ;;  %923 = vst [vmem:[%s1981_s8 + $0xd8] sm:$0xff] %v859_v12  ;;  %v889_v16 = vmax.f32 %v805_v13, 0.0 }
 0x123   : > { %955 = vst [vmem:[%s1981_s8 + $0x1d8] sm:$0xff] %v891_v14  ;;  %921 = vst [vmem:[%s1981_s8 + $0xc8] sm:$0xff] %v857_v15  ;;  %v1589_v17 = vpop.f32.mrb[28].mxu0 }
 0x124   : > { %953 = vst [vmem:[%s1981_s8 + $0x1c8] sm:$0xff] %v889_v16  ;;  %v698_v18 = vadd.f32 %v1589_v17, %v1972_v38  ;;  %v1621_v19 = vpop.f32.mrb[28].mxu1  ;;  %v689_v20 = vpop.f32.mrb[29].mxu0 }
 0x125   : > { %v826_v21 = vadd.f32 %v1621_v19, %v1972_v38  ;;  %v690_v22 = vadd.f32 %v1972_v38, %v689_v20  ;;  %v817_v23 = vpop.f32.mrb[29].mxu1  ;;  %v1590_v24 = vpop.f32.mrb[30].mxu0 }
 0x126   : > { %v862_v25 = vmax.f32 %v698_v18, 0.0  ;;  %v818_v26 = vadd.f32 %v1972_v38, %v817_v23  ;;  %v701_v27 = vadd.f32 %v1590_v24, %v1972_v38  ;;  %v1622_v28 = vpop.f32.mrb[30].mxu1  ;;  %v692_v29 = vpop.f32.mrb[31].mxu0  ;;  %966 = sbr.rel (!%p1884_p4) target bundleno = 373 (0x175), region = 36 }
 0x127   : > { %v894_v30 = vmax.f32 %v826_v21, 0.0  ;;  %v860_v31 = vmax.f32 %v690_v22, 0.0  ;;  %v829_v32 = vadd.f32 %v1622_v28, %v1972_v38  ;;  %v693_v33 = vadd.f32 %v1972_v38, %v692_v29  ;;  %v820_v34 = vpop.f32.mrb[31].mxu1 }
 0x128   : > { %926 = vst [vmem:[%s1981_s8 + $0xf0] sm:$0xff] %v862_v25  ;;  %v892_v35 = vmax.f32 %v818_v26, 0.0  ;;  %v863_v36 = vmax.f32 %v701_v27, 0.0  ;;  %v821_v37 = vadd.f32 %v1972_v38, %v820_v34 }
 0x129   : > { %958 = vst [vmem:[%s1981_s8 + $0x1f0] sm:$0xff] %v894_v30  ;;  %924 = vst [vmem:[%s1981_s8 + $0xe0] sm:$0xff] %v860_v31  ;;  %v895_v39 = vmax.f32 %v829_v32, 0.0  ;;  %v861_v40 = vmax.f32 %v693_v33, 0.0 }
 0x12a   : > { %956 = vst [vmem:[%s1981_s8 + $0x1e0] sm:$0xff] %v892_v35  ;;  %927 = vst [vmem:[%s1981_s8 + $0xf8] sm:$0xff] %v863_v36  ;;  %v893_v41 = vmax.f32 %v821_v37, 0.0 }
 0x12b   : > { %959 = vst [vmem:[%s1981_s8 + $0x1f8] sm:$0xff] %v895_v39  ;;  %925 = vst [vmem:[%s1981_s8 + $0xe8] sm:$0xff] %v861_v40 }
 0x12c   : > { %957 = vst [vmem:[%s1981_s8 + $0x1e8] sm:$0xff] %v893_v41 }
 0x12d   : > { %s2324_s9 = smov (!%p969_p8, %s968_s9), 64 }
 0x12e   : > { %s1503_s17 = sshll.u32 %s2324_s9, 7 }
 0x12f   : > { %p1506_p9 = scmp.eq.s32.totalorder %s1503_s17, 0 }
 0x130   : > { %s2117_s18 = sshrl.u32 (!%p1506_p9), %s2324_s9, 6 }
 0x131   : > { %977 = sbr.rel (%p1506_p9) target bundleno = 373 (0x175), region = 40  ;;  %p1507_p10 = scmp.le.s32.totalorder (!%p1506_p9), %s2117_s18, 0 }
 0x138   : > { %1383 = sbr.rel (%p1507_p10) target bundleno = 352 (0x160), region = 116  ;;  %s2315_s15 = smov (!%p1507_p10), %s2111_s14 }
 0x139   : > { %s2316_s20 = smov (!%p1507_p10), %s1981_s8  ;;  %s2126_s21 = smov (!%p1507_p10), 0  }
 0x13a   : > { %s2128_s22 = smov (!%p1507_p10), 0  }
 0x13f LB: >> { %v1165_v38 = vld [vmem:[%s1812_s20] sm:$0xff]  ;;  %v1167_v42 = vld [vmem:[%s1812_s20 + $0x8] sm:$0xff]  ;;  %v1169_v43 = vld [vmem:[%s1812_s20 + $0x10] sm:$0xff]  ;;  %s1293_s23 = sadd.s32 1, %s1816_s21  ;;  %s1159_s22 = sadd.s32 1, %s1820_s22   ;;  %s1820_s22 = sphi %s2128_s22, %s1159_s22   ;;  %s1816_s21 = sphi %s2126_s21, %s2319_s21   ;;  %s1812_s20 = sphi %s2316_s20, %s2318_s20   ;;  %s1808_s15 = sphi %s2315_s15, %s2317_s15  }
 0x140   : >> { %1166 = vst [vmem:[%s1808_s15] sm:$0xff] %v1165_v38  ;;  %1168 = vst [vmem:[%s1808_s15 + $0x8] sm:$0xff] %v1167_v42  ;;  %v1171_v44 = vld [vmem:[%s1812_s20 + $0x18] sm:$0xff]  ;;  %v1173_v45 = vld [vmem:[%s1812_s20 + $0x20] sm:$0xff]  ;;  %p1294_p11 = scmp.ge.s32.totalorder %s1293_s23, %s2117_s18  ;;  %p1158_p12 = scmp.ge.s32.totalorder %s1159_s22, %s2117_s18 }
 0x141   : >> { %1170 = vst [vmem:[%s1808_s15 + $0x10] sm:$0xff] %v1169_v43  ;;  %v1175_v46 = vld [vmem:[%s1812_s20 + $0x28] sm:$0xff]  ;;  %1172 = vst [vmem:[%s1808_s15 + $0x18] sm:$0xff] %v1171_v44  ;;  %v1177_v47 = vld [vmem:[%s1812_s20 + $0x30] sm:$0xff] }
 0x142   : >> { %1174 = vst [vmem:[%s1808_s15 + $0x20] sm:$0xff] %v1173_v45  ;;  %1176 = vst [vmem:[%s1808_s15 + $0x28] sm:$0xff] %v1175_v46  ;;  %v1179_v48 = vld [vmem:[%s1812_s20 + $0x38] sm:$0xff]  ;;  %v1181_v49 = vld [vmem:[%s1812_s20 + $0x40] sm:$0xff]  ;;  %s2326_s23 = smov (%p1294_p11, %s1293_s23), 0 }
 0x143   : >> { %1178 = vst [vmem:[%s1808_s15 + $0x30] sm:$0xff] %v1177_v47  ;;  %1180 = vst [vmem:[%s1808_s15 + $0x38] sm:$0xff] %v1179_v48  ;;  %v1183_v50 = vld [vmem:[%s1812_s20 + $0x48] sm:$0xff]  ;;  %v1185_v51 = vld [vmem:[%s1812_s20 + $0x50] sm:$0xff]  ;;  %s1508_s24 = sshll.u32 %s2326_s23, 9  ;;  %s2319_s21 = smov %s2326_s23 }
 0x144   : >> { %1182 = vst [vmem:[%s1808_s15 + $0x40] sm:$0xff] %v1181_v49  ;;  %v1187_v52 = vld [vmem:[%s1812_s20 + $0x58] sm:$0xff]  ;;  %1184 = vst [vmem:[%s1808_s15 + $0x48] sm:$0xff] %v1183_v50  ;;  %v1189_v53 = vld [vmem:[%s1812_s20 + $0x60] sm:$0xff]  ;;  %s2184_s25 = scalar_lea.vmem %s1981_s8, %s1508_s24 [#allocation2]   ;;  %s2187_s26 = scalar_lea.vmem %s2111_s14, %s1508_s24  }
 0x145   : >> { %1186 = vst [vmem:[%s1808_s15 + $0x50] sm:$0xff] %v1185_v51  ;;  %1188 = vst [vmem:[%s1808_s15 + $0x58] sm:$0xff] %v1187_v52  ;;  %v1191_v54 = vld [vmem:[%s1812_s20 + $0x68] sm:$0xff]  ;;  %v1193_v55 = vld [vmem:[%s1812_s20 + $0x70] sm:$0xff] }
 0x146   : >> { %1190 = vst [vmem:[%s1808_s15 + $0x60] sm:$0xff] %v1189_v53  ;;  %1192 = vst [vmem:[%s1808_s15 + $0x68] sm:$0xff] %v1191_v54  ;;  %v1195_v56 = vld [vmem:[%s1812_s20 + $0x78] sm:$0xff]  ;;  %v1197_v57 = vld [vmem:[%s1812_s20 + $0x80] sm:$0xff] }
 0x147   : >> { %1194 = vst [vmem:[%s1808_s15 + $0x70] sm:$0xff] %v1193_v55  ;;  %v1199_v58 = vld [vmem:[%s1812_s20 + $0x88] sm:$0xff]  ;;  %1196 = vst [vmem:[%s1808_s15 + $0x78] sm:$0xff] %v1195_v56  ;;  %v1201_v59 = vld [vmem:[%s1812_s20 + $0x90] sm:$0xff] }
 0x148   : >> { %1198 = vst [vmem:[%s1808_s15 + $0x80] sm:$0xff] %v1197_v57  ;;  %1200 = vst [vmem:[%s1808_s15 + $0x88] sm:$0xff] %v1199_v58  ;;  %v1203_v60 = vld [vmem:[%s1812_s20 + $0x98] sm:$0xff]  ;;  %v1205_v61 = vld [vmem:[%s1812_s20 + $0xa0] sm:$0xff] }
 0x149   : >> { %1202 = vst [vmem:[%s1808_s15 + $0x90] sm:$0xff] %v1201_v59  ;;  %1204 = vst [vmem:[%s1808_s15 + $0x98] sm:$0xff] %v1203_v60  ;;  %v1207_v62 = vld [vmem:[%s1812_s20 + $0xa8] sm:$0xff]  ;;  %v1209_v63 = vld [vmem:[%s1812_s20 + $0xb0] sm:$0xff] }
 0x14a   : >> { %1206 = vst [vmem:[%s1808_s15 + $0xa0] sm:$0xff] %v1205_v61  ;;  %v1211_v0 = vld [vmem:[%s1812_s20 + $0xb8] sm:$0xff]  ;;  %1208 = vst [vmem:[%s1808_s15 + $0xa8] sm:$0xff] %v1207_v62  ;;  %v1213_v1 = vld [vmem:[%s1812_s20 + $0xc0] sm:$0xff] }
 0x14b   : >> { %1210 = vst [vmem:[%s1808_s15 + $0xb0] sm:$0xff] %v1209_v63  ;;  %1212 = vst [vmem:[%s1808_s15 + $0xb8] sm:$0xff] %v1211_v0  ;;  %v1215_v2 = vld [vmem:[%s1812_s20 + $0xc8] sm:$0xff]  ;;  %v1217_v3 = vld [vmem:[%s1812_s20 + $0xd0] sm:$0xff] }
 0x14c   : >> { %1214 = vst [vmem:[%s1808_s15 + $0xc0] sm:$0xff] %v1213_v1  ;;  %1216 = vst [vmem:[%s1808_s15 + $0xc8] sm:$0xff] %v1215_v2  ;;  %v1219_v4 = vld [vmem:[%s1812_s20 + $0xd8] sm:$0xff]  ;;  %v1221_v5 = vld [vmem:[%s1812_s20 + $0xe0] sm:$0xff] }
 0x14d   : >> { %1218 = vst [vmem:[%s1808_s15 + $0xd0] sm:$0xff] %v1217_v3  ;;  %v1223_v6 = vld [vmem:[%s1812_s20 + $0xe8] sm:$0xff]  ;;  %1220 = vst [vmem:[%s1808_s15 + $0xd8] sm:$0xff] %v1219_v4  ;;  %v1225_v7 = vld [vmem:[%s1812_s20 + $0xf0] sm:$0xff] }
 0x14e   : >> { %1222 = vst [vmem:[%s1808_s15 + $0xe0] sm:$0xff] %v1221_v5  ;;  %1224 = vst [vmem:[%s1808_s15 + $0xe8] sm:$0xff] %v1223_v6  ;;  %v1227_v8 = vld [vmem:[%s1812_s20 + $0xf8] sm:$0xff]  ;;  %v1229_v9 = vld [vmem:[%s1812_s20 + $0x100] sm:$0xff] }
 0x14f   : >> { %1226 = vst [vmem:[%s1808_s15 + $0xf0] sm:$0xff] %v1225_v7  ;;  %1228 = vst [vmem:[%s1808_s15 + $0xf8] sm:$0xff] %v1227_v8  ;;  %v1231_v10 = vld [vmem:[%s1812_s20 + $0x108] sm:$0xff]  ;;  %v1233_v11 = vld [vmem:[%s1812_s20 + $0x110] sm:$0xff] }
 0x150   : >> { %1230 = vst [vmem:[%s1808_s15 + $0x100] sm:$0xff] %v1229_v9  ;;  %v1235_v12 = vld [vmem:[%s1812_s20 + $0x118] sm:$0xff]  ;;  %1232 = vst [vmem:[%s1808_s15 + $0x108] sm:$0xff] %v1231_v10  ;;  %v1237_v13 = vld [vmem:[%s1812_s20 + $0x120] sm:$0xff] }
 0x151   : >> { %1234 = vst [vmem:[%s1808_s15 + $0x110] sm:$0xff] %v1233_v11  ;;  %1236 = vst [vmem:[%s1808_s15 + $0x118] sm:$0xff] %v1235_v12  ;;  %v1239_v14 = vld [vmem:[%s1812_s20 + $0x128] sm:$0xff]  ;;  %v1241_v15 = vld [vmem:[%s1812_s20 + $0x130] sm:$0xff] }
 0x152   : >> { %1238 = vst [vmem:[%s1808_s15 + $0x120] sm:$0xff] %v1237_v13  ;;  %1240 = vst [vmem:[%s1808_s15 + $0x128] sm:$0xff] %v1239_v14  ;;  %v1243_v16 = vld [vmem:[%s1812_s20 + $0x138] sm:$0xff]  ;;  %v1245_v17 = vld [vmem:[%s1812_s20 + $0x140] sm:$0xff] }
 0x153   : >> { %1242 = vst [vmem:[%s1808_s15 + $0x130] sm:$0xff] %v1241_v15  ;;  %v1247_v18 = vld [vmem:[%s1812_s20 + $0x148] sm:$0xff]  ;;  %1244 = vst [vmem:[%s1808_s15 + $0x138] sm:$0xff] %v1243_v16  ;;  %v1249_v19 = vld [vmem:[%s1812_s20 + $0x150] sm:$0xff] }
 0x154   : >> { %1246 = vst [vmem:[%s1808_s15 + $0x140] sm:$0xff] %v1245_v17  ;;  %1248 = vst [vmem:[%s1808_s15 + $0x148] sm:$0xff] %v1247_v18  ;;  %v1251_v20 = vld [vmem:[%s1812_s20 + $0x158] sm:$0xff]  ;;  %v1253_v21 = vld [vmem:[%s1812_s20 + $0x160] sm:$0xff] }
 0x155   : >> { %1250 = vst [vmem:[%s1808_s15 + $0x150] sm:$0xff] %v1249_v19  ;;  %1252 = vst [vmem:[%s1808_s15 + $0x158] sm:$0xff] %v1251_v20  ;;  %v1255_v22 = vld [vmem:[%s1812_s20 + $0x168] sm:$0xff]  ;;  %v1257_v23 = vld [vmem:[%s1812_s20 + $0x170] sm:$0xff] }
 0x156   : >> { %1254 = vst [vmem:[%s1808_s15 + $0x160] sm:$0xff] %v1253_v21  ;;  %v1259_v24 = vld [vmem:[%s1812_s20 + $0x178] sm:$0xff]  ;;  %1256 = vst [vmem:[%s1808_s15 + $0x168] sm:$0xff] %v1255_v22  ;;  %v1261_v25 = vld [vmem:[%s1812_s20 + $0x180] sm:$0xff] }
 0x157   : >> { %1258 = vst [vmem:[%s1808_s15 + $0x170] sm:$0xff] %v1257_v23  ;;  %1260 = vst [vmem:[%s1808_s15 + $0x178] sm:$0xff] %v1259_v24  ;;  %v1263_v26 = vld [vmem:[%s1812_s20 + $0x188] sm:$0xff]  ;;  %v1265_v27 = vld [vmem:[%s1812_s20 + $0x190] sm:$0xff] }
 0x158   : >> { %1262 = vst [vmem:[%s1808_s15 + $0x180] sm:$0xff] %v1261_v25  ;;  %1264 = vst [vmem:[%s1808_s15 + $0x188] sm:$0xff] %v1263_v26  ;;  %v1267_v28 = vld [vmem:[%s1812_s20 + $0x198] sm:$0xff]  ;;  %v1269_v29 = vld [vmem:[%s1812_s20 + $0x1a0] sm:$0xff] }
 0x159   : >> { %1266 = vst [vmem:[%s1808_s15 + $0x190] sm:$0xff] %v1265_v27  ;;  %v1271_v30 = vld [vmem:[%s1812_s20 + $0x1a8] sm:$0xff]  ;;  %1268 = vst [vmem:[%s1808_s15 + $0x198] sm:$0xff] %v1267_v28  ;;  %v1273_v31 = vld [vmem:[%s1812_s20 + $0x1b0] sm:$0xff]  ;;  %1161 = sbr.rel (!%p1158_p12) target bundleno = 319 (0x13f), region = 122 }
 0x15a   : >> { %1270 = vst [vmem:[%s1808_s15 + $0x1a0] sm:$0xff] %v1269_v29  ;;  %1272 = vst [vmem:[%s1808_s15 + $0x1a8] sm:$0xff] %v1271_v30  ;;  %v1275_v32 = vld [vmem:[%s1812_s20 + $0x1b8] sm:$0xff]  ;;  %v1277_v33 = vld [vmem:[%s1812_s20 + $0x1c0] sm:$0xff] }
 0x15b   : >> { %1274 = vst [vmem:[%s1808_s15 + $0x1b0] sm:$0xff] %v1273_v31  ;;  %1276 = vst [vmem:[%s1808_s15 + $0x1b8] sm:$0xff] %v1275_v32  ;;  %v1279_v34 = vld [vmem:[%s1812_s20 + $0x1c8] sm:$0xff]  ;;  %v1281_v35 = vld [vmem:[%s1812_s20 + $0x1d0] sm:$0xff] }
 0x15c   : >> { %1278 = vst [vmem:[%s1808_s15 + $0x1c0] sm:$0xff] %v1277_v33  ;;  %v1283_v36 = vld [vmem:[%s1812_s20 + $0x1d8] sm:$0xff]  ;;  %1280 = vst [vmem:[%s1808_s15 + $0x1c8] sm:$0xff] %v1279_v34  ;;  %v1285_v37 = vld [vmem:[%s1812_s20 + $0x1e0] sm:$0xff] }
 0x15d   : >> { %1282 = vst [vmem:[%s1808_s15 + $0x1d0] sm:$0xff] %v1281_v35  ;;  %1284 = vst [vmem:[%s1808_s15 + $0x1d8] sm:$0xff] %v1283_v36  ;;  %v1287_v39 = vld [vmem:[%s1812_s20 + $0x1e8] sm:$0xff]  ;;  %v1289_v40 = vld [vmem:[%s1812_s20 + $0x1f0] sm:$0xff] }
 0x15e   : >> { %1286 = vst [vmem:[%s1808_s15 + $0x1e0] sm:$0xff] %v1285_v37  ;;  %1288 = vst [vmem:[%s1808_s15 + $0x1e8] sm:$0xff] %v1287_v39  ;;  %v1291_v41 = vld [vmem:[%s1812_s20 + $0x1f8] sm:$0xff]  ;;  %s2318_s20 = smov %s2184_s25 }
 0x15f   : >> { %1290 = vst [vmem:[%s1808_s15 + $0x1f0] sm:$0xff] %v1289_v40  ;;  %1292 = vst [vmem:[%s1808_s15 + $0x1f8] sm:$0xff] %v1291_v41  ;;  %s2317_s15 = smov %s2187_s26 }
 0x160 PF: > { %s2292_s27 = sand.u32 63, %s2324_s9   ;;  %s1519_s28 = sshll.u32 %s2117_s18, 9 }
 0x161   : > { %s1304_s29 = scalar_lea.vmem %s1981_s8, %s1519_s28 [#allocation2]   ;;  %s1306_s30 = scalar_lea.vmem %s2111_s14, %s1519_s28  }
 0x162   : > { %p1513_p13 = scmp.le.s32.totalorder %s2292_s27, 0 }
 0x163   : > { %s1822_s4 = smov (!%p1513_p13), %s1306_s30   ;;  %s1826_s5 = smov (!%p1513_p13), %s1304_s29  }
 0x164   : > { %1397 = sbr.rel (%p1513_p13) target bundleno = 373 (0x175), region = 127  ;;  %s1830_s6 = smov (!%p1513_p13), 0  }
 0x165   : > { %s1834_s7 = smov (!%p1513_p13), 0  }
 0x16b LB: >> { %v1316_v38 = vld [vmem:[%s1828_s5] sm:$0xff]  ;;  %s1318_s9 = sadd.s32 1, %s1832_s6  ;;  %s1310_s7 = sadd.s32 1, %s1836_s7   ;;  %s1836_s7 = sphi %s1834_s7, %s1310_s7   ;;  %s1832_s6 = sphi %s1830_s6, %s1831_s6   ;;  %s1828_s5 = sphi %s1826_s5, %s1323_s5   ;;  %s1824_s4 = sphi %s1822_s4, %s1324_s4  }
 0x16c   : >> { %1317 = vst [vmem:[%s1824_s4] sm:$0xff] %v1316_v38  ;;  %p1319_p0 = scmp.ge.s32.totalorder %s1318_s9, %s2292_s27  ;;  %p1309_p1 = scmp.ge.s32.totalorder %s1310_s7, %s2292_s27 }
 0x16e   : >> { %s2328_s9 = smov (%p1319_p0, %s1318_s9), 0  ;;  %1312 = sbr.rel (!%p1309_p1) target bundleno = 363 (0x16b), region = 133 }
 0x16f   : >> { %s1514_s8 = sshll.u32 %s2328_s9, 3  ;;  %s1831_s6 = smov %s2328_s9  }
 0x170   : >> { %s1323_s5 = scalar_lea.vmem %s1304_s29, %s1514_s8 [#allocation2]   ;;  %s1324_s4 = scalar_lea.vmem %s1306_s30, %s1514_s8  }
 0x175 PF: > { %p10_p2 = scmp.ge.s32.totalorder %s1874_s16, 5   ;;  %s2320_s12 = smov %s1800_s13 }
 0x176   : > { %s2321_s13 = smov %s1882_s19  ;;  %s2322_s14 = smov %s1874_s16 }
 0x177   :  { %12 = sbr.rel (!%p10_p2) target bundleno = 2 (0x2), region = 144 }

// kernel: net_forward.12
= control target key start
LH: loop header
LB: loop body
LE: loop exit
PB: predicated region body
PF: predicated region fallthrough
CT: control target
= control target key end

     0   :  { %s806_s12 = smov 0   ;;  %s947_s0 = inlined_call_operand.vmem [shape: bf16[576,10], index: 0, kind: input, shape index: {}]   ;;  %s948_s1 = inlined_call_operand.vmem [shape: bf16[10,128], index: 1, kind: input, shape index: {}]   ;;  %s949_s2 = inlined_call_operand.vmem [shape: f32[1,128], index: 2, kind: input, shape index: {}]   ;;  %s950_s3 = inlined_call_operand.vmem [shape: f32[576,128], index: 3, kind: output, shape index: {}]  }
   0x1 LB: > { %s643_s13 = sadd.s32 4294967295, %s784_s12   ;;  %p647_p0 = scmp.ge.s32.totalorder %s784_s12, 1  ;;  %s784_s12 = sphi %s806_s12, %s13_s12  }
   0x2   : > { %p138_p1 = scmp.lt.s32.totalorder %s784_s12, 3 }
   0x4   : > { %p139_p2 = pnand %p647_p0, %p138_p1 }
   0x5   : > { %v759_v0 = vld [vmem:[%s948_s1] sm:$0x1f] (!%p139_p2)   ;;  %vm370_vm0 = vcmask (!%p139_p2), 1044480   ;;  %s162_s16 = smul.u32 (!%p139_p2), 36, %s643_s13  ;;  %vm315_vm1 = vcmask (!%p139_p2), 80896  }
   0x6   : > { %142 = sbr.rel (%p139_p2) target bundleno = 268 (0x10c), region = 32  ;;  %749 = vmatprep.subr.msk.bf16.mxu0 (!%p139_p2), %vm370_vm0, %v759_v0  ;;  %v372_v1 = vsel (!%p139_p2), %vm370_vm0, %v759_v0, 0  ;;  %750 = vmatprep.subr.msk.bf16.mxu1 (!%p139_p2), %vm370_vm0, %v759_v0  ;;  %v865_v20 = vld [vmem:[%s949_s2] ss:$0 sm:$0xff] (!%p139_p2) }
   0x7   : > { %710 = vmatpush3.bf16.msra.mxu0 (!%p139_p2), %v372_v1  ;;  %p163_p3 = scmp.lt.s32.totalorder (!%p139_p2), %s162_s16, 71  ;;  %748 = vmatpush3.bf16.msra.mxu1 (!%p139_p2), %v372_v1 }
   0xd   : > { %s952_s16 = smov (!%p163_p3, %s162_s16), 71 }
   0xe   : > { %s648_s17 = sshll.u32 %s952_s16, 2  ;;  %s649_s21 = sshll.u32 %s952_s16, 3 }
   0xf   : > { %s823_s20 = scalar_lea.vmem %s947_s0, %s648_s17  ;;  %s870_s26 = scalar_lea.vmem %s950_s3, %s649_s21 }
  0x10   : > { %v760_v2 = vld [vmem:[%s823_s20] sm:$0xff]   ;;  %v761_v3 = vld [vmem:[%s823_s20 + $0x8] sm:$0xff]   ;;  %v762_v4 = vld [vmem:[%s823_s20 + $0x50] sm:$0xff]  }
  0x11   : > { %711 = vmatprep.mubr.msk.bf16.mxu0 %vm315_vm1, %v760_v2  ;;  %v763_v5 = vld [vmem:[%s823_s20 + $0x58] sm:$0xff]   ;;  %731 = vmatprep.mubr.msk.bf16.mxu1 %vm315_vm1, %v762_v4  ;;  %v764_v6 = vld [vmem:[%s823_s20 + $0x10] sm:$0xff]   ;;  %v766_v7 = vld [vmem:[%s823_s20 + $0x60] sm:$0xff]  }
  0x12   : > { %712 = vmatmul.mubr.msk.bf16.vlgmr.msra.gmra.mrb[0].mxu0 %vm315_vm1, %v761_v3  ;;  %732 = vmatmul.mubr.msk.bf16.vlgmr.msra.gmra.mrb[0].mxu1 %vm315_vm1, %v763_v5  ;;  %v765_v8 = vld [vmem:[%s823_s20 + $0x18] sm:$0xff]   ;;  %v768_v9 = vld [vmem:[%s823_s20 + $0x20] sm:$0xff]   ;;  %v767_v10 = vld [vmem:[%s823_s20 + $0x68] sm:$0xff]  }
  0x13   : > { %715 = vmatprep.mubr.msk.bf16.mxu0 %vm315_vm1, %v764_v6  ;;  %735 = vmatprep.mubr.msk.bf16.mxu1 %vm315_vm1, %v766_v7  ;;  %v770_v11 = vld [vmem:[%s823_s20 + $0x70] sm:$0xff]   ;;  %v769_v12 = vld [vmem:[%s823_s20 + $0x28] sm:$0xff]   ;;  %v771_v14 = vld [vmem:[%s823_s20 + $0x78] sm:$0xff]  }
  0x14   : > { %v772_v13 = vld [vmem:[%s823_s20 + $0x30] sm:$0xff]   ;;  %v774_v15 = vld [vmem:[%s823_s20 + $0x80] sm:$0xff]   ;;  %v773_v16 = vld [vmem:[%s823_s20 + $0x38] sm:$0xff]  }
  0x15   : > { %v776_v17 = vld [vmem:[%s823_s20 + $0x40] sm:$0xff]   ;;  %v775_v18 = vld [vmem:[%s823_s20 + $0x88] sm:$0xff]  }
  0x16   : > { %v777_v19 = vld [vmem:[%s823_s20 + $0x48] sm:$0xff]  }
  0x1a   : > { %716 = vmatmul.mubr.msk.bf16.gmra.mrb[4].mxu0 %vm315_vm1, %v765_v8  ;;  %736 = vmatmul.mubr.msk.bf16.gmra.mrb[4].mxu1 %vm315_vm1, %v767_v10 }
  0x1b   : > { %719 = vmatprep.mubr.msk.bf16.mxu0 %vm315_vm1, %v768_v9  ;;  %739 = vmatprep.mubr.msk.bf16.mxu1 %vm315_vm1, %v770_v11 }
  0x22   : > { %720 = vmatmul.mubr.msk.bf16.gmra.mrb[8].mxu0 %vm315_vm1, %v769_v12  ;;  %740 = vmatmul.mubr.msk.bf16.gmra.mrb[8].mxu1 %vm315_vm1, %v771_v14 }
  0x23   : > { %723 = vmatprep.mubr.msk.bf16.mxu0 %vm315_vm1, %v772_v13  ;;  %743 = vmatprep.mubr.msk.bf16.mxu1 %vm315_vm1, %v774_v15 }
  0x2a   : > { %724 = vmatmul.mubr.msk.bf16.gmra.mrb[12].mxu0 %vm315_vm1, %v773_v16  ;;  %744 = vmatmul.mubr.msk.bf16.gmra.mrb[12].mxu1 %vm315_vm1, %v775_v18 }
  0x2b   : > { %727 = vmatprep.mubr.msk.bf16.mxu0 %vm315_vm1, %v776_v17 }
  0x32   : > { %728 = vmatmul.mubr.msk.bf16.gmra.mrb[16].mxu0 %vm315_vm1, %v777_v19 }
  0xe5   : > { %v713_v21 = vpop.f32.mrb[0].mxu0  ;;  %v733_v26 = vpop.f32.mrb[0].mxu1 }
  0xe6   : > { %v417_v22 = vadd.f32 %v713_v21, %v865_v20  ;;  %v408_v23 = vpop.f32.mrb[1].mxu0  ;;  %v497_v29 = vadd.f32 %v733_v26, %v865_v20  ;;  %v488_v30 = vpop.f32.mrb[1].mxu1 }
  0xe7   : > { %v409_v24 = vadd.f32 %v865_v20, %v408_v23  ;;  %v714_v25 = vpop.f32.mrb[2].mxu0  ;;  %v489_v32 = vadd.f32 %v865_v20, %v488_v30  ;;  %v734_v33 = vpop.f32.mrb[2].mxu1 }
  0xe8   : > { %553 = vst [vmem:[%s870_s26 + $0x10] sm:$0xff] %v417_v22  ;;  %v420_v27 = vadd.f32 %v714_v25, %v865_v20  ;;  %v411_v28 = vpop.f32.mrb[3].mxu0  ;;  %573 = vst [vmem:[%s870_s26 + $0xb0] sm:$0xff] %v497_v29  ;;  %v500_v34 = vadd.f32 %v734_v33, %v865_v20  ;;  %v491_v35 = vpop.f32.mrb[3].mxu1 }
  0xe9   : > { %551 = vst [vmem:[%s870_s26] sm:$0xff] %v409_v24  ;;  %v412_v31 = vadd.f32 %v865_v20, %v411_v28  ;;  %571 = vst [vmem:[%s870_s26 + $0xa0] sm:$0xff] %v489_v32  ;;  %v492_v36 = vadd.f32 %v865_v20, %v491_v35 }
  0xea   : > { %554 = vst [vmem:[%s870_s26 + $0x18] sm:$0xff] %v420_v27  ;;  %574 = vst [vmem:[%s870_s26 + $0xb8] sm:$0xff] %v500_v34 }
  0xeb   : > { %552 = vst [vmem:[%s870_s26 + $0x8] sm:$0xff] %v412_v31  ;;  %572 = vst [vmem:[%s870_s26 + $0xa8] sm:$0xff] %v492_v36 }
  0xed   : > { %v717_v37 = vpop.f32.mrb[4].mxu0  ;;  %v737_v42 = vpop.f32.mrb[4].mxu1 }
  0xee   : > { %v433_v38 = vadd.f32 %v717_v37, %v865_v20  ;;  %v424_v39 = vpop.f32.mrb[5].mxu0  ;;  %v513_v45 = vadd.f32 %v737_v42, %v865_v20  ;;  %v504_v46 = vpop.f32.mrb[5].mxu1 }
  0xef   : > { %v425_v40 = vadd.f32 %v865_v20, %v424_v39  ;;  %v718_v41 = vpop.f32.mrb[6].mxu0  ;;  %v505_v48 = vadd.f32 %v865_v20, %v504_v46  ;;  %v738_v49 = vpop.f32.mrb[6].mxu1 }
  0xf0   : > { %557 = vst [vmem:[%s870_s26 + $0x30] sm:$0xff] %v433_v38  ;;  %v436_v43 = vadd.f32 %v718_v41, %v865_v20  ;;  %v427_v44 = vpop.f32.mrb[7].mxu0  ;;  %577 = vst [vmem:[%s870_s26 + $0xd0] sm:$0xff] %v513_v45  ;;  %v516_v50 = vadd.f32 %v738_v49, %v865_v20  ;;  %v507_v51 = vpop.f32.mrb[7].mxu1 }
  0xf1   : > { %555 = vst [vmem:[%s870_s26 + $0x20] sm:$0xff] %v425_v40  ;;  %v428_v47 = vadd.f32 %v865_v20, %v427_v44  ;;  %575 = vst [vmem:[%s870_s26 + $0xc0] sm:$0xff] %v505_v48  ;;  %v508_v52 = vadd.f32 %v865_v20, %v507_v51 }
  0xf2   : > { %558 = vst [vmem:[%s870_s26 + $0x38] sm:$0xff] %v436_v43  ;;  %578 = vst [vmem:[%s870_s26 + $0xd8] sm:$0xff] %v516_v50 }
  0xf3   : > { %556 = vst [vmem:[%s870_s26 + $0x28] sm:$0xff] %v428_v47  ;;  %576 = vst [vmem:[%s870_s26 + $0xc8] sm:$0xff] %v508_v52 }
  0xf5   : > { %v721_v53 = vpop.f32.mrb[8].mxu0  ;;  %v741_v58 = vpop.f32.mrb[8].mxu1 }
  0xf6   : > { %v449_v54 = vadd.f32 %v721_v53, %v865_v20  ;;  %v440_v55 = vpop.f32.mrb[9].mxu0  ;;  %v529_v61 = vadd.f32 %v741_v58, %v865_v20  ;;  %v520_v62 = vpop.f32.mrb[9].mxu1 }
  0xf7   : > { %v441_v56 = vadd.f32 %v865_v20, %v440_v55  ;;  %v722_v57 = vpop.f32.mrb[10].mxu0  ;;  %v521_v0 = vadd.f32 %v865_v20, %v520_v62  ;;  %v742_v1 = vpop.f32.mrb[10].mxu1 }
  0xf8   : > { %561 = vst [vmem:[%s870_s26 + $0x50] sm:$0xff] %v449_v54  ;;  %v452_v59 = vadd.f32 %v722_v57, %v865_v20  ;;  %v443_v60 = vpop.f32.mrb[11].mxu0  ;;  %581 = vst [vmem:[%s870_s26 + $0xf0] sm:$0xff] %v529_v61  ;;  %v532_v2 = vadd.f32 %v742_v1, %v865_v20  ;;  %v523_v3 = vpop.f32.mrb[11].mxu1 }
  0xf9   : > { %559 = vst [vmem:[%s870_s26 + $0x40] sm:$0xff] %v441_v56  ;;  %v444_v63 = vadd.f32 %v865_v20, %v443_v60  ;;  %579 = vst [vmem:[%s870_s26 + $0xe0] sm:$0xff] %v521_v0  ;;  %v524_v4 = vadd.f32 %v865_v20, %v523_v3 }
  0xfa   : > { %562 = vst [vmem:[%s870_s26 + $0x58] sm:$0xff] %v452_v59  ;;  %582 = vst [vmem:[%s870_s26 + $0xf8] sm:$0xff] %v532_v2 }
  0xfb   : > { %560 = vst [vmem:[%s870_s26 + $0x48] sm:$0xff] %v444_v63  ;;  %580 = vst [vmem:[%s870_s26 + $0xe8] sm:$0xff] %v524_v4 }
  0xfd   : > { %v725_v5 = vpop.f32.mrb[12].mxu0  ;;  %v745_v10 = vpop.f32.mrb[12].mxu1 }
  0xfe   : > { %v465_v6 = vadd.f32 %v725_v5, %v865_v20  ;;  %v456_v7 = vpop.f32.mrb[13].mxu0  ;;  %v545_v13 = vadd.f32 %v745_v10, %v865_v20  ;;  %v536_v14 = vpop.f32.mrb[13].mxu1 }
  0xff   : > { %v457_v8 = vadd.f32 %v865_v20, %v456_v7  ;;  %v726_v9 = vpop.f32.mrb[14].mxu0  ;;  %v537_v16 = vadd.f32 %v865_v20, %v536_v14  ;;  %v746_v17 = vpop.f32.mrb[14].mxu1 }
 0x100   : > { %565 = vst [vmem:[%s870_s26 + $0x70] sm:$0xff] %v465_v6  ;;  %v468_v11 = vadd.f32 %v726_v9, %v865_v20  ;;  %v459_v12 = vpop.f32.mrb[15].mxu0  ;;  %585 = vst [vmem:[%s870_s26 + $0x110] sm:$0xff] %v545_v13  ;;  %v548_v18 = vadd.f32 %v746_v17, %v865_v20  ;;  %v539_v19 = vpop.f32.mrb[15].mxu1 }
 0x101   : > { %563 = vst [vmem:[%s870_s26 + $0x60] sm:$0xff] %v457_v8  ;;  %v460_v15 = vadd.f32 %v865_v20, %v459_v12  ;;  %583 = vst [vmem:[%s870_s26 + $0x100] sm:$0xff] %v537_v16  ;;  %v540_v21 = vadd.f32 %v865_v20, %v539_v19 }
 0x102   : > { %566 = vst [vmem:[%s870_s26 + $0x78] sm:$0xff] %v468_v11  ;;  %586 = vst [vmem:[%s870_s26 + $0x118] sm:$0xff] %v548_v18 }
 0x103   : > { %564 = vst [vmem:[%s870_s26 + $0x68] sm:$0xff] %v460_v15  ;;  %584 = vst [vmem:[%s870_s26 + $0x108] sm:$0xff] %v540_v21 }
 0x105   : > { %v729_v22 = vpop.f32.mrb[16].mxu0 }
 0x106   : > { %v481_v23 = vadd.f32 %v729_v22, %v865_v20  ;;  %v472_v24 = vpop.f32.mrb[17].mxu0 }
 0x107   : > { %v473_v25 = vadd.f32 %v865_v20, %v472_v24  ;;  %v730_v26 = vpop.f32.mrb[18].mxu0 }
 0x108   : > { %569 = vst [vmem:[%s870_s26 + $0x90] sm:$0xff] %v481_v23  ;;  %v484_v27 = vadd.f32 %v730_v26, %v865_v20  ;;  %v475_v28 = vpop.f32.mrb[19].mxu0 }
 0x109   : > { %567 = vst [vmem:[%s870_s26 + $0x80] sm:$0xff] %v473_v25  ;;  %v476_v29 = vadd.f32 %v865_v20, %v475_v28 }
 0x10a   : > { %570 = vst [vmem:[%s870_s26 + $0x98] sm:$0xff] %v484_v27 }
 0x10b   : > { %568 = vst [vmem:[%s870_s26 + $0x88] sm:$0xff] %v476_v29 }
 0x10c PF: > { %s13_s12 = sadd.s32 1, %s784_s12  }
 0x10d   : > { %p10_p4 = scmp.ge.s32.totalorder %s13_s12, 4  }
 0x10f   :  { %12 = sbr.rel (!%p10_p4) target bundleno = 1 (0x1), region = 62 }

// kernel: net_forward.14
= control target key start
LH: loop header
LB: loop body
LE: loop exit
PB: predicated region body
PF: predicated region fallthrough
CT: control target
= control target key end

     0   :  { %s703_s12 = smov 0   ;;  %s826_s0 = inlined_call_operand.vmem [shape: bf16[288,144], index: 0, kind: input, shape index: {}]   ;;  %s827_s1 = inlined_call_operand.vmem [shape: bf16[144,128], index: 1, kind: input, shape index: {}]   ;;  %s828_s2 = inlined_call_operand.vmem [shape: f32[1,128], index: 2, kind: input, shape index: {}]   ;;  %s829_s3 = inlined_call_operand.vmem [shape: f32[288,128], index: 3, kind: output, shape index: {}]  }
   0x1 LB: > { %s563_s13 = sadd.s32 4294967295, %s680_s12   ;;  %p567_p0 = scmp.ge.s32.totalorder %s680_s12, 1  ;;  %s680_s12 = sphi %s703_s12, %s13_s12  }
   0x2   : > { %p139_p1 = scmp.lt.s32.totalorder %s680_s12, 3 }
   0x4   : > { %p140_p2 = pnand %p567_p0, %p139_p1 }
   0x5   : > { %v638_v0 = vld [vmem:[%s827_s1] sm:$0xff] (!%p140_p2)   ;;  %v682_v1 = vmov (!%p140_p2), 0   ;;  %s164_s16 = smul.u32 (!%p140_p2), 18, %s563_s13  ;;  %v639_v2 = vld [vmem:[%s827_s1 + $0x8] sm:$0xff] (!%p140_p2)   ;;  %v640_v3 = vld [vmem:[%s827_s1 + $0x10] sm:$0xff] (!%p140_p2)   ;;  %vm356_vm0 = vcmask (!%p140_p2), 130048  }
   0x6   : > { %143 = sbr.rel (%p140_p2) target bundleno = 291 (0x123), region = 32  ;;  %384 = vmatprep.subr.bf16.mxu0 (!%p140_p2), %v682_v1  ;;  %611 = vmatprep.subr.bf16.mxu1 (!%p140_p2), %v682_v1  ;;  %v641_v4 = vld [vmem:[%s827_s1 + $0x18] sm:$0xff] (!%p140_p2)   ;;  %v642_v7 = vld [vmem:[%s827_s1 + $0x20] sm:$0xff] (!%p140_p2)   ;;  %v643_v8 = vld [vmem:[%s827_s1 + $0x28] sm:$0xff] (!%p140_p2)  }
   0x7   : > { %385 = vmatpush1.bf16.msra.mxu0 (!%p140_p2), %v638_v0  ;;  %620 = vmatpush1.bf16.msra.mxu1 (!%p140_p2), %v638_v0  ;;  %p165_p3 = scmp.lt.s32.totalorder (!%p140_p2), %s164_s16, 35  ;;  %v644_v9 = vld [vmem:[%s827_s1 + $0x30] sm:$0xff] (!%p140_p2)   ;;  %v645_v10 = vld [vmem:[%s827_s1 + $0x38] sm:$0xff] (!%p140_p2)   ;;  %v646_v11 = vld [vmem:[%s827_s1 + $0x40] sm:$0xff] (!%p140_p2)  }
   0x8   : > { %386 = vmatprep.subr.bf16.mxu0 (!%p140_p2), %v682_v1  ;;  %612 = vmatprep.subr.bf16.mxu1 (!%p140_p2), %v682_v1  ;;  %v778_v28 = vld [vmem:[%s828_s2] ss:$0 sm:$0xff] (!%p140_p2) }
   0xb   : > { %387 = vmatpush1.bf16.msra.mxu0 (!%p140_p2), %v639_v2  ;;  %621 = vmatpush1.bf16.msra.mxu1 (!%p140_p2), %v639_v2 }
   0xc   : > { %388 = vmatprep.subr.bf16.mxu0 (!%p140_p2), %v682_v1  ;;  %613 = vmatprep.subr.bf16.mxu1 (!%p140_p2), %v682_v1 }
   0xd   : > { %s831_s16 = smov (!%p165_p3, %s164_s16), 35 }
   0xe   : > { %s610_s21 = sshll.u32 %s831_s16, 3 }
   0xf   : > { %s728_s24 = scalar_lea.vmem %s826_s0, %s610_s21  ;;  %389 = vmatpush1.bf16.msra.mxu0 %v640_v3  ;;  %622 = vmatpush1.bf16.msra.mxu1 %v640_v3  ;;  %s785_s15 = scalar_lea.vmem %s829_s3, %s610_s21 }
  0x10   : > { %v649_v5 = vld [vmem:[%s728_s24 + $0x4] ss:$8 sps:$4 sm:$0xff]   ;;  %390 = vmatprep.subr.bf16.mxu0 %v682_v1  ;;  %614 = vmatprep.subr.bf16.mxu1 %v682_v1  ;;  %v652_v6 = vld [vmem:[%s728_s24 + $0x54] ss:$8 sps:$4 sm:$0xff]   ;;  %v647_v12 = vld [vmem:[%s728_s24] ss:$8 sps:$4 sm:$0xff]  }
  0x11   : > { %599 = vmatprep.mubr.msk.bf16.mxu0 %vm356_vm0, %v649_v5  ;;  %604 = vmatprep.mubr.msk.bf16.mxu1 %vm356_vm0, %v652_v6  ;;  %v650_v13 = vld [vmem:[%s728_s24 + $0x50] ss:$8 sps:$4 sm:$0xff]   ;;  %v653_v14 = vld [vmem:[%s728_s24 + $0x14] ss:$8 sps:$4 sm:$0xff]   ;;  %v656_v15 = vld [vmem:[%s728_s24 + $0x64] ss:$8 sps:$4 sm:$0xff]  }
  0x12   : > { %v655_v16 = vld [vmem:[%s728_s24 + $0x10] ss:$8 sps:$4 sm:$0xff]   ;;  %v658_v17 = vld [vmem:[%s728_s24 + $0x60] ss:$8 sps:$4 sm:$0xff]   ;;  %v659_v18 = vld [vmem:[%s728_s24 + $0x24] ss:$8 sps:$4 sm:$0xff]  }
  0x13   : > { %391 = vmatpush1.bf16.msra.mxu0 %v641_v4  ;;  %623 = vmatpush1.bf16.msra.mxu1 %v641_v4  ;;  %v662_v19 = vld [vmem:[%s728_s24 + $0x74] ss:$8 sps:$4 sm:$0xff]   ;;  %v661_v20 = vld [vmem:[%s728_s24 + $0x20] ss:$8 sps:$4 sm:$0xff]   ;;  %v664_v21 = vld [vmem:[%s728_s24 + $0x70] ss:$8 sps:$4 sm:$0xff]  }
  0x14   : > { %392 = vmatprep.subr.bf16.mxu0 %v682_v1  ;;  %615 = vmatprep.subr.bf16.mxu1 %v682_v1  ;;  %v665_v22 = vld [vmem:[%s728_s24 + $0x34] ss:$8 sps:$4 sm:$0xff]   ;;  %v668_v23 = vld [vmem:[%s728_s24 + $0x84] ss:$8 sps:$4 sm:$0xff]   ;;  %v667_v24 = vld [vmem:[%s728_s24 + $0x30] ss:$8 sps:$4 sm:$0xff]  }
  0x15   : > { %v670_v25 = vld [vmem:[%s728_s24 + $0x80] ss:$8 sps:$4 sm:$0xff]   ;;  %v671_v26 = vld [vmem:[%s728_s24 + $0x44] ss:$8 sps:$4 sm:$0xff]  }
  0x16   : > { %v673_v27 = vld [vmem:[%s728_s24 + $0x40] ss:$8 sps:$4 sm:$0xff]  }
  0x17   : > { %393 = vmatpush1.bf16.msra.mxu0 %v642_v7  ;;  %624 = vmatpush1.bf16.msra.mxu1 %v642_v7 }
  0x18   : > { %394 = vmatprep.subr.bf16.mxu0 %v682_v1  ;;  %616 = vmatprep.subr.bf16.mxu1 %v682_v1 }
  0x1b   : > { %395 = vmatpush1.bf16.msra.mxu0 %v643_v8  ;;  %625 = vmatpush1.bf16.msra.mxu1 %v643_v8 }
  0x1c   : > { %396 = vmatprep.subr.bf16.mxu0 %v682_v1  ;;  %617 = vmatprep.subr.bf16.mxu1 %v682_v1 }
  0x1f   : > { %397 = vmatpush1.bf16.msra.mxu0 %v644_v9  ;;  %626 = vmatpush1.bf16.msra.mxu1 %v644_v9 }
  0x20   : > { %398 = vmatprep.subr.bf16.mxu0 %v682_v1  ;;  %618 = vmatprep.subr.bf16.mxu1 %v682_v1 }
  0x23   : > { %399 = vmatpush1.bf16.msra.mxu0 %v645_v10  ;;  %627 = vmatpush1.bf16.msra.mxu1 %v645_v10 }
  0x24   : > { %400 = vmatprep.subr.bf16.mxu0 %v682_v1  ;;  %619 = vmatprep.subr.bf16.mxu1 %v682_v1 }
  0x27   : > { %401 = vmatpush1.bf16.msra.mxu0 %v646_v11  ;;  %628 = vmatpush1.bf16.msra.mxu1 %v646_v11 }
  0x2a   : > { %417 = vmatmul.mubr.bf16.vlgmr.msra.gmra.mrb[0].mxu0 %v647_v12  ;;  %457 = vmatmul.mubr.bf16.vlgmr.msra.gmra.mrb[0].mxu1 %v650_v13 }
  0x2b   : > { %600 = vmatprep.mubr.msk.bf16.mxu0 %vm356_vm0, %v653_v14  ;;  %605 = vmatprep.mubr.msk.bf16.mxu1 %vm356_vm0, %v656_v15 }
  0x32   : > { %425 = vmatmul.mubr.bf16.gmra.mrb[4].mxu0 %v655_v16  ;;  %465 = vmatmul.mubr.bf16.gmra.mrb[4].mxu1 %v658_v17 }
  0x33   : > { %601 = vmatprep.mubr.msk.bf16.mxu0 %vm356_vm0, %v659_v18  ;;  %606 = vmatprep.mubr.msk.bf16.mxu1 %vm356_vm0, %v662_v19 }
  0x3a   : > { %433 = vmatmul.mubr.bf16.gmra.mrb[8].mxu0 %v661_v20  ;;  %473 = vmatmul.mubr.bf16.gmra.mrb[8].mxu1 %v664_v21 }
  0x3b   : > { %602 = vmatprep.mubr.msk.bf16.mxu0 %vm356_vm0, %v665_v22  ;;  %607 = vmatprep.mubr.msk.bf16.mxu1 %vm356_vm0, %v668_v23 }
  0x42   : > { %441 = vmatmul.mubr.bf16.gmra.mrb[12].mxu0 %v667_v24  ;;  %481 = vmatmul.mubr.bf16.gmra.mrb[12].mxu1 %v670_v25 }
  0x43   : > { %603 = vmatprep.mubr.msk.bf16.mxu0 %vm356_vm0, %v671_v26 }
  0x4a   : > { %449 = vmatmul.mubr.bf16.gmra.mrb[16].mxu0 %v673_v27 }
  0xfd   : > { %v418_v29 = vpop.f32.mrb[0].mxu0  ;;  %v458_v30 = vpop.f32.mrb[0].mxu1 }
  0xfe   : > { %v419_v31 = vadd.f32 %v778_v28, %v418_v29  ;;  %v420_v32 = vpop.f32.mrb[1].mxu0  ;;  %v459_v33 = vadd.f32 %v778_v28, %v458_v30  ;;  %v460_v34 = vpop.f32.mrb[1].mxu1 }
  0xff   : > { %v421_v35 = vpop.f32.mrb[2].mxu0  ;;  %v461_v36 = vpop.f32.mrb[2].mxu1 }
 0x100   : > { %489 = vst [vmem:[%s785_s15] sm:$0xff] %v419_v31  ;;  %v422_v37 = vadd.f32 %v778_v28, %v421_v35  ;;  %v423_v38 = vpop.f32.mrb[3].mxu0  ;;  %499 = vst [vmem:[%s785_s15 + $0x50] sm:$0xff] %v459_v33  ;;  %v462_v39 = vadd.f32 %v778_v28, %v461_v36  ;;  %v463_v40 = vpop.f32.mrb[3].mxu1 }
 0x102   : > { %490 = vst [vmem:[%s785_s15 + $0x8] sm:$0xff] %v422_v37  ;;  %500 = vst [vmem:[%s785_s15 + $0x58] sm:$0xff] %v462_v39 }
 0x105   : > { %v426_v41 = vpop.f32.mrb[4].mxu0  ;;  %v466_v42 = vpop.f32.mrb[4].mxu1 }
 0x106   : > { %v427_v43 = vadd.f32 %v778_v28, %v426_v41  ;;  %v428_v44 = vpop.f32.mrb[5].mxu0  ;;  %v467_v45 = vadd.f32 %v778_v28, %v466_v42  ;;  %v468_v46 = vpop.f32.mrb[5].mxu1 }
 0x107   : > { %v429_v47 = vpop.f32.mrb[6].mxu0  ;;  %v469_v48 = vpop.f32.mrb[6].mxu1 }
 0x108   : > { %491 = vst [vmem:[%s785_s15 + $0x10] sm:$0xff] %v427_v43  ;;  %v430_v49 = vadd.f32 %v778_v28, %v429_v47  ;;  %v431_v50 = vpop.f32.mrb[7].mxu0  ;;  %501 = vst [vmem:[%s785_s15 + $0x60] sm:$0xff] %v467_v45  ;;  %v470_v51 = vadd.f32 %v778_v28, %v469_v48  ;;  %v471_v52 = vpop.f32.mrb[7].mxu1 }
 0x10a   : > { %492 = vst [vmem:[%s785_s15 + $0x18] sm:$0xff] %v430_v49  ;;  %502 = vst [vmem:[%s785_s15 + $0x68] sm:$0xff] %v470_v51 }
 0x10d   : > { %v434_v53 = vpop.f32.mrb[8].mxu0  ;;  %v474_v54 = vpop.f32.mrb[8].mxu1 }
 0x10e   : > { %v435_v55 = vadd.f32 %v778_v28, %v434_v53  ;;  %v436_v56 = vpop.f32.mrb[9].mxu0  ;;  %v475_v57 = vadd.f32 %v778_v28, %v474_v54  ;;  %v476_v58 = vpop.f32.mrb[9].mxu1 }
 0x10f   : > { %v437_v59 = vpop.f32.mrb[10].mxu0  ;;  %v477_v60 = vpop.f32.mrb[10].mxu1 }
 0x110   : > { %493 = vst [vmem:[%s785_s15 + $0x20] sm:$0xff] %v435_v55  ;;  %v438_v61 = vadd.f32 %v778_v28, %v437_v59  ;;  %v439_v62 = vpop.f32.mrb[11].mxu0  ;;  %503 = vst [vmem:[%s785_s15 + $0x70] sm:$0xff] %v475_v57  ;;  %v478_v63 = vadd.f32 %v778_v28, %v477_v60  ;;  %v479_v0 = vpop.f32.mrb[11].mxu1 }
 0x112   : > { %494 = vst [vmem:[%s785_s15 + $0x28] sm:$0xff] %v438_v61  ;;  %504 = vst [vmem:[%s785_s15 + $0x78] sm:$0xff] %v478_v63 }
 0x115   : > { %v442_v1 = vpop.f32.mrb[12].mxu0  ;;  %v482_v2 = vpop.f32.mrb[12].mxu1 }
 0x116   : > { %v443_v3 = vadd.f32 %v778_v28, %v442_v1  ;;  %v444_v4 = vpop.f32.mrb[13].mxu0  ;;  %v483_v5 = vadd.f32 %v778_v28, %v482_v2  ;;  %v484_v6 = vpop.f32.mrb[13].mxu1 }
 0x117   : > { %v445_v7 = vpop.f32.mrb[14].mxu0  ;;  %v485_v8 = vpop.f32.mrb[14].mxu1 }
 0x118   : > { %495 = vst [vmem:[%s785_s15 + $0x30] sm:$0xff] %v443_v3  ;;  %v446_v9 = vadd.f32 %v778_v28, %v445_v7  ;;  %v447_v10 = vpop.f32.mrb[15].mxu0  ;;  %505 = vst [vmem:[%s785_s15 + $0x80] sm:$0xff] %v483_v5  ;;  %v486_v11 = vadd.f32 %v778_v28, %v485_v8  ;;  %v487_v12 = vpop.f32.mrb[15].mxu1 }
 0x11a   : > { %496 = vst [vmem:[%s785_s15 + $0x38] sm:$0xff] %v446_v9  ;;  %506 = vst [vmem:[%s785_s15 + $0x88] sm:$0xff] %v486_v11 }
 0x11d   : > { %v450_v13 = vpop.f32.mrb[16].mxu0 }
 0x11e   : > { %v451_v14 = vadd.f32 %v778_v28, %v450_v13  ;;  %v452_v15 = vpop.f32.mrb[17].mxu0 }
 0x11f   : > { %v453_v16 = vpop.f32.mrb[18].mxu0 }
 0x120   : > { %497 = vst [vmem:[%s785_s15 + $0x40] sm:$0xff] %v451_v14  ;;  %v454_v17 = vadd.f32 %v778_v28, %v453_v16  ;;  %v455_v18 = vpop.f32.mrb[19].mxu0 }
 0x122   : > { %498 = vst [vmem:[%s785_s15 + $0x48] sm:$0xff] %v454_v17 }
 0x123 PF: > { %s13_s12 = sadd.s32 1, %s680_s12  }
 0x124   : > { %p10_p4 = scmp.ge.s32.totalorder %s13_s12, 4  }
 0x126   :  { %12 = sbr.rel (!%p10_p4) target bundleno = 1 (0x1), region = 62 }

// kernel: net_forward.15
= control target key start
LH: loop header
LB: loop body
LE: loop exit
PB: predicated region body
PF: predicated region fallthrough
CT: control target
= control target key end

     0   :  { %s763_s12 = smov 0   ;;  %s929_s0 = inlined_call_operand.vmem [shape: bf16[288,216], index: 0, kind: input, shape index: {}]   ;;  %s930_s1 = inlined_call_operand.vmem [shape: bf16[216,128], index: 1, kind: input, shape index: {}]   ;;  %s931_s2 = inlined_call_operand.vmem [shape: f32[1,128], index: 2, kind: input, shape index: {}]   ;;  %s932_s3 = inlined_call_operand.vmem [shape: f32[288,128], index: 3, kind: output, shape index: {}]  }
   0x1 LB: > { %s603_s13 = sadd.s32 4294967295, %s740_s12   ;;  %p607_p0 = scmp.ge.s32.totalorder %s740_s12, 1  ;;  %s740_s12 = sphi %s763_s12, %s13_s12  }
   0x2   : > { %p139_p1 = scmp.lt.s32.totalorder %s740_s12, 3 }
   0x4   : > { %p140_p2 = pnand %p607_p0, %p139_p1 }
   0x5   : > { %v693_v0 = vld [vmem:[%s930_s1] sm:$0xff] (!%p140_p2)   ;;  %v742_v1 = vmov (!%p140_p2), 0   ;;  %v694_v2 = vld [vmem:[%s930_s1 + $0x8] sm:$0xff] (!%p140_p2)   ;;  %s164_s18 = smul.u32 (!%p140_p2), 18, %s603_s13  ;;  %v695_v3 = vld [vmem:[%s930_s1 + $0x10] sm:$0xff] (!%p140_p2)   ;;  %vm392_vm0 = vcmask (!%p140_p2), 719872  }
   0x6   : > { %143 = sbr.rel (%p140_p2) target bundleno = 311 (0x137), region = 32  ;;  %424 = vmatprep.subr.bf16.mxu0 (!%p140_p2), %v742_v1  ;;  %656 = vmatprep.subr.bf16.mxu1 (!%p140_p2), %v742_v1  ;;  %v696_v4 = vld [vmem:[%s930_s1 + $0x18] sm:$0xff] (!%p140_p2)   ;;  %v697_v5 = vld [vmem:[%s930_s1 + $0x20] sm:$0xff] (!%p140_p2)   ;;  %v698_v8 = vld [vmem:[%s930_s1 + $0x28] sm:$0xff] (!%p140_p2)   ;;  %vm420_vm1 = vcmask (!%p140_p2), 1043456  }
   0x7   : > { %425 = vmatpush1.bf16.msra.mxu0 (!%p140_p2), %v693_v0  ;;  %670 = vmatpush1.bf16.msra.mxu1 (!%p140_p2), %v693_v0  ;;  %p165_p3 = scmp.lt.s32.totalorder (!%p140_p2), %s164_s18, 35  ;;  %v699_v9 = vld [vmem:[%s930_s1 + $0x30] sm:$0xff] (!%p140_p2)   ;;  %v700_v10 = vld [vmem:[%s930_s1 + $0x38] sm:$0xff] (!%p140_p2)   ;;  %v701_v11 = vld [vmem:[%s930_s1 + $0x40] sm:$0xff] (!%p140_p2)  }
   0x8   : > { %426 = vmatprep.subr.bf16.mxu0 (!%p140_p2), %v742_v1  ;;  %657 = vmatprep.subr.bf16.mxu1 (!%p140_p2), %v742_v1  ;;  %v702_v12 = vld [vmem:[%s930_s1 + $0x48] sm:$0xff] (!%p140_p2)   ;;  %v703_v13 = vld [vmem:[%s930_s1 + $0x50] sm:$0xff] (!%p140_p2)   ;;  %v704_v14 = vld [vmem:[%s930_s1 + $0x58] sm:$0xff] (!%p140_p2)  }
   0x9   : > { %v705_v15 = vld [vmem:[%s930_s1 + $0x60] sm:$0xff] (!%p140_p2)   ;;  %v706_v16 = vld [vmem:[%s930_s1 + $0x68] ss:$0 sps:$4 sm:$0xff] (!%p140_p2)  }
   0xa   : > { %v422_v17 = vsel (!%p140_p2), %vm420_vm1, %v706_v16, 0  ;;  %v881_v34 = vld [vmem:[%s931_s2] ss:$0 sm:$0xff] (!%p140_p2) }
   0xb   : > { %427 = vmatpush1.bf16.msra.mxu0 (!%p140_p2), %v694_v2  ;;  %671 = vmatpush1.bf16.msra.mxu1 (!%p140_p2), %v694_v2 }
   0xc   : > { %428 = vmatprep.subr.bf16.mxu0 (!%p140_p2), %v742_v1  ;;  %658 = vmatprep.subr.bf16.mxu1 (!%p140_p2), %v742_v1 }
   0xd   : > { %s934_s18 = smov (!%p165_p3, %s164_s18), 35 }
   0xe   : > { %s655_s21 = sshll.u32 %s934_s18, 3 }
   0xf   : > { %429 = vmatpush1.bf16.msra.mxu0 %v695_v3  ;;  %672 = vmatpush1.bf16.msra.mxu1 %v695_v3  ;;  %s799_s26 = scalar_lea.vmem %s929_s0, %s655_s21  ;;  %s888_s28 = scalar_lea.vmem %s932_s3, %s655_s21 }
  0x10   : > { %430 = vmatprep.subr.bf16.mxu0 %v742_v1  ;;  %659 = vmatprep.subr.bf16.mxu1 %v742_v1  ;;  %v709_v6 = vld [vmem:[%s799_s26 + $0x4] ss:$8 sps:$4 sm:$0xff]   ;;  %v712_v7 = vld [vmem:[%s799_s26 + $0x54] ss:$8 sps:$4 sm:$0xff]   ;;  %v707_v18 = vld [vmem:[%s799_s26] ss:$8 sps:$4 sm:$0xff]  }
  0x11   : > { %644 = vmatprep.mubr.msk.bf16.mxu0 %vm392_vm0, %v709_v6  ;;  %649 = vmatprep.mubr.msk.bf16.mxu1 %vm392_vm0, %v712_v7  ;;  %v710_v19 = vld [vmem:[%s799_s26 + $0x50] ss:$8 sps:$4 sm:$0xff]   ;;  %v713_v20 = vld [vmem:[%s799_s26 + $0x14] ss:$8 sps:$4 sm:$0xff]   ;;  %v716_v21 = vld [vmem:[%s799_s26 + $0x64] ss:$8 sps:$4 sm:$0xff]  }
  0x12   : > { %v715_v22 = vld [vmem:[%s799_s26 + $0x10] ss:$8 sps:$4 sm:$0xff]   ;;  %v718_v23 = vld [vmem:[%s799_s26 + $0x60] ss:$8 sps:$4 sm:$0xff]   ;;  %v719_v24 = vld [vmem:[%s799_s26 + $0x24] ss:$8 sps:$4 sm:$0xff]  }
  0x13   : > { %431 = vmatpush1.bf16.msra.mxu0 %v696_v4  ;;  %673 = vmatpush1.bf16.msra.mxu1 %v696_v4  ;;  %v722_v25 = vld [vmem:[%s799_s26 + $0x74] ss:$8 sps:$4 sm:$0xff]   ;;  %v721_v26 = vld [vmem:[%s799_s26 + $0x20] ss:$8 sps:$4 sm:$0xff]   ;;  %v724_v27 = vld [vmem:[%s799_s26 + $0x70] ss:$8 sps:$4 sm:$0xff]  }
  0x14   : > { %432 = vmatprep.subr.bf16.mxu0 %v742_v1  ;;  %660 = vmatprep.subr.bf16.mxu1 %v742_v1  ;;  %v725_v28 = vld [vmem:[%s799_s26 + $0x34] ss:$8 sps:$4 sm:$0xff]   ;;  %v728_v29 = vld [vmem:[%s799_s26 + $0x84] ss:$8 sps:$4 sm:$0xff]   ;;  %v727_v30 = vld [vmem:[%s799_s26 + $0x30] ss:$8 sps:$4 sm:$0xff]  }
  0x15   : > { %v730_v31 = vld [vmem:[%s799_s26 + $0x80] ss:$8 sps:$4 sm:$0xff]   ;;  %v731_v32 = vld [vmem:[%s799_s26 + $0x44] ss:$8 sps:$4 sm:$0xff]  }
  0x16   : > { %v733_v33 = vld [vmem:[%s799_s26 + $0x40] ss:$8 sps:$4 sm:$0xff]  }
  0x17   : > { %433 = vmatpush1.bf16.msra.mxu0 %v697_v5  ;;  %674 = vmatpush1.bf16.msra.mxu1 %v697_v5 }
  0x18   : > { %434 = vmatprep.subr.bf16.mxu0 %v742_v1  ;;  %661 = vmatprep.subr.bf16.mxu1 %v742_v1 }
  0x1b   : > { %435 = vmatpush1.bf16.msra.mxu0 %v698_v8  ;;  %675 = vmatpush1.bf16.msra.mxu1 %v698_v8 }
  0x1c   : > { %436 = vmatprep.subr.bf16.mxu0 %v742_v1  ;;  %662 = vmatprep.subr.bf16.mxu1 %v742_v1 }
  0x1f   : > { %437 = vmatpush1.bf16.msra.mxu0 %v699_v9  ;;  %676 = vmatpush1.bf16.msra.mxu1 %v699_v9 }
  0x20   : > { %438 = vmatprep.subr.bf16.mxu0 %v742_v1  ;;  %663 = vmatprep.subr.bf16.mxu1 %v742_v1 }
  0x23   : > { %439 = vmatpush1.bf16.msra.mxu0 %v700_v10  ;;  %677 = vmatpush1.bf16.msra.mxu1 %v700_v10 }
  0x24   : > { %440 = vmatprep.subr.bf16.mxu0 %v742_v1  ;;  %664 = vmatprep.subr.bf16.mxu1 %v742_v1 }
  0x27   : > { %441 = vmatpush1.bf16.msra.mxu0 %v701_v11  ;;  %678 = vmatpush1.bf16.msra.mxu1 %v701_v11 }
  0x28   : > { %442 = vmatprep.subr.bf16.mxu0 %v742_v1  ;;  %665 = vmatprep.subr.bf16.mxu1 %v742_v1 }
  0x2b   : > { %443 = vmatpush1.bf16.msra.mxu0 %v702_v12  ;;  %679 = vmatpush1.bf16.msra.mxu1 %v702_v12 }
  0x2c   : > { %444 = vmatprep.subr.bf16.mxu0 %v742_v1  ;;  %666 = vmatprep.subr.bf16.mxu1 %v742_v1 }
  0x2f   : > { %445 = vmatpush1.bf16.msra.mxu0 %v703_v13  ;;  %680 = vmatpush1.bf16.msra.mxu1 %v703_v13 }
  0x30   : > { %446 = vmatprep.subr.bf16.mxu0 %v742_v1  ;;  %667 = vmatprep.subr.bf16.mxu1 %v742_v1 }
  0x33   : > { %447 = vmatpush1.bf16.msra.mxu0 %v704_v14  ;;  %681 = vmatpush1.bf16.msra.mxu1 %v704_v14 }
  0x34   : > { %448 = vmatprep.subr.bf16.mxu0 %v742_v1  ;;  %668 = vmatprep.subr.bf16.mxu1 %v742_v1 }
  0x37   : > { %449 = vmatpush1.bf16.msra.mxu0 %v705_v15  ;;  %682 = vmatpush1.bf16.msra.mxu1 %v705_v15 }
  0x38   : > { %450 = vmatprep.subr.bf16.mxu0 %v742_v1  ;;  %669 = vmatprep.subr.bf16.mxu1 %v742_v1 }
  0x3b   : > { %451 = vmatpush1.bf16.msra.mxu0 %v422_v17  ;;  %683 = vmatpush1.bf16.msra.mxu1 %v422_v17 }
  0x3e   : > { %457 = vmatmul.mubr.bf16.vlgmr.msra.gmra.mrb[0].mxu0 %v707_v18  ;;  %497 = vmatmul.mubr.bf16.vlgmr.msra.gmra.mrb[0].mxu1 %v710_v19 }
  0x3f   : > { %645 = vmatprep.mubr.msk.bf16.mxu0 %vm392_vm0, %v713_v20  ;;  %650 = vmatprep.mubr.msk.bf16.mxu1 %vm392_vm0, %v716_v21 }
  0x46   : > { %465 = vmatmul.mubr.bf16.gmra.mrb[4].mxu0 %v715_v22  ;;  %505 = vmatmul.mubr.bf16.gmra.mrb[4].mxu1 %v718_v23 }
  0x47   : > { %646 = vmatprep.mubr.msk.bf16.mxu0 %vm392_vm0, %v719_v24  ;;  %651 = vmatprep.mubr.msk.bf16.mxu1 %vm392_vm0, %v722_v25 }
  0x4e   : > { %473 = vmatmul.mubr.bf16.gmra.mrb[8].mxu0 %v721_v26  ;;  %513 = vmatmul.mubr.bf16.gmra.mrb[8].mxu1 %v724_v27 }
  0x4f   : > { %647 = vmatprep.mubr.msk.bf16.mxu0 %vm392_vm0, %v725_v28  ;;  %652 = vmatprep.mubr.msk.bf16.mxu1 %vm392_vm0, %v728_v29 }
  0x56   : > { %481 = vmatmul.mubr.bf16.gmra.mrb[12].mxu0 %v727_v30  ;;  %521 = vmatmul.mubr.bf16.gmra.mrb[12].mxu1 %v730_v31 }
  0x57   : > { %648 = vmatprep.mubr.msk.bf16.mxu0 %vm392_vm0, %v731_v32 }
  0x5e   : > { %489 = vmatmul.mubr.bf16.gmra.mrb[16].mxu0 %v733_v33 }
 0x111   : > { %v458_v35 = vpop.f32.mrb[0].mxu0  ;;  %v498_v36 = vpop.f32.mrb[0].mxu1 }
 0x112   : > { %v459_v37 = vadd.f32 %v881_v34, %v458_v35  ;;  %v460_v38 = vpop.f32.mrb[1].mxu0  ;;  %v499_v39 = vadd.f32 %v881_v34, %v498_v36  ;;  %v500_v40 = vpop.f32.mrb[1].mxu1 }
 0x113   : > { %v461_v41 = vpop.f32.mrb[2].mxu0  ;;  %v501_v42 = vpop.f32.mrb[2].mxu1 }
 0x114   : > { %529 = vst [vmem:[%s888_s28] sm:$0xff] %v459_v37  ;;  %v462_v43 = vadd.f32 %v881_v34, %v461_v41  ;;  %v463_v44 = vpop.f32.mrb[3].mxu0  ;;  %539 = vst [vmem:[%s888_s28 + $0x50] sm:$0xff] %v499_v39  ;;  %v502_v45 = vadd.f32 %v881_v34, %v501_v42  ;;  %v503_v46 = vpop.f32.mrb[3].mxu1 }
 0x116   : > { %530 = vst [vmem:[%s888_s28 + $0x8] sm:$0xff] %v462_v43  ;;  %540 = vst [vmem:[%s888_s28 + $0x58] sm:$0xff] %v502_v45 }
 0x119   : > { %v466_v47 = vpop.f32.mrb[4].mxu0  ;;  %v506_v48 = vpop.f32.mrb[4].mxu1 }
 0x11a   : > { %v467_v49 = vadd.f32 %v881_v34, %v466_v47  ;;  %v468_v50 = vpop.f32.mrb[5].mxu0  ;;  %v507_v51 = vadd.f32 %v881_v34, %v506_v48  ;;  %v508_v52 = vpop.f32.mrb[5].mxu1 }
 0x11b   : > { %v469_v53 = vpop.f32.mrb[6].mxu0  ;;  %v509_v54 = vpop.f32.mrb[6].mxu1 }
 0x11c   : > { %531 = vst [vmem:[%s888_s28 + $0x10] sm:$0xff] %v467_v49  ;;  %v470_v55 = vadd.f32 %v881_v34, %v469_v53  ;;  %v471_v56 = vpop.f32.mrb[7].mxu0  ;;  %541 = vst [vmem:[%s888_s28 + $0x60] sm:$0xff] %v507_v51  ;;  %v510_v57 = vadd.f32 %v881_v34, %v509_v54  ;;  %v511_v58 = vpop.f32.mrb[7].mxu1 }
 0x11e   : > { %532 = vst [vmem:[%s888_s28 + $0x18] sm:$0xff] %v470_v55  ;;  %542 = vst [vmem:[%s888_s28 + $0x68] sm:$0xff] %v510_v57 }
 0x121   : > { %v474_v59 = vpop.f32.mrb[8].mxu0  ;;  %v514_v60 = vpop.f32.mrb[8].mxu1 }
 0x122   : > { %v475_v61 = vadd.f32 %v881_v34, %v474_v59  ;;  %v476_v62 = vpop.f32.mrb[9].mxu0  ;;  %v515_v63 = vadd.f32 %v881_v34, %v514_v60  ;;  %v516_v0 = vpop.f32.mrb[9].mxu1 }
 0x123   : > { %v477_v1 = vpop.f32.mrb[10].mxu0  ;;  %v517_v2 = vpop.f32.mrb[10].mxu1 }
 0x124   : > { %533 = vst [vmem:[%s888_s28 + $0x20] sm:$0xff] %v475_v61  ;;  %v478_v3 = vadd.f32 %v881_v34, %v477_v1  ;;  %v479_v4 = vpop.f32.mrb[11].mxu0  ;;  %543 = vst [vmem:[%s888_s28 + $0x70] sm:$0xff] %v515_v63  ;;  %v518_v5 = vadd.f32 %v881_v34, %v517_v2  ;;  %v519_v6 = vpop.f32.mrb[11].mxu1 }
 0x126   : > { %534 = vst [vmem:[%s888_s28 + $0x28] sm:$0xff] %v478_v3  ;;  %544 = vst [vmem:[%s888_s28 + $0x78] sm:$0xff] %v518_v5 }
 0x129   : > { %v482_v7 = vpop.f32.mrb[12].mxu0  ;;  %v522_v8 = vpop.f32.mrb[12].mxu1 }
 0x12a   : > { %v483_v9 = vadd.f32 %v881_v34, %v482_v7  ;;  %v484_v10 = vpop.f32.mrb[13].mxu0  ;;  %v523_v11 = vadd.f32 %v881_v34, %v522_v8  ;;  %v524_v12 = vpop.f32.mrb[13].mxu1 }
 0x12b   : > { %v485_v13 = vpop.f32.mrb[14].mxu0  ;;  %v525_v14 = vpop.f32.mrb[14].mxu1 }
 0x12c   : > { %535 = vst [vmem:[%s888_s28 + $0x30] sm:$0xff] %v483_v9  ;;  %v486_v15 = vadd.f32 %v881_v34, %v485_v13  ;;  %v487_v16 = vpop.f32.mrb[15].mxu0  ;;  %545 = vst [vmem:[%s888_s28 + $0x80] sm:$0xff] %v523_v11  ;;  %v526_v17 = vadd.f32 %v881_v34, %v525_v14  ;;  %v527_v18 = vpop.f32.mrb[15].mxu1 }
 0x12e   : > { %536 = vst [vmem:[%s888_s28 + $0x38] sm:$0xff] %v486_v15  ;;  %546 = vst [vmem:[%s888_s28 + $0x88] sm:$0xff] %v526_v17 }
 0x131   : > { %v490_v19 = vpop.f32.mrb[16].mxu0 }
 0x132   : > { %v491_v20 = vadd.f32 %v881_v34, %v490_v19  ;;  %v492_v21 = vpop.f32.mrb[17].mxu0 }
 0x133   : > { %v493_v22 = vpop.f32.mrb[18].mxu0 }
 0x134   : > { %537 = vst [vmem:[%s888_s28 + $0x40] sm:$0xff] %v491_v20  ;;  %v494_v23 = vadd.f32 %v881_v34, %v493_v22  ;;  %v495_v24 = vpop.f32.mrb[19].mxu0 }
 0x136   : > { %538 = vst [vmem:[%s888_s28 + $0x48] sm:$0xff] %v494_v23 }
 0x137 PF: > { %s13_s12 = sadd.s32 1, %s740_s12  }
 0x138   : > { %p10_p4 = scmp.ge.s32.totalorder %s13_s12, 4  }
 0x13a   :  { %12 = sbr.rel (!%p10_p4) target bundleno = 1 (0x1), region = 62 }

// kernel: net_forward.13
= control target key start
LH: loop header
LB: loop body
LE: loop exit
PB: predicated region body
PF: predicated region fallthrough
CT: control target
= control target key end

     0   :  { %s1173_s12 = smov 0   ;;  %s1368_s0 = inlined_call_operand.vmem [shape: bf16[288,400], index: 0, kind: input, shape index: {}]   ;;  %s1369_s1 = inlined_call_operand.vmem [shape: bf16[400,128], index: 1, kind: input, shape index: {}]   ;;  %s1370_s2 = inlined_call_operand.vmem [shape: f32[1,128], index: 2, kind: input, shape index: {}]   ;;  %s1371_s3 = inlined_call_operand.vmem [shape: f32[288,128], index: 3, kind: output, shape index: {}]  }
   0x1 LB: > { %s904_s13 = sadd.s32 4294967295, %s1150_s12   ;;  %p908_p0 = scmp.ge.s32.totalorder %s1150_s12, 1  ;;  %s1150_s12 = sphi %s1173_s12, %s13_s12  }
   0x2   : > { %p139_p1 = scmp.lt.s32.totalorder %s1150_s12, 3 }
   0x4   : > { %p140_p2 = pnand %p908_p0, %p139_p1 }
   0x5   : > { %v1065_v0 = vld [vmem:[%s1369_s1 + $0x40] sm:$0xff] (!%p140_p2)   ;;  %v1152_v1 = vmov (!%p140_p2), 0   ;;  %v1068_v4 = vld [vmem:[%s1369_s1 + $0x48] sm:$0xff] (!%p140_p2)   ;;  %v1071_v7 = vld [vmem:[%s1369_s1 + $0x50] sm:$0xff] (!%p140_p2)   ;;  %s164_s30 = smul.u32 (!%p140_p2), 18, %s904_s13  ;;  %vm592_vm0 = vcmask (!%p140_p2), 130048  }
   0x6   : > { %143 = sbr.rel (%p140_p2) target bundleno = 325 (0x145), region = 32  ;;  %725 = vmatprep.subr.bf16.mxu1 (!%p140_p2), %v1152_v1  ;;  %v1066_v2 = vld [vmem:[%s1369_s1 + $0x80] sm:$0xff] (!%p140_p2)   ;;  %986 = vmatprep.subr.bf16.mxu0 (!%p140_p2), %v1065_v0  ;;  %v1069_v5 = vld [vmem:[%s1369_s1 + $0x88] sm:$0xff] (!%p140_p2)   ;;  %v1072_v8 = vld [vmem:[%s1369_s1 + $0x90] sm:$0xff] (!%p140_p2)  }
   0x7   : > { %v1067_v3 = vld [vmem:[%s1369_s1] sm:$0xff] (!%p140_p2)   ;;  %726 = vmatpush1.bf16.msra.mxu1 (!%p140_p2), %v1066_v2  ;;  %v1070_v6 = vld [vmem:[%s1369_s1 + $0x8] sm:$0xff] (!%p140_p2)   ;;  %v1073_v9 = vld [vmem:[%s1369_s1 + $0x10] sm:$0xff] (!%p140_p2)   ;;  %p165_p3 = scmp.lt.s32.totalorder (!%p140_p2), %s164_s30, 35 }
   0x8   : > { %987 = vmatpush3.bf16.msra.mxu0 (!%p140_p2), %v1067_v3  ;;  %727 = vmatprep.subr.bf16.mxu1 (!%p140_p2), %v1152_v1  ;;  %v1074_v10 = vld [vmem:[%s1369_s1 + $0x58] sm:$0xff] (!%p140_p2)   ;;  %v1077_v13 = vld [vmem:[%s1369_s1 + $0x60] sm:$0xff] (!%p140_p2)   ;;  %v1080_v16 = vld [vmem:[%s1369_s1 + $0x68] sm:$0xff] (!%p140_p2)  }
   0x9   : > { %988 = vmatprep.subr.bf16.mxu0 (!%p140_p2), %v1068_v4  ;;  %v1075_v11 = vld [vmem:[%s1369_s1 + $0x98] sm:$0xff] (!%p140_p2)   ;;  %v1078_v14 = vld [vmem:[%s1369_s1 + $0xa0] sm:$0xff] (!%p140_p2)   ;;  %v1081_v17 = vld [vmem:[%s1369_s1 + $0xa8] sm:$0xff] (!%p140_p2)  }
   0xa   : > { %v1076_v12 = vld [vmem:[%s1369_s1 + $0x18] sm:$0xff] (!%p140_p2)   ;;  %v1079_v15 = vld [vmem:[%s1369_s1 + $0x20] sm:$0xff] (!%p140_p2)   ;;  %v1082_v18 = vld [vmem:[%s1369_s1 + $0x28] sm:$0xff] (!%p140_p2)  }
   0xb   : > { %728 = vmatpush1.bf16.msra.mxu1 (!%p140_p2), %v1069_v5  ;;  %v1083_v19 = vld [vmem:[%s1369_s1 + $0x70] sm:$0xff] (!%p140_p2)   ;;  %v1086_v22 = vld [vmem:[%s1369_s1 + $0x78] sm:$0xff] (!%p140_p2)   ;;  %v1092_v28 = vld [vmem:[%s1369_s1 + $0xc0] sm:$0xff] (!%p140_p2)  }
   0xc   : > { %989 = vmatpush3.bf16.msra.mxu0 (!%p140_p2), %v1070_v6  ;;  %729 = vmatprep.subr.bf16.mxu1 (!%p140_p2), %v1152_v1  ;;  %v1084_v20 = vld [vmem:[%s1369_s1 + $0xb0] sm:$0xff] (!%p140_p2)   ;;  %v1087_v24 = vld [vmem:[%s1369_s1 + $0xb8] sm:$0xff] (!%p140_p2)   ;;  %v1321_v0 = vld [vmem:[%s1370_s2] ss:$0 sm:$0xff] (!%p140_p2) }
   0xd   : > { %990 = vmatprep.subr.bf16.mxu0 %v1071_v7  ;;  %s1373_s30 = smov (!%p165_p3, %s164_s30), 35  ;;  %v1085_v21 = vld [vmem:[%s1369_s1 + $0x30] sm:$0xff]   ;;  %v1088_v26 = vld [vmem:[%s1369_s1 + $0x38] sm:$0xff]  }
   0xe   : > { %s985_s23 = sshll.u32 %s1373_s30, 4  ;;  %s911_s20 = sshll.u32 %s1373_s30, 3 }
   0xf   : > { %730 = vmatpush1.bf16.msra.mxu1 %v1072_v8  ;;  %s1253_s6 = scalar_lea.vmem %s1368_s0, %s985_s23  ;;  %s1328_s23 = scalar_lea.vmem %s1371_s3, %s911_s20 }
  0x10   : > { %991 = vmatpush3.bf16.msra.mxu0 %v1073_v9  ;;  %731 = vmatprep.subr.bf16.mxu1 %v1152_v1  ;;  %v1091_v23 = vld [vmem:[%s1253_s6 + $0x4] ss:$16 sps:$4 sm:$0xff]   ;;  %v1095_v25 = vld [vmem:[%s1253_s6 + $0xc] ss:$16 sps:$4 sm:$0xff]   ;;  %v1089_v27 = vld [vmem:[%s1253_s6] ss:$16 sps:$4 sm:$0xff]  }
  0x11   : > { %992 = vmatprep.subr.bf16.mxu0 %v1074_v10  ;;  %652 = vmatprep.mubr.bf16.mxu0 %v1091_v23  ;;  %v1096_v29 = vld [vmem:[%s1253_s6 + $0x24] ss:$16 sps:$4 sm:$0xff]   ;;  %v1093_v30 = vld [vmem:[%s1253_s6 + $0x8] ss:$16 sps:$4 sm:$0xff]   ;;  %v1099_v31 = vld [vmem:[%s1253_s6 + $0x2c] ss:$16 sps:$4 sm:$0xff]  }
  0x12   : > { %974 = vmatprep.mubr.msk.bf16.mxu1 %vm592_vm0, %v1095_v25  ;;  %v1098_v32 = vld [vmem:[%s1253_s6 + $0x20] ss:$16 sps:$4 sm:$0xff]   ;;  %v1102_v33 = vld [vmem:[%s1253_s6 + $0x44] ss:$16 sps:$4 sm:$0xff]   ;;  %v1101_v34 = vld [vmem:[%s1253_s6 + $0x28] ss:$16 sps:$4 sm:$0xff]  }
  0x13   : > { %732 = vmatpush1.bf16.msra.mxu1 %v1075_v11  ;;  %v1105_v35 = vld [vmem:[%s1253_s6 + $0x4c] ss:$16 sps:$4 sm:$0xff]   ;;  %v1104_v36 = vld [vmem:[%s1253_s6 + $0x40] ss:$16 sps:$4 sm:$0xff]   ;;  %v1108_v37 = vld [vmem:[%s1253_s6 + $0x64] ss:$16 sps:$4 sm:$0xff]  }
  0x14   : > { %993 = vmatpush3.bf16.msra.mxu0 %v1076_v12  ;;  %733 = vmatprep.subr.bf16.mxu1 %v1152_v1  ;;  %v1107_v38 = vld [vmem:[%s1253_s6 + $0x48] ss:$16 sps:$4 sm:$0xff]   ;;  %v1111_v39 = vld [vmem:[%s1253_s6 + $0x6c] ss:$16 sps:$4 sm:$0xff]   ;;  %v1110_v40 = vld [vmem:[%s1253_s6 + $0x60] ss:$16 sps:$4 sm:$0xff]  }
  0x15   : > { %994 = vmatprep.subr.bf16.mxu0 %v1077_v13  ;;  %v1114_v41 = vld [vmem:[%s1253_s6 + $0x84] ss:$16 sps:$4 sm:$0xff]   ;;  %v1113_v42 = vld [vmem:[%s1253_s6 + $0x68] ss:$16 sps:$4 sm:$0xff]   ;;  %v1117_v43 = vld [vmem:[%s1253_s6 + $0x8c] ss:$16 sps:$4 sm:$0xff]  }
  0x16   : > { %v1116_v44 = vld [vmem:[%s1253_s6 + $0x80] ss:$16 sps:$4 sm:$0xff]   ;;  %v1120_v45 = vld [vmem:[%s1253_s6 + $0xa4] ss:$16 sps:$4 sm:$0xff]   ;;  %v1119_v46 = vld [vmem:[%s1253_s6 + $0x88] ss:$16 sps:$4 sm:$0xff]  }
  0x17   : > { %734 = vmatpush1.bf16.msra.mxu1 %v1078_v14  ;;  %v1123_v47 = vld [vmem:[%s1253_s6 + $0xac] ss:$16 sps:$4 sm:$0xff]   ;;  %v1122_v48 = vld [vmem:[%s1253_s6 + $0xa0] ss:$16 sps:$4 sm:$0xff]   ;;  %v1126_v49 = vld [vmem:[%s1253_s6 + $0xc4] ss:$16 sps:$4 sm:$0xff]  }
  0x18   : > { %995 = vmatpush3.bf16.msra.mxu0 %v1079_v15  ;;  %735 = vmatprep.subr.bf16.mxu1 %v1152_v1  ;;  %v1125_v50 = vld [vmem:[%s1253_s6 + $0xa8] ss:$16 sps:$4 sm:$0xff]   ;;  %v1129_v51 = vld [vmem:[%s1253_s6 + $0xcc] ss:$16 sps:$4 sm:$0xff]   ;;  %v1128_v52 = vld [vmem:[%s1253_s6 + $0xc0] ss:$16 sps:$4 sm:$0xff]  }
  0x19   : > { %996 = vmatprep.subr.bf16.mxu0 %v1080_v16  ;;  %v1132_v53 = vld [vmem:[%s1253_s6 + $0xe4] ss:$16 sps:$4 sm:$0xff]   ;;  %v1131_v54 = vld [vmem:[%s1253_s6 + $0xc8] ss:$16 sps:$4 sm:$0xff]   ;;  %v1135_v55 = vld [vmem:[%s1253_s6 + $0xec] ss:$16 sps:$4 sm:$0xff]  }
  0x1a   : > { %v1134_v56 = vld [vmem:[%s1253_s6 + $0xe0] ss:$16 sps:$4 sm:$0xff]   ;;  %v1138_v57 = vld [vmem:[%s1253_s6 + $0x104] ss:$16 sps:$4 sm:$0xff]   ;;  %v1137_v58 = vld [vmem:[%s1253_s6 + $0xe8] ss:$16 sps:$4 sm:$0xff]  }
  0x1b   : > { %736 = vmatpush1.bf16.msra.mxu1 %v1081_v17  ;;  %v1141_v59 = vld [vmem:[%s1253_s6 + $0x10c] ss:$16 sps:$4 sm:$0xff]   ;;  %v1140_v60 = vld [vmem:[%s1253_s6 + $0x100] ss:$16 sps:$4 sm:$0xff]   ;;  %v1143_v61 = vld [vmem:[%s1253_s6 + $0x108] ss:$16 sps:$4 sm:$0xff]  }
  0x1c   : > { %997 = vmatpush3.bf16.msra.mxu0 %v1082_v18  ;;  %737 = vmatprep.subr.bf16.mxu1 %v1152_v1 }
  0x1d   : > { %998 = vmatprep.subr.bf16.mxu0 %v1083_v19 }
  0x1f   : > { %738 = vmatpush1.bf16.msra.mxu1 %v1084_v20 }
  0x20   : > { %999 = vmatpush3.bf16.msra.mxu0 %v1085_v21  ;;  %739 = vmatprep.subr.bf16.mxu1 %v1152_v1 }
  0x21   : > { %1000 = vmatprep.subr.bf16.mxu0 %v1086_v22 }
  0x23   : > { %740 = vmatpush1.bf16.msra.mxu1 %v1087_v24 }
  0x24   : > { %1001 = vmatpush3.bf16.msra.mxu0 %v1088_v26  ;;  %741 = vmatprep.subr.bf16.mxu1 %v1152_v1 }
  0x27   : > { %653 = vmatmul.mubr.bf16.vlgmr.msra.gmra.mrb[0].mxu0 %v1089_v27  ;;  %742 = vmatpush1.bf16.msra.mxu1 %v1092_v28 }
  0x28   : > { %660 = vmatprep.mubr.bf16.mxu0 %v1096_v29 }
  0x2a   : > { %758 = vmatmul.mubr.bf16.vlgmr.msra.gmra.mrb[0].mxu1 %v1093_v30 }
  0x2b   : > { %975 = vmatprep.mubr.msk.bf16.mxu1 %vm592_vm0, %v1099_v31 }
  0x2f   : > { %661 = vmatmul.mubr.bf16.gmra.mrb[4].mxu0 %v1098_v32 }
  0x30   : > { %668 = vmatprep.mubr.bf16.mxu0 %v1102_v33 }
  0x32   : > { %766 = vmatmul.mubr.bf16.gmra.mrb[4].mxu1 %v1101_v34 }
  0x33   : > { %976 = vmatprep.mubr.msk.bf16.mxu1 %vm592_vm0, %v1105_v35 }
  0x37   : > { %669 = vmatmul.mubr.bf16.gmra.mrb[8].mxu0 %v1104_v36 }
  0x38   : > { %676 = vmatprep.mubr.bf16.mxu0 %v1108_v37 }
  0x3a   : > { %774 = vmatmul.mubr.bf16.gmra.mrb[8].mxu1 %v1107_v38 }
  0x3b   : > { %977 = vmatprep.mubr.msk.bf16.mxu1 %vm592_vm0, %v1111_v39 }
  0x3f   : > { %677 = vmatmul.mubr.bf16.gmra.mrb[12].mxu0 %v1110_v40 }
  0x40   : > { %684 = vmatprep.mubr.bf16.mxu0 %v1114_v41 }
  0x42   : > { %782 = vmatmul.mubr.bf16.gmra.mrb[12].mxu1 %v1113_v42 }
  0x43   : > { %978 = vmatprep.mubr.msk.bf16.mxu1 %vm592_vm0, %v1117_v43 }
  0x47   : > { %685 = vmatmul.mubr.bf16.gmra.mrb[16].mxu0 %v1116_v44 }
  0x48   : > { %692 = vmatprep.mubr.bf16.mxu0 %v1120_v45 }
  0x4a   : > { %790 = vmatmul.mubr.bf16.gmra.mrb[16].mxu1 %v1119_v46 }
  0x4b   : > { %979 = vmatprep.mubr.msk.bf16.mxu1 %vm592_vm0, %v1123_v47 }
  0x4f   : > { %693 = vmatmul.mubr.bf16.gmra.mrb[20].mxu0 %v1122_v48 }
  0x50   : > { %700 = vmatprep.mubr.bf16.mxu0 %v1126_v49 }
  0x52   : > { %798 = vmatmul.mubr.bf16.gmra.mrb[20].mxu1 %v1125_v50 }
  0x53   : > { %980 = vmatprep.mubr.msk.bf16.mxu1 %vm592_vm0, %v1129_v51 }
  0x57   : > { %701 = vmatmul.mubr.bf16.gmra.mrb[24].mxu0 %v1128_v52 }
  0x58   : > { %708 = vmatprep.mubr.bf16.mxu0 %v1132_v53 }
  0x5a   : > { %806 = vmatmul.mubr.bf16.gmra.mrb[24].mxu1 %v1131_v54 }
  0x5b   : > { %981 = vmatprep.mubr.msk.bf16.mxu1 %vm592_vm0, %v1135_v55 }
  0x5f   : > { %709 = vmatmul.mubr.bf16.gmra.mrb[28].mxu0 %v1134_v56 }
  0x60   : > { %716 = vmatprep.mubr.bf16.mxu0 %v1138_v57 }
  0x62   : > { %814 = vmatmul.mubr.bf16.gmra.mrb[28].mxu1 %v1137_v58 }
  0x63   : > { %982 = vmatprep.mubr.msk.bf16.mxu1 %vm592_vm0, %v1141_v59 }
  0x67   : > { %717 = vmatmul.mubr.bf16.gmra.mrb[32].mxu0 %v1140_v60 }
  0x6a   : > { %822 = vmatmul.mubr.bf16.gmra.mrb[32].mxu1 %v1143_v61 }
  0xfa   : > { %v1002_v62 = vpop.f32.mrb[0].mxu0 }
  0xfb   : > { %v1003_v63 = vpop.f32.mrb[1].mxu0 }
  0xfc   : > { %v1004_v1 = vadd.f32 %v1003_v63, %v1002_v62  ;;  %v1005_v2 = vpop.f32.mrb[2].mxu0 }
  0xfd   : > { %v1006_v3 = vpop.f32.mrb[3].mxu0  ;;  %v759_v4 = vpop.f32.mrb[0].mxu1 }
  0xfe   : > { %v1007_v5 = vadd.f32 %v1006_v3, %v1005_v2  ;;  %v655_v6 = vadd.f32 %v1004_v1, %v1321_v0  ;;  %v761_v7 = vpop.f32.mrb[1].mxu1 }
  0xff   : > { %v762_v8 = vpop.f32.mrb[2].mxu1 }
 0x100   : > { %v760_v9 = vadd.f32 %v759_v4, %v655_v6  ;;  %v658_v10 = vadd.f32 %v1007_v5, %v1321_v0  ;;  %v764_v11 = vpop.f32.mrb[3].mxu1 }
 0x102   : > { %830 = vst [vmem:[%s1328_s23] sm:$0xff] %v760_v9  ;;  %v763_v12 = vadd.f32 %v762_v8, %v658_v10  ;;  %v1008_v13 = vpop.f32.mrb[4].mxu0 }
 0x103   : > { %v1009_v14 = vpop.f32.mrb[5].mxu0 }
 0x104   : > { %831 = vst [vmem:[%s1328_s23 + $0x8] sm:$0xff] %v763_v12  ;;  %v1010_v15 = vadd.f32 %v1009_v14, %v1008_v13  ;;  %v1011_v16 = vpop.f32.mrb[6].mxu0 }
 0x105   : > { %v1012_v17 = vpop.f32.mrb[7].mxu0  ;;  %v767_v18 = vpop.f32.mrb[4].mxu1 }
 0x106   : > { %v1013_v19 = vadd.f32 %v1012_v17, %v1011_v16  ;;  %v663_v20 = vadd.f32 %v1010_v15, %v1321_v0  ;;  %v769_v21 = vpop.f32.mrb[5].mxu1 }
 0x107   : > { %v770_v22 = vpop.f32.mrb[6].mxu1 }
 0x108   : > { %v768_v23 = vadd.f32 %v767_v18, %v663_v20  ;;  %v666_v24 = vadd.f32 %v1013_v19, %v1321_v0  ;;  %v772_v25 = vpop.f32.mrb[7].mxu1 }
 0x10a   : > { %832 = vst [vmem:[%s1328_s23 + $0x10] sm:$0xff] %v768_v23  ;;  %v771_v26 = vadd.f32 %v770_v22, %v666_v24  ;;  %v1014_v27 = vpop.f32.mrb[8].mxu0 }
 0x10b   : > { %v1015_v28 = vpop.f32.mrb[9].mxu0 }
 0x10c   : > { %833 = vst [vmem:[%s1328_s23 + $0x18] sm:$0xff] %v771_v26  ;;  %v1016_v29 = vadd.f32 %v1015_v28, %v1014_v27  ;;  %v1017_v30 = vpop.f32.mrb[10].mxu0 }
 0x10d   : > { %v1018_v31 = vpop.f32.mrb[11].mxu0  ;;  %v775_v32 = vpop.f32.mrb[8].mxu1 }
 0x10e   : > { %v1019_v33 = vadd.f32 %v1018_v31, %v1017_v30  ;;  %v671_v34 = vadd.f32 %v1016_v29, %v1321_v0  ;;  %v777_v35 = vpop.f32.mrb[9].mxu1 }
 0x10f   : > { %v778_v36 = vpop.f32.mrb[10].mxu1 }
 0x110   : > { %v776_v37 = vadd.f32 %v775_v32, %v671_v34  ;;  %v674_v38 = vadd.f32 %v1019_v33, %v1321_v0  ;;  %v780_v39 = vpop.f32.mrb[11].mxu1 }
 0x112   : > { %834 = vst [vmem:[%s1328_s23 + $0x20] sm:$0xff] %v776_v37  ;;  %v779_v40 = vadd.f32 %v778_v36, %v674_v38  ;;  %v1020_v41 = vpop.f32.mrb[12].mxu0 }
 0x113   : > { %v1021_v42 = vpop.f32.mrb[13].mxu0 }
 0x114   : > { %835 = vst [vmem:[%s1328_s23 + $0x28] sm:$0xff] %v779_v40  ;;  %v1022_v43 = vadd.f32 %v1021_v42, %v1020_v41  ;;  %v1023_v44 = vpop.f32.mrb[14].mxu0 }
 0x115   : > { %v1024_v45 = vpop.f32.mrb[15].mxu0  ;;  %v783_v46 = vpop.f32.mrb[12].mxu1 }
 0x116   : > { %v1025_v47 = vadd.f32 %v1024_v45, %v1023_v44  ;;  %v679_v48 = vadd.f32 %v1022_v43, %v1321_v0  ;;  %v785_v49 = vpop.f32.mrb[13].mxu1 }
 0x117   : > { %v786_v50 = vpop.f32.mrb[14].mxu1 }
 0x118   : > { %v784_v51 = vadd.f32 %v783_v46, %v679_v48  ;;  %v682_v52 = vadd.f32 %v1025_v47, %v1321_v0  ;;  %v788_v53 = vpop.f32.mrb[15].mxu1 }
 0x11a   : > { %836 = vst [vmem:[%s1328_s23 + $0x30] sm:$0xff] %v784_v51  ;;  %v787_v54 = vadd.f32 %v786_v50, %v682_v52  ;;  %v1026_v55 = vpop.f32.mrb[16].mxu0 }
 0x11b   : > { %v1027_v56 = vpop.f32.mrb[17].mxu0 }
 0x11c   : > { %837 = vst [vmem:[%s1328_s23 + $0x38] sm:$0xff] %v787_v54  ;;  %v1028_v57 = vadd.f32 %v1027_v56, %v1026_v55  ;;  %v1029_v58 = vpop.f32.mrb[18].mxu0 }
 0x11d   : > { %v1030_v59 = vpop.f32.mrb[19].mxu0  ;;  %v791_v60 = vpop.f32.mrb[16].mxu1 }
 0x11e   : > { %v1031_v61 = vadd.f32 %v1030_v59, %v1029_v58  ;;  %v687_v62 = vadd.f32 %v1028_v57, %v1321_v0  ;;  %v793_v63 = vpop.f32.mrb[17].mxu1 }
 0x11f   : > { %v794_v1 = vpop.f32.mrb[18].mxu1 }
 0x120   : > { %v792_v2 = vadd.f32 %v791_v60, %v687_v62  ;;  %v690_v3 = vadd.f32 %v1031_v61, %v1321_v0  ;;  %v796_v4 = vpop.f32.mrb[19].mxu1 }
 0x122   : > { %838 = vst [vmem:[%s1328_s23 + $0x40] sm:$0xff] %v792_v2  ;;  %v795_v5 = vadd.f32 %v794_v1, %v690_v3  ;;  %v1032_v6 = vpop.f32.mrb[20].mxu0 }
 0x123   : > { %v1033_v7 = vpop.f32.mrb[21].mxu0 }
 0x124   : > { %839 = vst [vmem:[%s1328_s23 + $0x48] sm:$0xff] %v795_v5  ;;  %v1034_v8 = vadd.f32 %v1033_v7, %v1032_v6  ;;  %v1035_v9 = vpop.f32.mrb[22].mxu0 }
 0x125   : > { %v1036_v10 = vpop.f32.mrb[23].mxu0  ;;  %v799_v11 = vpop.f32.mrb[20].mxu1 }
 0x126   : > { %v1037_v12 = vadd.f32 %v1036_v10, %v1035_v9  ;;  %v695_v13 = vadd.f32 %v1034_v8, %v1321_v0  ;;  %v801_v14 = vpop.f32.mrb[21].mxu1 }
 0x127   : > { %v802_v15 = vpop.f32.mrb[22].mxu1 }
 0x128   : > { %v800_v16 = vadd.f32 %v799_v11, %v695_v13  ;;  %v698_v17 = vadd.f32 %v1037_v12, %v1321_v0  ;;  %v804_v18 = vpop.f32.mrb[23].mxu1 }
 0x12a   : > { %840 = vst [vmem:[%s1328_s23 + $0x50] sm:$0xff] %v800_v16  ;;  %v803_v19 = vadd.f32 %v802_v15, %v698_v17  ;;  %v1038_v20 = vpop.f32.mrb[24].mxu0 }
 0x12b   : > { %v1039_v21 = vpop.f32.mrb[25].mxu0 }
 0x12c   : > { %841 = vst [vmem:[%s1328_s23 + $0x58] sm:$0xff] %v803_v19  ;;  %v1040_v22 = vadd.f32 %v1039_v21, %v1038_v20  ;;  %v1041_v23 = vpop.f32.mrb[26].mxu0 }
 0x12d   : > { %v1042_v24 = vpop.f32.mrb[27].mxu0  ;;  %v807_v25 = vpop.f32.mrb[24].mxu1 }
 0x12e   : > { %v1043_v26 = vadd.f32 %v1042_v24, %v1041_v23  ;;  %v703_v27 = vadd.f32 %v1040_v22, %v1321_v0  ;;  %v809_v28 = vpop.f32.mrb[25].mxu1 }
 0x12f   : > { %v810_v29 = vpop.f32.mrb[26].mxu1 }
 0x130   : > { %v808_v30 = vadd.f32 %v807_v25, %v703_v27  ;;  %v706_v31 = vadd.f32 %v1043_v26, %v1321_v0  ;;  %v812_v32 = vpop.f32.mrb[27].mxu1 }
 0x132   : > { %842 = vst [vmem:[%s1328_s23 + $0x60] sm:$0xff] %v808_v30  ;;  %v811_v33 = vadd.f32 %v810_v29, %v706_v31  ;;  %v1044_v34 = vpop.f32.mrb[28].mxu0 }
 0x133   : > { %v1045_v35 = vpop.f32.mrb[29].mxu0 }
 0x134   : > { %843 = vst [vmem:[%s1328_s23 + $0x68] sm:$0xff] %v811_v33  ;;  %v1046_v36 = vadd.f32 %v1045_v35, %v1044_v34  ;;  %v1047_v37 = vpop.f32.mrb[30].mxu0 }
 0x135   : > { %v1048_v38 = vpop.f32.mrb[31].mxu0  ;;  %v815_v39 = vpop.f32.mrb[28].mxu1 }
 0x136   : > { %v1049_v40 = vadd.f32 %v1048_v38, %v1047_v37  ;;  %v711_v41 = vadd.f32 %v1046_v36, %v1321_v0  ;;  %v817_v42 = vpop.f32.mrb[29].mxu1 }
 0x137   : > { %v818_v43 = vpop.f32.mrb[30].mxu1 }
 0x138   : > { %v816_v44 = vadd.f32 %v815_v39, %v711_v41  ;;  %v714_v45 = vadd.f32 %v1049_v40, %v1321_v0  ;;  %v820_v46 = vpop.f32.mrb[31].mxu1 }
 0x13a   : > { %844 = vst [vmem:[%s1328_s23 + $0x70] sm:$0xff] %v816_v44  ;;  %v819_v47 = vadd.f32 %v818_v43, %v714_v45  ;;  %v1050_v48 = vpop.f32.mrb[32].mxu0 }
 0x13b   : > { %v1051_v49 = vpop.f32.mrb[33].mxu0 }
 0x13c   : > { %845 = vst [vmem:[%s1328_s23 + $0x78] sm:$0xff] %v819_v47  ;;  %v1052_v50 = vadd.f32 %v1051_v49, %v1050_v48  ;;  %v1053_v51 = vpop.f32.mrb[34].mxu0 }
 0x13d   : > { %v1054_v52 = vpop.f32.mrb[35].mxu0  ;;  %v823_v53 = vpop.f32.mrb[32].mxu1 }
 0x13e   : > { %v1055_v54 = vadd.f32 %v1054_v52, %v1053_v51  ;;  %v719_v55 = vadd.f32 %v1052_v50, %v1321_v0  ;;  %v825_v56 = vpop.f32.mrb[33].mxu1 }
 0x13f   : > { %v826_v57 = vpop.f32.mrb[34].mxu1 }
 0x140   : > { %v824_v58 = vadd.f32 %v823_v53, %v719_v55  ;;  %v722_v59 = vadd.f32 %v1055_v54, %v1321_v0  ;;  %v828_v60 = vpop.f32.mrb[35].mxu1 }
 0x142   : > { %846 = vst [vmem:[%s1328_s23 + $0x80] sm:$0xff] %v824_v58  ;;  %v827_v61 = vadd.f32 %v826_v57, %v722_v59 }
 0x144   : > { %847 = vst [vmem:[%s1328_s23 + $0x88] sm:$0xff] %v827_v61 }
 0x145 PF: > { %s13_s12 = sadd.s32 1, %s1150_s12  }
 0x146   : > { %p10_p4 = scmp.ge.s32.totalorder %s13_s12, 4  }
 0x148   :  { %12 = sbr.rel (!%p10_p4) target bundleno = 1 (0x1), region = 62 }

// kernel: net_forward.16
= control target key start
LH: loop header
LB: loop body
LE: loop exit
PB: predicated region body
PF: predicated region fallthrough
CT: control target
= control target key end

     0   :  { %s3238_s12 = smov 0   ;;  %s3807_s0 = inlined_call_operand.vmem [shape: bf16[128,2200], index: 0, kind: input, shape index: {}]   ;;  %s3808_s1 = inlined_call_operand.vmem [shape: bf16[2200,128], index: 1, kind: input, shape index: {}]   ;;  %s3809_s2 = inlined_call_operand.vmem [shape: f32[1,128], index: 2, kind: input, shape index: {}]   ;;  %s3810_s3 = inlined_call_operand.vmem [shape: f32[128,128], index: 3, kind: output, shape index: {}]  }
   0x1 LB: > { %s2387_s13 = sadd.s32 4294967295, %s3215_s12   ;;  %p2391_p0 = scmp.ge.s32.totalorder %s3215_s12, 1  ;;  %s3215_s12 = sphi %s3238_s12, %s13_s12  }
   0x2   : > { %p139_p1 = scmp.lt.s32.totalorder %s3215_s12, 3 }
   0x4   : > { %p140_p2 = pnand %p2391_p0, %p139_p1 }
   0x5   : > { %v2963_v0 = vld [vmem:[%s3808_s1 + $0x40] sm:$0xff] (!%p140_p2)   ;;  %v2967_v4 = vld [vmem:[%s3808_s1 + $0x48] sm:$0xff] (!%p140_p2)   ;;  %v2971_v8 = vld [vmem:[%s3808_s1 + $0x50] sm:$0xff] (!%p140_p2)   ;;  %s2392_s19 = sshll.u32 (!%p140_p2), %s2387_s13, 3  ;;  %vm1713_vm0 = vcmask (!%p140_p2), 195584   ;;  %vm1726_vm1 = vcmask (!%p140_p2), 1043456  }
   0x6   : > { %143 = sbr.rel (%p140_p2) target bundleno = 403 (0x193), region = 32  ;;  %v2964_v1 = vld [vmem:[%s3808_s1 + $0xc0] sm:$0xff] (!%p140_p2)   ;;  %2613 = vmatprep.subr.bf16.mxu0 (!%p140_p2), %v2963_v0  ;;  %v2968_v5 = vld [vmem:[%s3808_s1 + $0xc8] sm:$0xff] (!%p140_p2)   ;;  %v2972_v9 = vld [vmem:[%s3808_s1 + $0xd0] sm:$0xff] (!%p140_p2)   ;;  %p165_p3 = scmp.lt.s32.totalorder (!%p140_p2), %s2392_s19, 15 }
   0x7   : > { %v2965_v2 = vld [vmem:[%s3808_s1] sm:$0xff] (!%p140_p2)   ;;  %2653 = vmatprep.subr.bf16.mxu1 (!%p140_p2), %v2964_v1  ;;  %v2969_v6 = vld [vmem:[%s3808_s1 + $0x8] sm:$0xff] (!%p140_p2)   ;;  %v2973_v10 = vld [vmem:[%s3808_s1 + $0x10] sm:$0xff] (!%p140_p2)  }
   0x8   : > { %v2966_v3 = vld [vmem:[%s3808_s1 + $0x80] sm:$0xff] (!%p140_p2)   ;;  %2614 = vmatpush3.bf16.msra.mxu0 (!%p140_p2), %v2965_v2  ;;  %v2970_v7 = vld [vmem:[%s3808_s1 + $0x88] sm:$0xff] (!%p140_p2)   ;;  %v2974_v11 = vld [vmem:[%s3808_s1 + $0x90] sm:$0xff] (!%p140_p2)  }
   0x9   : > { %2654 = vmatpush3.bf16.msra.mxu1 (!%p140_p2), %v2966_v3  ;;  %2615 = vmatprep.subr.bf16.mxu0 (!%p140_p2), %v2967_v4  ;;  %v2975_v12 = vld [vmem:[%s3808_s1 + $0x58] sm:$0xff] (!%p140_p2)   ;;  %v2979_v16 = vld [vmem:[%s3808_s1 + $0x60] sm:$0xff] (!%p140_p2)   ;;  %v2983_v20 = vld [vmem:[%s3808_s1 + $0x68] sm:$0xff] (!%p140_p2)  }
   0xa   : > { %2655 = vmatprep.subr.bf16.mxu1 (!%p140_p2), %v2968_v5  ;;  %v2976_v13 = vld [vmem:[%s3808_s1 + $0xd8] sm:$0xff] (!%p140_p2)   ;;  %v2980_v17 = vld [vmem:[%s3808_s1 + $0xe0] sm:$0xff] (!%p140_p2)   ;;  %v2984_v21 = vld [vmem:[%s3808_s1 + $0xe8] sm:$0xff] (!%p140_p2)  }
   0xb   : > { %v2977_v14 = vld [vmem:[%s3808_s1 + $0x18] sm:$0xff] (!%p140_p2)   ;;  %v2981_v18 = vld [vmem:[%s3808_s1 + $0x20] sm:$0xff] (!%p140_p2)   ;;  %v2985_v22 = vld [vmem:[%s3808_s1 + $0x28] sm:$0xff] (!%p140_p2)  }
   0xc   : > { %2616 = vmatpush3.bf16.msra.mxu0 (!%p140_p2), %v2969_v6  ;;  %v2978_v15 = vld [vmem:[%s3808_s1 + $0x98] sm:$0xff] (!%p140_p2)   ;;  %v2982_v19 = vld [vmem:[%s3808_s1 + $0xa0] sm:$0xff] (!%p140_p2)   ;;  %v2986_v23 = vld [vmem:[%s3808_s1 + $0xa8] sm:$0xff] (!%p140_p2)  }
   0xd   : > { %2656 = vmatpush3.bf16.msra.mxu1 %v2970_v7  ;;  %2617 = vmatprep.subr.bf16.mxu0 %v2971_v8  ;;  %s3812_s19 = smov (!%p165_p3, %s2392_s19), 15  ;;  %v2987_v24 = vld [vmem:[%s3808_s1 + $0x70] sm:$0xff]   ;;  %v2991_v28 = vld [vmem:[%s3808_s1 + $0x78] sm:$0xff]   ;;  %v3001_v36 = vld [vmem:[%s3808_s1 + $0x140] sm:$0xff]  }
   0xe   : > { %2657 = vmatprep.subr.bf16.mxu1 %v2972_v9  ;;  %v2988_v25 = vld [vmem:[%s3808_s1 + $0xf0] sm:$0xff]   ;;  %s2953_s16 = smul.u32 72, %s3812_s19  ;;  %v2992_v29 = vld [vmem:[%s3808_s1 + $0xf8] sm:$0xff]   ;;  %v3002_v37 = vld [vmem:[%s3808_s1 + $0x1c0] sm:$0xff]  }
   0xf   : > { %v2989_v26 = vld [vmem:[%s3808_s1 + $0x30] sm:$0xff]   ;;  %v2993_v30 = vld [vmem:[%s3808_s1 + $0x38] sm:$0xff]   ;;  %v3003_v38 = vld [vmem:[%s3808_s1 + $0x100] sm:$0xff]  }
  0x10   : > { %2618 = vmatpush3.bf16.msra.mxu0 %v2973_v10  ;;  %v2990_v27 = vld [vmem:[%s3808_s1 + $0xb0] sm:$0xff]   ;;  %s3344_s13 = scalar_lea.vmem %s3807_s0, %s2953_s16  ;;  %v2994_v31 = vld [vmem:[%s3808_s1 + $0xb8] sm:$0xff]   ;;  %v3004_v39 = vld [vmem:[%s3808_s1 + $0x180] sm:$0xff]  }
  0x11   : > { %2658 = vmatpush3.bf16.msra.mxu1 %v2974_v11  ;;  %2619 = vmatprep.subr.bf16.mxu0 %v2975_v12  ;;  %v2995_v32 = vld [vmem:[%s3344_s13] ss:$72 sps:$4 sm:$0xff]   ;;  %v2997_v33 = vld [vmem:[%s3344_s13 + $0x4] ss:$72 sps:$4 sm:$0xff]   ;;  %v3009_v44 = vld [vmem:[%s3344_s13 + $0x94] ss:$72 sps:$4 sm:$0xff]  }
  0x12   : > { %2659 = vmatprep.subr.bf16.mxu1 %v2976_v13  ;;  %v2998_v34 = vld [vmem:[%s3344_s13 + $0x8] ss:$72 sps:$4 sm:$0xff]   ;;  %v3000_v35 = vld [vmem:[%s3344_s13 + $0xc] ss:$72 sps:$4 sm:$0xff]   ;;  %1762 = vmatprep.mubr.bf16.mxu0 %v2997_v33  ;;  %v3011_v45 = vld [vmem:[%s3344_s13 + $0x9c] ss:$72 sps:$4 sm:$0xff]  }
  0x13   : > { %1827 = vmatprep.mubr.bf16.mxu1 %v3000_v35  ;;  %v3005_v40 = vld [vmem:[%s3808_s1 + $0x148] sm:$0xff]   ;;  %v3013_v46 = vld [vmem:[%s3344_s13 + $0x90] ss:$72 sps:$4 sm:$0xff]   ;;  %v3029_v60 = vld [vmem:[%s3808_s1 + $0x160] sm:$0xff]  }
  0x14   : > { %2620 = vmatpush3.bf16.msra.mxu0 %v2977_v14  ;;  %v3006_v41 = vld [vmem:[%s3808_s1 + $0x1c8] sm:$0xff]   ;;  %v3014_v47 = vld [vmem:[%s3344_s13 + $0x98] ss:$72 sps:$4 sm:$0xff]   ;;  %v3015_v48 = vld [vmem:[%s3808_s1 + $0x150] sm:$0xff]  }
  0x15   : > { %2660 = vmatpush3.bf16.msra.mxu1 %v2978_v15  ;;  %2621 = vmatprep.subr.bf16.mxu0 %v2979_v16  ;;  %v3007_v42 = vld [vmem:[%s3808_s1 + $0x108] sm:$0xff]   ;;  %v3016_v49 = vld [vmem:[%s3808_s1 + $0x1d0] sm:$0xff]   ;;  %v3019_v52 = vld [vmem:[%s3808_s1 + $0x158] sm:$0xff]  }
  0x16   : > { %2661 = vmatprep.subr.bf16.mxu1 %v2980_v17  ;;  %v3008_v43 = vld [vmem:[%s3808_s1 + $0x188] sm:$0xff]   ;;  %v3017_v50 = vld [vmem:[%s3808_s1 + $0x110] sm:$0xff]   ;;  %v3020_v53 = vld [vmem:[%s3808_s1 + $0x1d8] sm:$0xff]  }
  0x17   : > { %v3018_v51 = vld [vmem:[%s3808_s1 + $0x190] sm:$0xff]   ;;  %v3021_v54 = vld [vmem:[%s3808_s1 + $0x118] sm:$0xff]   ;;  %v3023_v56 = vld [vmem:[%s3344_s13 + $0x124] ss:$72 sps:$4 sm:$0xff]  }
  0x18   : > { %2622 = vmatpush3.bf16.msra.mxu0 %v2981_v18  ;;  %v3022_v55 = vld [vmem:[%s3808_s1 + $0x198] sm:$0xff]   ;;  %v3025_v57 = vld [vmem:[%s3344_s13 + $0x12c] ss:$72 sps:$4 sm:$0xff]   ;;  %v3027_v58 = vld [vmem:[%s3344_s13 + $0x120] ss:$72 sps:$4 sm:$0xff]  }
  0x19   : > { %2662 = vmatpush3.bf16.msra.mxu1 %v2982_v19  ;;  %2623 = vmatprep.subr.bf16.mxu0 %v2983_v20  ;;  %v3028_v59 = vld [vmem:[%s3344_s13 + $0x128] ss:$72 sps:$4 sm:$0xff]   ;;  %v3030_v61 = vld [vmem:[%s3808_s1 + $0x1e0] sm:$0xff]   ;;  %v3037_v4 = vld [vmem:[%s3344_s13 + $0x1b4] ss:$72 sps:$4 sm:$0xff]  }
  0x1a   : > { %2663 = vmatprep.subr.bf16.mxu1 %v2984_v21  ;;  %v3031_v62 = vld [vmem:[%s3808_s1 + $0x120] sm:$0xff]   ;;  %v3033_v0 = vld [vmem:[%s3808_s1 + $0x168] sm:$0xff]   ;;  %v3041_v6 = vld [vmem:[%s3344_s13 + $0x1b0] ss:$72 sps:$4 sm:$0xff]  }
  0x1b   : > { %v3032_v63 = vld [vmem:[%s3808_s1 + $0x1a0] sm:$0xff]   ;;  %v3034_v1 = vld [vmem:[%s3808_s1 + $0x1e8] sm:$0xff]   ;;  %v3043_v8 = vld [vmem:[%s3808_s1 + $0x170] sm:$0xff]  }
  0x1c   : > { %2624 = vmatpush3.bf16.msra.mxu0 %v2985_v22  ;;  %v3035_v2 = vld [vmem:[%s3808_s1 + $0x128] sm:$0xff]   ;;  %v3039_v5 = vld [vmem:[%s3344_s13 + $0x1bc] ss:$72 sps:$4 sm:$0xff]   ;;  %v3042_v7 = vld [vmem:[%s3344_s13 + $0x1b8] ss:$72 sps:$4 sm:$0xff]  }
  0x1d   : > { %2664 = vmatpush3.bf16.msra.mxu1 %v2986_v23  ;;  %2625 = vmatprep.subr.bf16.mxu0 %v2987_v24  ;;  %v3036_v3 = vld [vmem:[%s3808_s1 + $0x1a8] sm:$0xff]   ;;  %v3044_v9 = vld [vmem:[%s3808_s1 + $0x1f0] sm:$0xff]   ;;  %v3047_v12 = vld [vmem:[%s3808_s1 + $0x178] sm:$0xff]  }
  0x1e   : > { %2665 = vmatprep.subr.bf16.mxu1 %v2988_v25  ;;  %v3045_v10 = vld [vmem:[%s3808_s1 + $0x130] sm:$0xff]   ;;  %v3048_v13 = vld [vmem:[%s3808_s1 + $0x1f8] sm:$0xff]   ;;  %v3057_v20 = vld [vmem:[%s3808_s1 + $0x240] sm:$0xff]  }
  0x1f   : > { %v3046_v11 = vld [vmem:[%s3808_s1 + $0x1b0] sm:$0xff]   ;;  %v3049_v14 = vld [vmem:[%s3808_s1 + $0x138] sm:$0xff]   ;;  %v3058_v21 = vld [vmem:[%s3808_s1 + $0x2c0] sm:$0xff]  }
  0x20   : > { %2626 = vmatpush3.bf16.msra.mxu0 %v2989_v26  ;;  %v3050_v15 = vld [vmem:[%s3808_s1 + $0x1b8] sm:$0xff]   ;;  %v3059_v22 = vld [vmem:[%s3808_s1 + $0x200] sm:$0xff]   ;;  %v3061_v24 = vld [vmem:[%s3808_s1 + $0x248] sm:$0xff]  }
  0x21   : > { %2666 = vmatpush3.bf16.msra.mxu1 %v2990_v27  ;;  %2627 = vmatprep.subr.bf16.mxu0 %v2991_v28  ;;  %v3051_v16 = vld [vmem:[%s3344_s13 + $0x10] ss:$72 sps:$4 sm:$0xff]   ;;  %v3053_v17 = vld [vmem:[%s3344_s13 + $0x14] ss:$72 sps:$4 sm:$0xff]   ;;  %v3060_v23 = vld [vmem:[%s3808_s1 + $0x280] sm:$0xff]  }
  0x22   : > { %2667 = vmatprep.subr.bf16.mxu1 %v2992_v29  ;;  %v3054_v18 = vld [vmem:[%s3344_s13 + $0x18] ss:$72 sps:$4 sm:$0xff]   ;;  %v3056_v19 = vld [vmem:[%s3344_s13 + $0x1c] ss:$72 sps:$4 sm:$0xff]   ;;  %v3062_v25 = vld [vmem:[%s3808_s1 + $0x2c8] sm:$0xff]  }
  0x23   : > { %v3063_v26 = vld [vmem:[%s3808_s1 + $0x208] sm:$0xff]   ;;  %v3072_v33 = vld [vmem:[%s3808_s1 + $0x2d0] sm:$0xff]  }
  0x24   : > { %2628 = vmatpush3.bf16.msra.mxu0 %v2993_v30  ;;  %v3064_v27 = vld [vmem:[%s3808_s1 + $0x288] sm:$0xff]   ;;  %v3074_v35 = vld [vmem:[%s3808_s1 + $0x290] sm:$0xff]  }
  0x25   : > { %2668 = vmatpush3.bf16.msra.mxu1 %v2994_v31  ;;  %2693 = vmatprep.subr.bf16.mxu0 %v3001_v36  ;;  %v3065_v28 = vld [vmem:[%s3344_s13 + $0xa4] ss:$72 sps:$4 sm:$0xff]   ;;  %v3069_v30 = vld [vmem:[%s3344_s13 + $0xa0] ss:$72 sps:$4 sm:$0xff]   ;;  %v3075_v36 = vld [vmem:[%s3808_s1 + $0x258] sm:$0xff]  }
  0x26   : > { %2733 = vmatprep.subr.bf16.mxu1 %v3002_v37  ;;  %v3067_v29 = vld [vmem:[%s3344_s13 + $0xac] ss:$72 sps:$4 sm:$0xff]   ;;  %v3070_v31 = vld [vmem:[%s3344_s13 + $0xa8] ss:$72 sps:$4 sm:$0xff]   ;;  %v3076_v37 = vld [vmem:[%s3808_s1 + $0x2d8] sm:$0xff]  }
  0x27   : > { %1763 = vmatmul.mubr.bf16.vlgmr.msra.gmra.mrb[0].mxu0 %v2995_v32  ;;  %v3071_v32 = vld [vmem:[%s3808_s1 + $0x250] sm:$0xff]  }
  0x28   : > { %1828 = vmatmul.mubr.bf16.vlgmr.msra.gmra.mrb[0].mxu1 %v2998_v34  ;;  %2694 = vmatpush3.bf16.msra.mxu0 %v3003_v38  ;;  %v3073_v34 = vld [vmem:[%s3808_s1 + $0x210] sm:$0xff]   ;;  %v3077_v38 = vld [vmem:[%s3808_s1 + $0x218] sm:$0xff]  }
  0x29   : > { %2734 = vmatpush3.bf16.msra.mxu1 %v3004_v39  ;;  %2695 = vmatprep.subr.bf16.mxu0 %v3005_v40  ;;  %v3078_v39 = vld [vmem:[%s3808_s1 + $0x298] sm:$0xff]  }
  0x2a   : > { %2735 = vmatprep.subr.bf16.mxu1 %v3006_v41  ;;  %1770 = vmatprep.mubr.bf16.mxu0 %v3009_v44  ;;  %v3079_v40 = vld [vmem:[%s3344_s13 + $0x134] ss:$72 sps:$4 sm:$0xff]   ;;  %v3085_v44 = vld [vmem:[%s3808_s1 + $0x260] sm:$0xff]  }
  0x2b   : > { %1835 = vmatprep.mubr.bf16.mxu1 %v3011_v45  ;;  %v3081_v41 = vld [vmem:[%s3344_s13 + $0x13c] ss:$72 sps:$4 sm:$0xff]  }
  0x2c   : > { %2696 = vmatpush3.bf16.msra.mxu0 %v3007_v42  ;;  %v3083_v42 = vld [vmem:[%s3344_s13 + $0x130] ss:$72 sps:$4 sm:$0xff]   ;;  %v3086_v45 = vld [vmem:[%s3808_s1 + $0x2e0] sm:$0xff]  }
  0x2d   : > { %2736 = vmatpush3.bf16.msra.mxu1 %v3008_v43  ;;  %2697 = vmatprep.subr.bf16.mxu0 %v3015_v48  ;;  %v3084_v43 = vld [vmem:[%s3344_s13 + $0x138] ss:$72 sps:$4 sm:$0xff]   ;;  %v3089_v48 = vld [vmem:[%s3808_s1 + $0x268] sm:$0xff]  }
  0x2e   : > { %2737 = vmatprep.subr.bf16.mxu1 %v3016_v49  ;;  %v3090_v49 = vld [vmem:[%s3808_s1 + $0x2e8] sm:$0xff]  }
  0x2f   : > { %1771 = vmatmul.mubr.bf16.gmra.mrb[4].mxu0 %v3013_v46  ;;  %v3087_v46 = vld [vmem:[%s3808_s1 + $0x220] sm:$0xff]  }
  0x30   : > { %1836 = vmatmul.mubr.bf16.gmra.mrb[4].mxu1 %v3014_v47  ;;  %2698 = vmatpush3.bf16.msra.mxu0 %v3017_v50  ;;  %v3088_v47 = vld [vmem:[%s3808_s1 + $0x2a0] sm:$0xff]   ;;  %v3091_v50 = vld [vmem:[%s3808_s1 + $0x228] sm:$0xff]  }
  0x31   : > { %2738 = vmatpush3.bf16.msra.mxu1 %v3018_v51  ;;  %2699 = vmatprep.subr.bf16.mxu0 %v3019_v52  ;;  %v3092_v51 = vld [vmem:[%s3808_s1 + $0x2a8] sm:$0xff]  }
  0x32   : > { %2739 = vmatprep.subr.bf16.mxu1 %v3020_v53  ;;  %1778 = vmatprep.mubr.bf16.mxu0 %v3023_v56  ;;  %v3093_v52 = vld [vmem:[%s3344_s13 + $0x1c4] ss:$72 sps:$4 sm:$0xff]   ;;  %v3099_v56 = vld [vmem:[%s3808_s1 + $0x270] sm:$0xff]  }
  0x33   : > { %1843 = vmatprep.mubr.bf16.mxu1 %v3025_v57  ;;  %v3095_v53 = vld [vmem:[%s3344_s13 + $0x1cc] ss:$72 sps:$4 sm:$0xff]  }
  0x34   : > { %2700 = vmatpush3.bf16.msra.mxu0 %v3021_v54  ;;  %v3097_v54 = vld [vmem:[%s3344_s13 + $0x1c0] ss:$72 sps:$4 sm:$0xff]   ;;  %v3100_v57 = vld [vmem:[%s3808_s1 + $0x2f0] sm:$0xff]  }
  0x35   : > { %2740 = vmatpush3.bf16.msra.mxu1 %v3022_v55  ;;  %2701 = vmatprep.subr.bf16.mxu0 %v3029_v60  ;;  %v3098_v55 = vld [vmem:[%s3344_s13 + $0x1c8] ss:$72 sps:$4 sm:$0xff]   ;;  %v3103_v60 = vld [vmem:[%s3808_s1 + $0x278] sm:$0xff]  }
  0x36   : > { %2741 = vmatprep.subr.bf16.mxu1 %v3030_v61  ;;  %v3104_v61 = vld [vmem:[%s3808_s1 + $0x2f8] sm:$0xff]  }
  0x37   : > { %1779 = vmatmul.mubr.bf16.gmra.mrb[8].mxu0 %v3027_v58  ;;  %v3101_v58 = vld [vmem:[%s3808_s1 + $0x230] sm:$0xff]  }
  0x38   : > { %1844 = vmatmul.mubr.bf16.gmra.mrb[8].mxu1 %v3028_v59  ;;  %2702 = vmatpush3.bf16.msra.mxu0 %v3031_v62  ;;  %v3102_v59 = vld [vmem:[%s3808_s1 + $0x2b0] sm:$0xff]   ;;  %v3105_v62 = vld [vmem:[%s3808_s1 + $0x238] sm:$0xff]  }
  0x39   : > { %2742 = vmatpush3.bf16.msra.mxu1 %v3032_v63  ;;  %2703 = vmatprep.subr.bf16.mxu0 %v3033_v0  ;;  %v3106_v63 = vld [vmem:[%s3808_s1 + $0x2b8] sm:$0xff]   ;;  %v3107_v0 = vld [vmem:[%s3344_s13 + $0x20] ss:$72 sps:$4 sm:$0xff]  }
  0x3a   : > { %2743 = vmatprep.subr.bf16.mxu1 %v3034_v1  ;;  %1786 = vmatprep.mubr.bf16.mxu0 %v3037_v4  ;;  %v3109_v1 = vld [vmem:[%s3344_s13 + $0x24] ss:$72 sps:$4 sm:$0xff]  }
  0x3b   : > { %1851 = vmatprep.mubr.bf16.mxu1 %v3039_v5  ;;  %v3113_v4 = vld [vmem:[%s3808_s1 + $0x340] sm:$0xff]  }
  0x3c   : > { %2704 = vmatpush3.bf16.msra.mxu0 %v3035_v2  ;;  %v3110_v2 = vld [vmem:[%s3344_s13 + $0x28] ss:$72 sps:$4 sm:$0xff]   ;;  %v3114_v5 = vld [vmem:[%s3808_s1 + $0x3c0] sm:$0xff]  }
  0x3d   : > { %2744 = vmatpush3.bf16.msra.mxu1 %v3036_v3  ;;  %2705 = vmatprep.subr.bf16.mxu0 %v3043_v8  ;;  %v3112_v3 = vld [vmem:[%s3344_s13 + $0x2c] ss:$72 sps:$4 sm:$0xff]  }
  0x3e   : > { %2745 = vmatprep.subr.bf16.mxu1 %v3044_v9  ;;  %v3117_v8 = vld [vmem:[%s3808_s1 + $0x348] sm:$0xff]  }
  0x3f   : > { %1787 = vmatmul.mubr.bf16.gmra.mrb[12].mxu0 %v3041_v6  ;;  %v3115_v6 = vld [vmem:[%s3808_s1 + $0x300] sm:$0xff]   ;;  %v3118_v9 = vld [vmem:[%s3808_s1 + $0x3c8] sm:$0xff]  }
  0x40   : > { %1852 = vmatmul.mubr.bf16.gmra.mrb[12].mxu1 %v3042_v7  ;;  %2706 = vmatpush3.bf16.msra.mxu0 %v3045_v10  ;;  %v3116_v7 = vld [vmem:[%s3808_s1 + $0x380] sm:$0xff]   ;;  %v3119_v10 = vld [vmem:[%s3808_s1 + $0x308] sm:$0xff]  }
  0x41   : > { %2746 = vmatpush3.bf16.msra.mxu1 %v3046_v11  ;;  %2707 = vmatprep.subr.bf16.mxu0 %v3047_v12  ;;  %v3120_v11 = vld [vmem:[%s3808_s1 + $0x388] sm:$0xff]   ;;  %v3121_v12 = vld [vmem:[%s3344_s13 + $0xb4] ss:$72 sps:$4 sm:$0xff]  }
  0x42   : > { %2747 = vmatprep.subr.bf16.mxu1 %v3048_v13  ;;  %1892 = vmatprep.mubr.bf16.mxu0 %v3053_v17  ;;  %v3123_v13 = vld [vmem:[%s3344_s13 + $0xbc] ss:$72 sps:$4 sm:$0xff]   ;;  %v3128_v17 = vld [vmem:[%s3808_s1 + $0x3d0] sm:$0xff]  }
  0x43   : > { %1957 = vmatprep.mubr.bf16.mxu1 %v3056_v19  ;;  %v3130_v19 = vld [vmem:[%s3808_s1 + $0x390] sm:$0xff]  }
  0x44   : > { %2708 = vmatpush3.bf16.msra.mxu0 %v3049_v14  ;;  %v3125_v14 = vld [vmem:[%s3344_s13 + $0xb0] ss:$72 sps:$4 sm:$0xff]  }
  0x45   : > { %2748 = vmatpush3.bf16.msra.mxu1 %v3050_v15  ;;  %2773 = vmatprep.subr.bf16.mxu0 %v3057_v20  ;;  %v3126_v15 = vld [vmem:[%s3344_s13 + $0xb8] ss:$72 sps:$4 sm:$0xff]  }
  0x46   : > { %2813 = vmatprep.subr.bf16.mxu1 %v3058_v21  ;;  %v3131_v20 = vld [vmem:[%s3808_s1 + $0x358] sm:$0xff]  }
  0x47   : > { %1893 = vmatmul.mubr.bf16.vlgmr.msra.gmra.mrb[16].mxu0 %v3051_v16  ;;  %v3127_v16 = vld [vmem:[%s3808_s1 + $0x350] sm:$0xff]   ;;  %v3132_v21 = vld [vmem:[%s3808_s1 + $0x3d8] sm:$0xff]  }
  0x48   : > { %1958 = vmatmul.mubr.bf16.vlgmr.msra.gmra.mrb[16].mxu1 %v3054_v18  ;;  %2774 = vmatpush3.bf16.msra.mxu0 %v3059_v22  ;;  %v3129_v18 = vld [vmem:[%s3808_s1 + $0x310] sm:$0xff]   ;;  %v3133_v22 = vld [vmem:[%s3808_s1 + $0x318] sm:$0xff]  }
  0x49   : > { %2814 = vmatpush3.bf16.msra.mxu1 %v3060_v23  ;;  %2775 = vmatprep.subr.bf16.mxu0 %v3061_v24  ;;  %v3134_v23 = vld [vmem:[%s3808_s1 + $0x398] sm:$0xff]   ;;  %v3135_v24 = vld [vmem:[%s3344_s13 + $0x144] ss:$72 sps:$4 sm:$0xff]  }
  0x4a   : > { %2815 = vmatprep.subr.bf16.mxu1 %v3062_v25  ;;  %1900 = vmatprep.mubr.bf16.mxu0 %v3065_v28  ;;  %v3137_v25 = vld [vmem:[%s3344_s13 + $0x14c] ss:$72 sps:$4 sm:$0xff]   ;;  %v3141_v28 = vld [vmem:[%s3808_s1 + $0x360] sm:$0xff]  }
  0x4b   : > { %1965 = vmatprep.mubr.bf16.mxu1 %v3067_v29  ;;  %v3142_v29 = vld [vmem:[%s3808_s1 + $0x3e0] sm:$0xff]  }
  0x4c   : > { %2776 = vmatpush3.bf16.msra.mxu0 %v3063_v26  ;;  %v3139_v26 = vld [vmem:[%s3344_s13 + $0x140] ss:$72 sps:$4 sm:$0xff]  }
  0x4d   : > { %2816 = vmatpush3.bf16.msra.mxu1 %v3064_v27  ;;  %2777 = vmatprep.subr.bf16.mxu0 %v3071_v32  ;;  %v3140_v27 = vld [vmem:[%s3344_s13 + $0x148] ss:$72 sps:$4 sm:$0xff]  }
  0x4e   : > { %2817 = vmatprep.subr.bf16.mxu1 %v3072_v33  ;;  %v3145_v32 = vld [vmem:[%s3808_s1 + $0x368] sm:$0xff]  }
  0x4f   : > { %1901 = vmatmul.mubr.bf16.gmra.mrb[20].mxu0 %v3069_v30  ;;  %v3143_v30 = vld [vmem:[%s3808_s1 + $0x320] sm:$0xff]   ;;  %v3146_v33 = vld [vmem:[%s3808_s1 + $0x3e8] sm:$0xff]  }
  0x50   : > { %1966 = vmatmul.mubr.bf16.gmra.mrb[20].mxu1 %v3070_v31  ;;  %2778 = vmatpush3.bf16.msra.mxu0 %v3073_v34  ;;  %v3144_v31 = vld [vmem:[%s3808_s1 + $0x3a0] sm:$0xff]   ;;  %v3147_v34 = vld [vmem:[%s3808_s1 + $0x328] sm:$0xff]  }
  0x51   : > { %2818 = vmatpush3.bf16.msra.mxu1 %v3074_v35  ;;  %2779 = vmatprep.subr.bf16.mxu0 %v3075_v36  ;;  %v3148_v35 = vld [vmem:[%s3808_s1 + $0x3a8] sm:$0xff]   ;;  %v3149_v36 = vld [vmem:[%s3344_s13 + $0x1d4] ss:$72 sps:$4 sm:$0xff]  }
  0x52   : > { %2819 = vmatprep.subr.bf16.mxu1 %v3076_v37  ;;  %1908 = vmatprep.mubr.bf16.mxu0 %v3079_v40  ;;  %v3151_v37 = vld [vmem:[%s3344_s13 + $0x1dc] ss:$72 sps:$4 sm:$0xff]   ;;  %v3155_v40 = vld [vmem:[%s3808_s1 + $0x370] sm:$0xff]  }
  0x53   : > { %1973 = vmatprep.mubr.bf16.mxu1 %v3081_v41  ;;  %v3156_v41 = vld [vmem:[%s3808_s1 + $0x3f0] sm:$0xff]  }
  0x54   : > { %2780 = vmatpush3.bf16.msra.mxu0 %v3077_v38  ;;  %v3153_v38 = vld [vmem:[%s3344_s13 + $0x1d0] ss:$72 sps:$4 sm:$0xff]  }
  0x55   : > { %2820 = vmatpush3.bf16.msra.mxu1 %v3078_v39  ;;  %2781 = vmatprep.subr.bf16.mxu0 %v3085_v44  ;;  %v3154_v39 = vld [vmem:[%s3344_s13 + $0x1d8] ss:$72 sps:$4 sm:$0xff]  }
  0x56   : > { %2821 = vmatprep.subr.bf16.mxu1 %v3086_v45  ;;  %v3159_v44 = vld [vmem:[%s3808_s1 + $0x378] sm:$0xff]  }
  0x57   : > { %1909 = vmatmul.mubr.bf16.gmra.mrb[24].mxu0 %v3083_v42  ;;  %v3157_v42 = vld [vmem:[%s3808_s1 + $0x330] sm:$0xff]   ;;  %v3160_v45 = vld [vmem:[%s3808_s1 + $0x3f8] sm:$0xff]  }
  0x58   : > { %1974 = vmatmul.mubr.bf16.gmra.mrb[24].mxu1 %v3084_v43  ;;  %2782 = vmatpush3.bf16.msra.mxu0 %v3087_v46  ;;  %v3158_v43 = vld [vmem:[%s3808_s1 + $0x3b0] sm:$0xff]   ;;  %v3161_v46 = vld [vmem:[%s3808_s1 + $0x338] sm:$0xff]  }
  0x59   : > { %2822 = vmatpush3.bf16.msra.mxu1 %v3088_v47  ;;  %2783 = vmatprep.subr.bf16.mxu0 %v3089_v48  ;;  %v3162_v47 = vld [vmem:[%s3808_s1 + $0x3b8] sm:$0xff]  }
  0x5a   : > { %2823 = vmatprep.subr.bf16.mxu1 %v3090_v49  ;;  %1916 = vmatprep.mubr.bf16.mxu0 %v3093_v52  ;;  %v3163_v48 = vld [vmem:[%s3344_s13 + $0x30] ss:$72 sps:$4 sm:$0xff]   ;;  %v3165_v49 = vld [vmem:[%s3344_s13 + $0x34] ss:$72 sps:$4 sm:$0xff]  }
  0x5b   : > { %1981 = vmatprep.mubr.bf16.mxu1 %v3095_v53  ;;  %v3168_v52 = vld [vmem:[%s3344_s13 + $0x3c] ss:$72 sps:$4 sm:$0xff]  }
  0x5c   : > { %2784 = vmatpush3.bf16.msra.mxu0 %v3091_v50  ;;  %v3217_v50 = vmov 0   ;;  %v3169_v53 = vld [vmem:[%s3808_s1 + $0x400] sm:$0xff]  }
  0x5d   : > { %2824 = vmatpush3.bf16.msra.mxu1 %v3092_v51  ;;  %2785 = vmatprep.subr.bf16.mxu0 %v3099_v56  ;;  %v3166_v51 = vld [vmem:[%s3344_s13 + $0x38] ss:$72 sps:$4 sm:$0xff]   ;;  %v3174_v56 = vld [vmem:[%s3344_s13 + $0xcc] ss:$72 sps:$4 sm:$0xff]  }
  0x5e   : > { %2825 = vmatprep.subr.bf16.mxu1 %v3100_v57  ;;  %v3173_v57 = vld [vmem:[%s3344_s13 + $0xc0] ss:$72 sps:$4 sm:$0xff]  }
  0x5f   : > { %1917 = vmatmul.mubr.bf16.gmra.mrb[28].mxu0 %v3097_v54  ;;  %v3170_v54 = vld [vmem:[%s3808_s1 + $0x408] sm:$0xff]  }
  0x60   : > { %1982 = vmatmul.mubr.bf16.gmra.mrb[28].mxu1 %v3098_v55  ;;  %2786 = vmatpush3.bf16.msra.mxu0 %v3101_v58  ;;  %v3171_v55 = vld [vmem:[%s3344_s13 + $0xc4] ss:$72 sps:$4 sm:$0xff]   ;;  %v3176_v58 = vld [vmem:[%s3808_s1 + $0x410] sm:$0xff]  }
  0x61   : > { %2826 = vmatpush3.bf16.msra.mxu1 %v3102_v59  ;;  %2787 = vmatprep.subr.bf16.mxu0 %v3103_v60  ;;  %v3177_v59 = vld [vmem:[%s3344_s13 + $0xc8] ss:$72 sps:$4 sm:$0xff]   ;;  %v3179_v60 = vld [vmem:[%s3344_s13 + $0x154] ss:$72 sps:$4 sm:$0xff]  }
  0x62   : > { %2827 = vmatprep.subr.bf16.mxu1 %v3104_v61  ;;  %2022 = vmatprep.mubr.bf16.mxu0 %v3109_v1  ;;  %v3182_v61 = vld [vmem:[%s3344_s13 + $0x15c] ss:$72 sps:$4 sm:$0xff]   ;;  %v3185_v1 = vld [vmem:[%s3344_s13 + $0x158] ss:$72 sps:$4 sm:$0xff]  }
  0x63   : > { %2087 = vmatprep.mubr.bf16.mxu1 %v3112_v3  ;;  %v3190_v3 = vld [vmem:[%s3344_s13 + $0x1ec] ss:$72 sps:$4 sm:$0xff]  }
  0x64   : > { %2788 = vmatpush3.bf16.msra.mxu0 %v3105_v62  ;;  %v3178_v62 = vld [vmem:[%s3808_s1 + $0x418] sm:$0xff]  }
  0x65   : > { %2828 = vmatpush3.bf16.msra.mxu1 %v3106_v63  ;;  %2853 = vmatprep.subr.bf16.mxu0 %v3113_v4  ;;  %v3181_v63 = vld [vmem:[%s3344_s13 + $0x150] ss:$72 sps:$4 sm:$0xff]   ;;  %v3186_v4 = vld [vmem:[%s3808_s1 + $0x428] sm:$0xff]  }
  0x66   : > { %2893 = vmatprep.subr.bf16.mxu1 %v3114_v5  ;;  %v3189_v5 = vld [vmem:[%s3344_s13 + $0x1e0] ss:$72 sps:$4 sm:$0xff]  }
  0x67   : > { %2023 = vmatmul.mubr.bf16.vlgmr.msra.gmra.mrb[32].mxu0 %v3107_v0  ;;  %v3184_v0 = vld [vmem:[%s3808_s1 + $0x420] sm:$0xff]  }
  0x68   : > { %2088 = vmatmul.mubr.bf16.vlgmr.msra.gmra.mrb[32].mxu1 %v3110_v2  ;;  %2854 = vmatpush3.bf16.msra.mxu0 %v3115_v6  ;;  %v3187_v2 = vld [vmem:[%s3344_s13 + $0x1e4] ss:$72 sps:$4 sm:$0xff]   ;;  %v3192_v6 = vld [vmem:[%s3808_s1 + $0x430] sm:$0xff]  }
  0x69   : > { %2894 = vmatpush3.bf16.msra.mxu1 %v3116_v7  ;;  %2855 = vmatprep.subr.bf16.mxu0 %v3117_v8  ;;  %v3193_v7 = vld [vmem:[%s3344_s13 + $0x1e8] ss:$72 sps:$4 sm:$0xff]   ;;  %v3199_v8 = vld [vmem:[%s3344_s13 + $0x44] ss:$72 sps:$4 sm:$0xff]  }
  0x6a   : > { %2895 = vmatprep.subr.bf16.mxu1 %v3118_v9  ;;  %2030 = vmatprep.mubr.bf16.mxu0 %v3121_v12  ;;  %v3202_v9 = vld [vmem:[%s3344_s13 + $0x164] ss:$72 sps:$4 sm:$0xff]   ;;  %v3196_v12 = vld [vmem:[%s3808_s1 + $0x448] ss:$0 sps:$4 sm:$0xff]  }
  0x6b   : > { %2095 = vmatprep.mubr.bf16.mxu1 %v3123_v13  ;;  %v1728_v13 = vsel %vm1726_vm1, %v3196_v12, 0 }
  0x6c   : > { %2856 = vmatpush3.bf16.msra.mxu0 %v3119_v10  ;;  %v3194_v10 = vld [vmem:[%s3808_s1 + $0x438] sm:$0xff]  }
  0x6d   : > { %2896 = vmatpush3.bf16.msra.mxu1 %v3120_v11  ;;  %2857 = vmatprep.subr.bf16.mxu0 %v3127_v16  ;;  %v3195_v11 = vld [vmem:[%s3808_s1 + $0x440] sm:$0xff]   ;;  %v3203_v16 = vld [vmem:[%s3344_s13 + $0xd4] ss:$72 sps:$4 sm:$0xff]  }
  0x6e   : > { %2897 = vmatprep.subr.bf16.mxu1 %v3128_v17  ;;  %v3205_v17 = vld [vmem:[%s3344_s13 + $0x1f4] ss:$72 sps:$4 sm:$0xff]  }
  0x6f   : > { %2031 = vmatmul.mubr.bf16.gmra.mrb[36].mxu0 %v3125_v14  ;;  %v3197_v14 = vld [vmem:[%s3344_s13 + $0x40] ss:$72 sps:$4 sm:$0xff]  }
  0x70   : > { %2096 = vmatmul.mubr.bf16.gmra.mrb[36].mxu1 %v3126_v15  ;;  %2858 = vmatpush3.bf16.msra.mxu0 %v3129_v18  ;;  %v3200_v15 = vld [vmem:[%s3344_s13 + $0x160] ss:$72 sps:$4 sm:$0xff]   ;;  %v3207_v18 = vld [vmem:[%s3344_s13 + $0xd0] ss:$72 sps:$4 sm:$0xff]  }
  0x71   : > { %2898 = vmatpush3.bf16.msra.mxu1 %v3130_v19  ;;  %2859 = vmatprep.subr.bf16.mxu0 %v3131_v20  ;;  %v3208_v19 = vld [vmem:[%s3344_s13 + $0x1f0] ss:$72 sps:$4 sm:$0xff]   ;;  %s2395_s13 = sshll.u32 %s3812_s19, 3 }
  0x72   : > { %2899 = vmatprep.subr.bf16.mxu1 %v3132_v21  ;;  %2038 = vmatprep.mubr.bf16.mxu0 %v3135_v24  ;;  %s3794_s5 = scalar_lea.vmem %s3810_s3, %s2395_s13 }
  0x73   : > { %2103 = vmatprep.mubr.bf16.mxu1 %v3137_v25 }
  0x74   : > { %2860 = vmatpush3.bf16.msra.mxu0 %v3133_v22  ;;  %v2396_v22 = vld [vmem:[%s3809_s2] ss:$0 sm:$0xff] }
  0x75   : > { %2900 = vmatpush3.bf16.msra.mxu1 %v3134_v23  ;;  %2861 = vmatprep.subr.bf16.mxu0 %v3141_v28 }
  0x76   : > { %2901 = vmatprep.subr.bf16.mxu1 %v3142_v29 }
  0x77   : > { %2039 = vmatmul.mubr.bf16.gmra.mrb[40].mxu0 %v3139_v26 }
  0x78   : > { %2104 = vmatmul.mubr.bf16.gmra.mrb[40].mxu1 %v3140_v27  ;;  %2862 = vmatpush3.bf16.msra.mxu0 %v3143_v30 }
  0x79   : > { %2902 = vmatpush3.bf16.msra.mxu1 %v3144_v31  ;;  %2863 = vmatprep.subr.bf16.mxu0 %v3145_v32 }
  0x7a   : > { %2903 = vmatprep.subr.bf16.mxu1 %v3146_v33  ;;  %2046 = vmatprep.mubr.bf16.mxu0 %v3149_v36 }
  0x7b   : > { %2111 = vmatprep.mubr.bf16.mxu1 %v3151_v37 }
  0x7c   : > { %2864 = vmatpush3.bf16.msra.mxu0 %v3147_v34 }
  0x7d   : > { %2904 = vmatpush3.bf16.msra.mxu1 %v3148_v35  ;;  %2865 = vmatprep.subr.bf16.mxu0 %v3155_v40 }
  0x7e   : > { %2905 = vmatprep.subr.bf16.mxu1 %v3156_v41 }
  0x7f   : > { %2047 = vmatmul.mubr.bf16.gmra.mrb[44].mxu0 %v3153_v38 }
  0x80   : > { %2112 = vmatmul.mubr.bf16.gmra.mrb[44].mxu1 %v3154_v39  ;;  %2866 = vmatpush3.bf16.msra.mxu0 %v3157_v42 }
  0x81   : > { %2906 = vmatpush3.bf16.msra.mxu1 %v3158_v43  ;;  %2867 = vmatprep.subr.bf16.mxu0 %v3159_v44 }
  0x82   : > { %2907 = vmatprep.subr.bf16.mxu1 %v3160_v45  ;;  %2152 = vmatprep.mubr.bf16.mxu0 %v3165_v49 }
  0x83   : > { %2217 = vmatprep.mubr.bf16.mxu1 %v3168_v52 }
  0x84   : > { %2868 = vmatpush3.bf16.msra.mxu0 %v3161_v46 }
  0x85   : > { %2908 = vmatpush3.bf16.msra.mxu1 %v3162_v47  ;;  %2250 = vmatprep.subr.bf16.mxu0 %v3217_v50 }
  0x86   : > { %2933 = vmatprep.subr.bf16.mxu1 %v3217_v50 }
  0x87   : > { %2153 = vmatmul.mubr.bf16.vlgmr.msra.gmra.mrb[48].mxu0 %v3163_v48 }
  0x88   : > { %2218 = vmatmul.mubr.bf16.vlgmr.msra.gmra.mrb[48].mxu1 %v3166_v51  ;;  %2251 = vmatpush1.bf16.msra.mxu0 %v3169_v53 }
  0x89   : > { %2943 = vmatpush1.bf16.msra.mxu1 %v3169_v53  ;;  %2252 = vmatprep.subr.bf16.mxu0 %v3217_v50 }
  0x8a   : > { %2934 = vmatprep.subr.bf16.mxu1 %v3217_v50  ;;  %2160 = vmatprep.mubr.bf16.mxu0 %v3171_v55 }
  0x8b   : > { %2225 = vmatprep.mubr.bf16.mxu1 %v3174_v56 }
  0x8c   : > { %2253 = vmatpush1.bf16.msra.mxu0 %v3170_v54 }
  0x8d   : > { %2944 = vmatpush1.bf16.msra.mxu1 %v3170_v54  ;;  %2254 = vmatprep.subr.bf16.mxu0 %v3217_v50 }
  0x8e   : > { %2935 = vmatprep.subr.bf16.mxu1 %v3217_v50 }
  0x8f   : > { %2161 = vmatmul.mubr.bf16.gmra.mrb[52].mxu0 %v3173_v57 }
  0x90   : > { %2255 = vmatpush1.bf16.msra.mxu0 %v3176_v58  ;;  %2226 = vmatmul.mubr.bf16.gmra.mrb[52].mxu1 %v3177_v59 }
  0x91   : > { %2945 = vmatpush1.bf16.msra.mxu1 %v3176_v58  ;;  %2256 = vmatprep.subr.bf16.mxu0 %v3217_v50 }
  0x92   : > { %2936 = vmatprep.subr.bf16.mxu1 %v3217_v50  ;;  %2168 = vmatprep.mubr.bf16.mxu0 %v3179_v60 }
  0x93   : > { %2233 = vmatprep.mubr.bf16.mxu1 %v3182_v61 }
  0x94   : > { %2257 = vmatpush1.bf16.msra.mxu0 %v3178_v62 }
  0x95   : > { %2946 = vmatpush1.bf16.msra.mxu1 %v3178_v62  ;;  %2258 = vmatprep.subr.bf16.mxu0 %v3217_v50 }
  0x96   : > { %2937 = vmatprep.subr.bf16.mxu1 %v3217_v50 }
  0x97   : > { %2169 = vmatmul.mubr.bf16.gmra.mrb[56].mxu0 %v3181_v63 }
  0x98   : > { %2259 = vmatpush1.bf16.msra.mxu0 %v3184_v0  ;;  %2234 = vmatmul.mubr.bf16.gmra.mrb[56].mxu1 %v3185_v1 }
  0x99   : > { %2947 = vmatpush1.bf16.msra.mxu1 %v3184_v0  ;;  %2260 = vmatprep.subr.bf16.mxu0 %v3217_v50 }
  0x9a   : > { %2938 = vmatprep.subr.bf16.mxu1 %v3217_v50  ;;  %2176 = vmatprep.mubr.bf16.mxu0 %v3187_v2 }
  0x9b   : > { %2241 = vmatprep.mubr.bf16.mxu1 %v3190_v3 }
  0x9c   : > { %2261 = vmatpush1.bf16.msra.mxu0 %v3186_v4 }
  0x9d   : > { %2948 = vmatpush1.bf16.msra.mxu1 %v3186_v4  ;;  %2262 = vmatprep.subr.bf16.mxu0 %v3217_v50 }
  0x9e   : > { %2939 = vmatprep.subr.bf16.mxu1 %v3217_v50 }
  0x9f   : > { %2177 = vmatmul.mubr.bf16.gmra.mrb[60].mxu0 %v3189_v5 }
  0xa0   : > { %2263 = vmatpush1.bf16.msra.mxu0 %v3192_v6  ;;  %2242 = vmatmul.mubr.bf16.gmra.mrb[60].mxu1 %v3193_v7 }
  0xa1   : > { %2949 = vmatpush1.bf16.msra.mxu1 %v3192_v6  ;;  %2264 = vmatprep.subr.bf16.mxu0 %v3217_v50 }
  0xa2   : > { %2940 = vmatprep.subr.bf16.mxu1 %v3217_v50  ;;  %2607 = vmatprep.mubr.msk.bf16.mxu0 %vm1713_vm0, %v3199_v8 }
  0xa3   : > { %2609 = vmatprep.mubr.msk.bf16.mxu1 %vm1713_vm0, %v3202_v9 }
  0xa4   : > { %2265 = vmatpush1.bf16.msra.mxu0 %v3194_v10 }
  0xa5   : > { %2950 = vmatpush1.bf16.msra.mxu1 %v3194_v10  ;;  %2266 = vmatprep.subr.bf16.mxu0 %v3217_v50 }
  0xa6   : > { %2941 = vmatprep.subr.bf16.mxu1 %v3217_v50 }
  0xa8   : > { %2267 = vmatpush1.bf16.msra.mxu0 %v3195_v11 }
  0xa9   : > { %2951 = vmatpush1.bf16.msra.mxu1 %v3195_v11  ;;  %2268 = vmatprep.subr.bf16.mxu0 %v3217_v50 }
  0xaa   : > { %2942 = vmatprep.subr.bf16.mxu1 %v3217_v50 }
  0xac   : > { %2269 = vmatpush1.bf16.msra.mxu0 %v1728_v13 }
  0xad   : > { %2952 = vmatpush1.bf16.msra.mxu1 %v1728_v13 }
  0xaf   : > { %2283 = vmatmul.mubr.bf16.vlgmr.msra.gmra.mrb[64].mxu0 %v3197_v14 }
  0xb0   : > { %2299 = vmatmul.mubr.bf16.vlgmr.msra.gmra.mrb[64].mxu1 %v3200_v15  ;;  %2608 = vmatprep.mubr.msk.bf16.mxu0 %vm1713_vm0, %v3203_v16 }
  0xb1   : > { %2610 = vmatprep.mubr.msk.bf16.mxu1 %vm1713_vm0, %v3205_v17 }
  0xb7   : > { %2291 = vmatmul.mubr.bf16.gmra.mrb[68].mxu0 %v3207_v18 }
  0xb8   : > { %2307 = vmatmul.mubr.bf16.gmra.mrb[68].mxu1 %v3208_v19 }
  0xfa   : > { %v2629_v20 = vpop.f32.mrb[0].mxu0 }
  0xfb   : > { %v2669_v21 = vpop.f32.mrb[0].mxu1  ;;  %v2630_v23 = vpop.f32.mrb[1].mxu0 }
  0xfc   : > { %v2631_v24 = vadd.f32 %v2630_v23, %v2629_v20  ;;  %v2670_v25 = vpop.f32.mrb[1].mxu1  ;;  %v2632_v26 = vpop.f32.mrb[2].mxu0 }
  0xfd   : > { %v2671_v27 = vadd.f32 %v2670_v25, %v2669_v21  ;;  %v2672_v28 = vpop.f32.mrb[2].mxu1  ;;  %v2633_v29 = vpop.f32.mrb[3].mxu0 }
  0xfe   : > { %v1765_v30 = vadd.f32 %v2631_v24, %v2396_v22  ;;  %v2634_v31 = vadd.f32 %v2633_v29, %v2632_v26  ;;  %v2673_v32 = vpop.f32.mrb[3].mxu1 }
  0xff   : > { %v2674_v33 = vadd.f32 %v2673_v32, %v2672_v28 }
 0x100   : > { %v1830_v34 = vadd.f32 %v2671_v27, %v1765_v30  ;;  %v1768_v35 = vadd.f32 %v2634_v31, %v2396_v22 }
 0x102   : > { %v1833_v36 = vadd.f32 %v2674_v33, %v1768_v35  ;;  %v2635_v37 = vpop.f32.mrb[4].mxu0 }
 0x103   : > { %v2675_v38 = vpop.f32.mrb[4].mxu1  ;;  %v2636_v39 = vpop.f32.mrb[5].mxu0 }
 0x104   : > { %v2637_v40 = vadd.f32 %v2636_v39, %v2635_v37  ;;  %v2676_v41 = vpop.f32.mrb[5].mxu1  ;;  %v2638_v42 = vpop.f32.mrb[6].mxu0 }
 0x105   : > { %v2677_v43 = vadd.f32 %v2676_v41, %v2675_v38  ;;  %v2678_v44 = vpop.f32.mrb[6].mxu1  ;;  %v2639_v45 = vpop.f32.mrb[7].mxu0 }
 0x106   : > { %v1773_v46 = vadd.f32 %v2637_v40, %v2396_v22  ;;  %v2640_v47 = vadd.f32 %v2639_v45, %v2638_v42  ;;  %v2679_v48 = vpop.f32.mrb[7].mxu1 }
 0x107   : > { %v2680_v49 = vadd.f32 %v2679_v48, %v2678_v44 }
 0x108   : > { %v1838_v50 = vadd.f32 %v2677_v43, %v1773_v46  ;;  %v1776_v51 = vadd.f32 %v2640_v47, %v2396_v22 }
 0x10a   : > { %v3769_v52 = vadd.f32 %v2680_v49, %v1776_v51  ;;  %v2641_v53 = vpop.f32.mrb[8].mxu0 }
 0x10b   : > { %v2681_v54 = vpop.f32.mrb[8].mxu1  ;;  %v2642_v55 = vpop.f32.mrb[9].mxu0 }
 0x10c   : > { %v2643_v56 = vadd.f32 %v2642_v55, %v2641_v53  ;;  %v2682_v57 = vpop.f32.mrb[9].mxu1  ;;  %v2644_v58 = vpop.f32.mrb[10].mxu0 }
 0x10d   : > { %v2683_v59 = vadd.f32 %v2682_v57, %v2681_v54  ;;  %v2684_v60 = vpop.f32.mrb[10].mxu1  ;;  %v2645_v61 = vpop.f32.mrb[11].mxu0 }
 0x10e   : > { %v1781_v62 = vadd.f32 %v2643_v56, %v2396_v22  ;;  %v2646_v63 = vadd.f32 %v2645_v61, %v2644_v58  ;;  %v2685_v0 = vpop.f32.mrb[11].mxu1 }
 0x10f   : > { %v2686_v1 = vadd.f32 %v2685_v0, %v2684_v60 }
 0x110   : > { %v1846_v2 = vadd.f32 %v2683_v59, %v1781_v62  ;;  %v1784_v3 = vadd.f32 %v2646_v63, %v2396_v22 }
 0x112   : > { %v3771_v4 = vadd.f32 %v2686_v1, %v1784_v3  ;;  %v2647_v5 = vpop.f32.mrb[12].mxu0 }
 0x113   : > { %v2687_v6 = vpop.f32.mrb[12].mxu1  ;;  %v2648_v7 = vpop.f32.mrb[13].mxu0 }
 0x114   : > { %v2688_v8 = vpop.f32.mrb[13].mxu1  ;;  %v2649_v9 = vadd.f32 %v2648_v7, %v2647_v5  ;;  %v2650_v11 = vpop.f32.mrb[14].mxu0 }
 0x115   : > { %v2689_v10 = vadd.f32 %v2688_v8, %v2687_v6  ;;  %v2690_v12 = vpop.f32.mrb[14].mxu1  ;;  %v2651_v13 = vpop.f32.mrb[15].mxu0 }
 0x116   : > { %v2691_v14 = vpop.f32.mrb[15].mxu1  ;;  %v1789_v15 = vadd.f32 %v2649_v9, %v2396_v22  ;;  %v2652_v16 = vadd.f32 %v2651_v13, %v2650_v11 }
 0x117   : > { %v2692_v17 = vadd.f32 %v2691_v14, %v2690_v12 }
 0x118   : > { %v1854_v18 = vadd.f32 %v2689_v10, %v1789_v15  ;;  %v1792_v19 = vadd.f32 %v2652_v16, %v2396_v22 }
 0x11a   : > { %v3773_v20 = vadd.f32 %v2692_v17, %v1792_v19  ;;  %v2709_v21 = vpop.f32.mrb[16].mxu0 }
 0x11b   : > { %v2710_v23 = vpop.f32.mrb[17].mxu0  ;;  %v2749_v24 = vpop.f32.mrb[16].mxu1 }
 0x11c   : > { %v2711_v25 = vadd.f32 %v2710_v23, %v2709_v21  ;;  %v2712_v26 = vpop.f32.mrb[18].mxu0  ;;  %v2750_v27 = vpop.f32.mrb[17].mxu1 }
 0x11d   : > { %v2713_v28 = vpop.f32.mrb[19].mxu0  ;;  %v2751_v30 = vadd.f32 %v2750_v27, %v2749_v24  ;;  %v2752_v31 = vpop.f32.mrb[18].mxu1 }
 0x11e   : > { %v1895_v29 = vadd.f32 %v2711_v25, %v1830_v34  ;;  %v2714_v32 = vadd.f32 %v2713_v28, %v2712_v26  ;;  %v2753_v33 = vpop.f32.mrb[19].mxu1 }
 0x11f   : > { %v2754_v38 = vadd.f32 %v2753_v33, %v2752_v31 }
 0x120   : > { %v1960_v35 = vadd.f32 %v2751_v30, %v1895_v29  ;;  %v1898_v37 = vadd.f32 %v2714_v32, %v1833_v36 }
 0x122   : > { %v3775_v39 = vadd.f32 %v2754_v38, %v1898_v37  ;;  %v2715_v22 = vpop.f32.mrb[20].mxu0 }
 0x123   : > { %v2755_v40 = vpop.f32.mrb[20].mxu1  ;;  %v2716_v41 = vpop.f32.mrb[21].mxu0 }
 0x124   : > { %v2717_v42 = vadd.f32 %v2716_v41, %v2715_v22  ;;  %v2756_v43 = vpop.f32.mrb[21].mxu1  ;;  %v2718_v44 = vpop.f32.mrb[22].mxu0 }
 0x125   : > { %v2757_v45 = vadd.f32 %v2756_v43, %v2755_v40  ;;  %v2758_v46 = vpop.f32.mrb[22].mxu1  ;;  %v2719_v47 = vpop.f32.mrb[23].mxu0 }
 0x126   : > { %v1903_v48 = vadd.f32 %v2717_v42, %v1838_v50  ;;  %v2720_v34 = vadd.f32 %v2719_v47, %v2718_v44  ;;  %v2759_v49 = vpop.f32.mrb[23].mxu1 }
 0x127   : > { %v2760_v51 = vadd.f32 %v2759_v49, %v2758_v46 }
 0x128   : > { %v1968_v53 = vadd.f32 %v2757_v45, %v1903_v48  ;;  %v1906_v54 = vadd.f32 %v2720_v34, %v3769_v52 }
 0x12a   : > { %v3778_v36 = vadd.f32 %v2760_v51, %v1906_v54  ;;  %v2721_v55 = vpop.f32.mrb[24].mxu0 }
 0x12b   : > { %v2761_v56 = vpop.f32.mrb[24].mxu1  ;;  %v2722_v57 = vpop.f32.mrb[25].mxu0 }
 0x12c   : > { %v2762_v58 = vpop.f32.mrb[25].mxu1  ;;  %v2723_v59 = vadd.f32 %v2722_v57, %v2721_v55  ;;  %v2724_v61 = vpop.f32.mrb[26].mxu0 }
 0x12d   : > { %v2763_v60 = vadd.f32 %v2762_v58, %v2761_v56  ;;  %v2764_v62 = vpop.f32.mrb[26].mxu1  ;;  %v2725_v63 = vpop.f32.mrb[27].mxu0 }
 0x12e   : > { %v2765_v0 = vpop.f32.mrb[27].mxu1  ;;  %v1911_v1 = vadd.f32 %v2723_v59, %v1846_v2  ;;  %v2726_v50 = vadd.f32 %v2725_v63, %v2724_v61 }
 0x12f   : > { %v2766_v3 = vadd.f32 %v2765_v0, %v2764_v62 }
 0x130   : > { %v1976_v5 = vadd.f32 %v2763_v60, %v1911_v1  ;;  %v1914_v6 = vadd.f32 %v2726_v50, %v3771_v4 }
 0x132   : > { %v3781_v7 = vadd.f32 %v2766_v3, %v1914_v6  ;;  %v2727_v52 = vpop.f32.mrb[28].mxu0 }
 0x133   : > { %v2767_v8 = vpop.f32.mrb[28].mxu1  ;;  %v2728_v9 = vpop.f32.mrb[29].mxu0 }
 0x134   : > { %v2729_v10 = vadd.f32 %v2728_v9, %v2727_v52  ;;  %v2768_v11 = vpop.f32.mrb[29].mxu1  ;;  %v2730_v12 = vpop.f32.mrb[30].mxu0 }
 0x135   : > { %v2769_v13 = vadd.f32 %v2768_v11, %v2767_v8  ;;  %v2770_v14 = vpop.f32.mrb[30].mxu1  ;;  %v2731_v15 = vpop.f32.mrb[31].mxu0 }
 0x136   : > { %v1919_v16 = vadd.f32 %v2729_v10, %v1854_v18  ;;  %v2732_v17 = vadd.f32 %v2731_v15, %v2730_v12  ;;  %v2771_v19 = vpop.f32.mrb[31].mxu1 }
 0x137   : > { %v2772_v2 = vadd.f32 %v2771_v19, %v2770_v14 }
 0x138   : > { %v1984_v21 = vadd.f32 %v2769_v13, %v1919_v16  ;;  %v1922_v23 = vadd.f32 %v2732_v17, %v3773_v20 }
 0x13a   : > { %v3784_v24 = vadd.f32 %v2772_v2, %v1922_v23  ;;  %v2789_v4 = vpop.f32.mrb[32].mxu0 }
 0x13b   : > { %v2829_v25 = vpop.f32.mrb[32].mxu1  ;;  %v2790_v26 = vpop.f32.mrb[33].mxu0 }
 0x13c   : > { %v2791_v27 = vadd.f32 %v2790_v26, %v2789_v4  ;;  %v2830_v28 = vpop.f32.mrb[33].mxu1  ;;  %v2792_v29 = vpop.f32.mrb[34].mxu0 }
 0x13d   : > { %v2831_v30 = vadd.f32 %v2830_v28, %v2829_v25  ;;  %v2832_v31 = vpop.f32.mrb[34].mxu1  ;;  %v2793_v32 = vpop.f32.mrb[35].mxu0 }
 0x13e   : > { %v2025_v33 = vadd.f32 %v2791_v27, %v1960_v35  ;;  %v2794_v37 = vadd.f32 %v2793_v32, %v2792_v29  ;;  %v2833_v18 = vpop.f32.mrb[35].mxu1 }
 0x13f   : > { %v2834_v38 = vadd.f32 %v2833_v18, %v2832_v31 }
 0x140   : > { %v2090_v22 = vadd.f32 %v2831_v30, %v2025_v33  ;;  %v2028_v40 = vadd.f32 %v2794_v37, %v3775_v39 }
 0x142   : > { %v2093_v41 = vadd.f32 %v2834_v38, %v2028_v40  ;;  %v2795_v20 = vpop.f32.mrb[36].mxu0 }
 0x143   : > { %v2835_v42 = vpop.f32.mrb[36].mxu1  ;;  %v2796_v43 = vpop.f32.mrb[37].mxu0 }
 0x144   : > { %v2836_v44 = vpop.f32.mrb[37].mxu1  ;;  %v2797_v45 = vadd.f32 %v2796_v43, %v2795_v20  ;;  %v2798_v47 = vpop.f32.mrb[38].mxu0 }
 0x145   : > { %v2837_v46 = vadd.f32 %v2836_v44, %v2835_v42  ;;  %v2838_v48 = vpop.f32.mrb[38].mxu1  ;;  %v2799_v34 = vpop.f32.mrb[39].mxu0 }
 0x146   : > { %v2839_v49 = vpop.f32.mrb[39].mxu1  ;;  %v2033_v51 = vadd.f32 %v2797_v45, %v1968_v53  ;;  %v2800_v54 = vadd.f32 %v2799_v34, %v2798_v47 }
 0x147   : > { %v2840_v35 = vadd.f32 %v2839_v49, %v2838_v48 }
 0x148   : > { %v2098_v55 = vadd.f32 %v2837_v46, %v2033_v51  ;;  %v2036_v56 = vadd.f32 %v2800_v54, %v3778_v36 }
 0x14a   : > { %v2101_v57 = vadd.f32 %v2840_v35, %v2036_v56  ;;  %v2801_v58 = vpop.f32.mrb[40].mxu0 }
 0x14b   : > { %v2841_v39 = vpop.f32.mrb[40].mxu1  ;;  %v2802_v59 = vpop.f32.mrb[41].mxu0 }
 0x14c   : > { %v2803_v60 = vadd.f32 %v2802_v59, %v2801_v58  ;;  %v2842_v61 = vpop.f32.mrb[41].mxu1  ;;  %v2804_v62 = vpop.f32.mrb[42].mxu0 }
 0x14d   : > { %v2843_v63 = vadd.f32 %v2842_v61, %v2841_v39  ;;  %v2844_v0 = vpop.f32.mrb[42].mxu1  ;;  %v2805_v1 = vpop.f32.mrb[43].mxu0 }
 0x14e   : > { %v2041_v50 = vadd.f32 %v2803_v60, %v1976_v5  ;;  %v2806_v3 = vadd.f32 %v2805_v1, %v2804_v62  ;;  %v2845_v6 = vpop.f32.mrb[43].mxu1 }
 0x14f   : > { %v2846_v52 = vadd.f32 %v2845_v6, %v2844_v0 }
 0x150   : > { %v2106_v53 = vadd.f32 %v2843_v63, %v2041_v50  ;;  %v2044_v8 = vadd.f32 %v2806_v3, %v3781_v7 }
 0x152   : > { %v2109_v9 = vadd.f32 %v2846_v52, %v2044_v8  ;;  %v2807_v10 = vpop.f32.mrb[44].mxu0 }
 0x153   : > { %v2847_v36 = vpop.f32.mrb[44].mxu1  ;;  %v2808_v11 = vpop.f32.mrb[45].mxu0 }
 0x154   : > { %v2809_v12 = vadd.f32 %v2808_v11, %v2807_v10  ;;  %v2848_v13 = vpop.f32.mrb[45].mxu1  ;;  %v2810_v14 = vpop.f32.mrb[46].mxu0 }
 0x155   : > { %v2849_v15 = vadd.f32 %v2848_v13, %v2847_v36  ;;  %v2850_v16 = vpop.f32.mrb[46].mxu1  ;;  %v2811_v17 = vpop.f32.mrb[47].mxu0 }
 0x156   : > { %v2049_v19 = vadd.f32 %v2809_v12, %v1984_v21  ;;  %v2812_v2 = vadd.f32 %v2811_v17, %v2810_v14  ;;  %v2851_v23 = vpop.f32.mrb[47].mxu1 }
 0x157   : > { %v2852_v5 = vadd.f32 %v2851_v23, %v2850_v16 }
 0x158   : > { %v2114_v4 = vadd.f32 %v2849_v15, %v2049_v19  ;;  %v2052_v25 = vadd.f32 %v2812_v2, %v3784_v24 }
 0x15a   : > { %v2117_v26 = vadd.f32 %v2852_v5, %v2052_v25  ;;  %v2869_v27 = vpop.f32.mrb[48].mxu0 }
 0x15b   : > { %v2909_v7 = vpop.f32.mrb[48].mxu1  ;;  %v2870_v28 = vpop.f32.mrb[49].mxu0 }
 0x15c   : > { %v2871_v29 = vadd.f32 %v2870_v28, %v2869_v27  ;;  %v2910_v30 = vpop.f32.mrb[49].mxu1  ;;  %v2872_v31 = vpop.f32.mrb[50].mxu0 }
 0x15d   : > { %v2911_v32 = vadd.f32 %v2910_v30, %v2909_v7  ;;  %v2912_v33 = vpop.f32.mrb[50].mxu1  ;;  %v2873_v37 = vpop.f32.mrb[51].mxu0 }
 0x15e   : > { %v2155_v18 = vadd.f32 %v2871_v29, %v2090_v22  ;;  %v2874_v38 = vadd.f32 %v2873_v37, %v2872_v31  ;;  %v2913_v40 = vpop.f32.mrb[51].mxu1 }
 0x15f   : > { %v2914_v21 = vadd.f32 %v2913_v40, %v2912_v33 }
 0x160   : > { %v2158_v20 = vadd.f32 %v2874_v38, %v2093_v41  ;;  %v2220_v42 = vadd.f32 %v2911_v32, %v2155_v18 }
 0x162   : > { %v2875_v43 = vpop.f32.mrb[52].mxu0  ;;  %v2223_v44 = vadd.f32 %v2914_v21, %v2158_v20 }
 0x163   : > { %v2876_v45 = vpop.f32.mrb[53].mxu0  ;;  %v2915_v24 = vpop.f32.mrb[52].mxu1 }
 0x164   : > { %v2877_v46 = vadd.f32 %v2876_v45, %v2875_v43  ;;  %v2878_v47 = vpop.f32.mrb[54].mxu0  ;;  %v2916_v48 = vpop.f32.mrb[53].mxu1 }
 0x165   : > { %v2879_v34 = vpop.f32.mrb[55].mxu0  ;;  %v2917_v49 = vadd.f32 %v2916_v48, %v2915_v24  ;;  %v2918_v51 = vpop.f32.mrb[54].mxu1 }
 0x166   : > { %v2163_v54 = vadd.f32 %v2877_v46, %v2098_v55  ;;  %v2880_v35 = vadd.f32 %v2879_v34, %v2878_v47  ;;  %v2919_v56 = vpop.f32.mrb[55].mxu1 }
 0x167   : > { %v2920_v58 = vadd.f32 %v2919_v56, %v2918_v51 }
 0x168   : > { %v2166_v22 = vadd.f32 %v2880_v35, %v2101_v57  ;;  %v2228_v39 = vadd.f32 %v2917_v49, %v2163_v54 }
 0x16a   : > { %v2881_v59 = vpop.f32.mrb[56].mxu0  ;;  %v2231_v60 = vadd.f32 %v2920_v58, %v2166_v22 }
 0x16b   : > { %v2882_v41 = vpop.f32.mrb[57].mxu0  ;;  %v2921_v61 = vpop.f32.mrb[56].mxu1 }
 0x16c   : > { %v2883_v62 = vadd.f32 %v2882_v41, %v2881_v59  ;;  %v2884_v63 = vpop.f32.mrb[58].mxu0  ;;  %v2922_v0 = vpop.f32.mrb[57].mxu1 }
 0x16d   : > { %v2885_v1 = vpop.f32.mrb[59].mxu0  ;;  %v2923_v50 = vadd.f32 %v2922_v0, %v2921_v61  ;;  %v2924_v3 = vpop.f32.mrb[58].mxu1 }
 0x16e   : > { %v2171_v6 = vadd.f32 %v2883_v62, %v2106_v53  ;;  %v2886_v52 = vadd.f32 %v2885_v1, %v2884_v63  ;;  %v2925_v8 = vpop.f32.mrb[59].mxu1 }
 0x16f   : > { %v2926_v10 = vadd.f32 %v2925_v8, %v2924_v3 }
 0x170   : > { %v2174_v55 = vadd.f32 %v2886_v52, %v2109_v9  ;;  %v2236_v36 = vadd.f32 %v2923_v50, %v2171_v6 }
 0x172   : > { %v2887_v11 = vpop.f32.mrb[60].mxu0  ;;  %v2239_v12 = vadd.f32 %v2926_v10, %v2174_v55 }
 0x173   : > { %v2888_v57 = vpop.f32.mrb[61].mxu0  ;;  %v2927_v13 = vpop.f32.mrb[60].mxu1 }
 0x174   : > { %v2889_v14 = vadd.f32 %v2888_v57, %v2887_v11  ;;  %v2890_v15 = vpop.f32.mrb[62].mxu0  ;;  %v2928_v16 = vpop.f32.mrb[61].mxu1 }
 0x175   : > { %v2891_v17 = vpop.f32.mrb[63].mxu0  ;;  %v2929_v19 = vadd.f32 %v2928_v16, %v2927_v13  ;;  %v2930_v2 = vpop.f32.mrb[62].mxu1 }
 0x176   : > { %v2179_v23 = vadd.f32 %v2889_v14, %v2114_v4  ;;  %v2892_v5 = vadd.f32 %v2891_v17, %v2890_v15  ;;  %v2931_v25 = vpop.f32.mrb[63].mxu1 }
 0x177   : > { %v2932_v53 = vadd.f32 %v2931_v25, %v2930_v2 }
 0x178   : > { %v2182_v27 = vadd.f32 %v2892_v5, %v2117_v26  ;;  %v2244_v7 = vadd.f32 %v2929_v19, %v2179_v23 }
 0x17a   : > { %v2247_v28 = vadd.f32 %v2932_v53, %v2182_v27 }
 0x182   : > { %v2284_v9 = vpop.f32.mrb[64].mxu0 }
 0x183   : > { %v2285_v29 = vadd.f32 %v2284_v9, %v2220_v42  ;;  %v2300_v30 = vpop.f32.mrb[64].mxu1  ;;  %v2286_v31 = vpop.f32.mrb[65].mxu0 }
 0x184   : > { %v2301_v4 = vadd.f32 %v2300_v30, %v2236_v36  ;;  %v2302_v32 = vpop.f32.mrb[65].mxu1  ;;  %v2287_v33 = vpop.f32.mrb[66].mxu0 }
 0x185   : > { %v2315_v26 = vmax.f32 %v2285_v29, 0.0  ;;  %v2288_v37 = vadd.f32 %v2287_v33, %v2223_v44  ;;  %v2303_v18 = vpop.f32.mrb[66].mxu1  ;;  %v2289_v38 = vpop.f32.mrb[67].mxu0 }
 0x186   : > { %v2319_v40 = vmax.f32 %v2301_v4, 0.0  ;;  %v2304_v21 = vadd.f32 %v2303_v18, %v2239_v12  ;;  %v2305_v20 = vpop.f32.mrb[67].mxu1 }
 0x187   : > { %2323 = vst [vmem:[%s3794_s5] sm:$0xff] %v2315_v26  ;;  %v2316_v42 = vmax.f32 %v2288_v37, 0.0 }
 0x188   : > { %2327 = vst [vmem:[%s3794_s5 + $0x20] sm:$0xff] %v2319_v40  ;;  %v2320_v43 = vmax.f32 %v2304_v21, 0.0 }
 0x189   : > { %2324 = vst [vmem:[%s3794_s5 + $0x8] sm:$0xff] %v2316_v42 }
 0x18a   : > { %2328 = vst [vmem:[%s3794_s5 + $0x28] sm:$0xff] %v2320_v43  ;;  %v2292_v45 = vpop.f32.mrb[68].mxu0 }
 0x18b   : > { %v2293_v24 = vadd.f32 %v2292_v45, %v2228_v39  ;;  %v2308_v46 = vpop.f32.mrb[68].mxu1  ;;  %v2294_v47 = vpop.f32.mrb[69].mxu0 }
 0x18c   : > { %v2309_v44 = vadd.f32 %v2308_v46, %v2244_v7  ;;  %v2310_v48 = vpop.f32.mrb[69].mxu1  ;;  %v2295_v34 = vpop.f32.mrb[70].mxu0 }
 0x18d   : > { %v2317_v49 = vmax.f32 %v2293_v24, 0.0  ;;  %v2296_v51 = vadd.f32 %v2295_v34, %v2231_v60  ;;  %v2311_v54 = vpop.f32.mrb[70].mxu1  ;;  %v2297_v35 = vpop.f32.mrb[71].mxu0 }
 0x18e   : > { %v2321_v56 = vmax.f32 %v2309_v44, 0.0  ;;  %v2312_v58 = vadd.f32 %v2311_v54, %v2247_v28  ;;  %v2313_v22 = vpop.f32.mrb[71].mxu1 }
 0x18f   : > { %2325 = vst [vmem:[%s3794_s5 + $0x10] sm:$0xff] %v2317_v49  ;;  %v2318_v59 = vmax.f32 %v2296_v51, 0.0 }
 0x190   : > { %2329 = vst [vmem:[%s3794_s5 + $0x30] sm:$0xff] %v2321_v56  ;;  %v2322_v41 = vmax.f32 %v2312_v58, 0.0 }
 0x191   : > { %2326 = vst [vmem:[%s3794_s5 + $0x18] sm:$0xff] %v2318_v59 }
 0x192   : > { %2330 = vst [vmem:[%s3794_s5 + $0x38] sm:$0xff] %v2322_v41 }
 0x193 PF: > { %s13_s12 = sadd.s32 1, %s3215_s12  }
 0x194   : > { %p10_p4 = scmp.ge.s32.totalorder %s13_s12, 4  }
 0x196   :  { %12 = sbr.rel (!%p10_p4) target bundleno = 1 (0x1), region = 62 }

// kernel: net_forward.17
= control target key start
LH: loop header
LB: loop body
LE: loop exit
PB: predicated region body
PF: predicated region fallthrough
CT: control target
= control target key end

     0   :  { %s399_s12 = smov 0   ;;  %s425_s0 = inlined_call_operand.vmem [shape: bf16[64,20], index: 0, kind: input, shape index: {}]   ;;  %s426_s1 = inlined_call_operand.vmem [shape: bf16[20,128], index: 1, kind: input, shape index: {}]   ;;  %s427_s2 = inlined_call_operand.vmem [shape: f32[1,128], index: 2, kind: input, shape index: {}]   ;;  %s428_s3 = inlined_call_operand.vmem [shape: f32[64,128], index: 3, kind: output, shape index: {}]  }
   0x1 LB: > { %s328_s13 = sadd.s32 4294967295, %s377_s12   ;;  %p332_p0 = scmp.ge.s32.totalorder %s377_s12, 1  ;;  %s377_s12 = sphi %s399_s12, %s13_s12  }
   0x2   : > { %p138_p1 = scmp.lt.s32.totalorder %s377_s12, 3 }
   0x4   : > { %p139_p2 = pnand %p332_p0, %p138_p1 }
   0x5   : > { %v367_v0 = vld [vmem:[%s426_s1] sm:$0xff] (!%p139_p2)   ;;  %vm215_vm0 = vcmask (!%p139_p2), 1041408   ;;  %v368_v1 = vld [vmem:[%s426_s1 + $0x8] ss:$0 sps:$4 sm:$0x33] (!%p139_p2)   ;;  %s333_s18 = sshll.u32 (!%p139_p2), %s328_s13, 2 }
   0x6   : > { %142 = sbr.rel (%p139_p2) target bundleno = 236 (0xec), region = 32  ;;  %350 = vmatprep.subr.bf16.mxu0 (!%p139_p2), %v367_v0  ;;  %p163_p3 = scmp.lt.s32.totalorder (!%p139_p2), %s333_s18, 7  ;;  %v217_v2 = vsel (!%p139_p2), %vm215_vm0, %v368_v1, 0  ;;  %vm208_vm1 = vcmask (!%p139_p2), 162816   ;;  %v337_v5 = vld [vmem:[%s427_s2] ss:$0 sm:$0xff] (!%p139_p2) }
   0x7   : > { %351 = vmatpush3.bf16.msra.mxu0 (!%p139_p2), %v367_v0 }
   0x8   : > { %358 = vmatprep.subr.msk.bf16.mxu0 (!%p139_p2), %vm215_vm0, %v368_v1 }
   0xb   : > { %353 = vmatpush3.bf16.msra.mxu0 (!%p139_p2), %v217_v2 }
   0xd   : > { %s430_s18 = smov (!%p163_p3, %s333_s18), 7 }
   0xe   : > { %s334_s19 = sshll.u32 %s430_s18, 2  ;;  %s336_s23 = sshll.u32 %s430_s18, 3 }
   0xf   : > { %s166_s22 = scalar_lea.vmem %s425_s0, %s334_s19  ;;  %s172_s28 = scalar_lea.vmem %s428_s3, %s336_s23 }
  0x10   : > { %v369_v3 = vld [vmem:[%s166_s22] sm:$0xff]   ;;  %v370_v4 = vld [vmem:[%s166_s22 + $0x8] sm:$0xff]  }
  0x11   : > { %354 = vmatprep.mubr.msk.bf16.mxu0 %vm208_vm1, %v369_v3 }
  0x12   : > { %355 = vmatmul.mubr.msk.bf16.vlgmr.msra.gmra.mrb[0].mxu0 %vm208_vm1, %v370_v4 }
  0xe5   : > { %v356_v6 = vpop.f32.mrb[0].mxu0 }
  0xe6   : > { %v253_v7 = vpop.f32.mrb[1].mxu0  ;;  %v262_v12 = vadd.f32 %v356_v6, %v337_v5 }
  0xe7   : > { %v254_v8 = vadd.f32 %v337_v5, %v253_v7  ;;  %v357_v9 = vpop.f32.mrb[2].mxu0 }
  0xe8   : > { %v256_v10 = vpop.f32.mrb[3].mxu0  ;;  %v265_v13 = vadd.f32 %v357_v9, %v337_v5  ;;  %270 = vst [vmem:[%s172_s28 + $0x10] sm:$0xff] %v262_v12 }
  0xe9   : > { %268 = vst [vmem:[%s172_s28] sm:$0xff] %v254_v8  ;;  %v257_v11 = vadd.f32 %v337_v5, %v256_v10 }
  0xea   : > { %271 = vst [vmem:[%s172_s28 + $0x18] sm:$0xff] %v265_v13 }
  0xeb   : > { %269 = vst [vmem:[%s172_s28 + $0x8] sm:$0xff] %v257_v11 }
  0xec PF: > { %s13_s12 = sadd.s32 1, %s377_s12  }
  0xed   : > { %p10_p4 = scmp.ge.s32.totalorder %s13_s12, 4  }
  0xef   :  { %12 = sbr.rel (!%p10_p4) target bundleno = 1 (0x1), region = 62 }

// kernel: net_forward.19
= control target key start
LH: loop header
LB: loop body
LE: loop exit
PB: predicated region body
PF: predicated region fallthrough
CT: control target
= control target key end

     0   :  { %s447_s12 = smov 0   ;;  %s497_s0 = inlined_call_operand.vmem [shape: bf16[32,144], index: 0, kind: input, shape index: {}]   ;;  %s498_s1 = inlined_call_operand.vmem [shape: bf16[144,128], index: 1, kind: input, shape index: {}]   ;;  %s499_s2 = inlined_call_operand.vmem [shape: f32[1,128], index: 2, kind: input, shape index: {}]   ;;  %s500_s3 = inlined_call_operand.vmem [shape: f32[32,128], index: 3, kind: output, shape index: {}]  }
   0x1 LB: > { %s371_s13 = sadd.s32 4294967295, %s424_s12   ;;  %p375_p0 = scmp.ge.s32.totalorder %s424_s12, 1  ;;  %s424_s12 = sphi %s447_s12, %s13_s12  }
   0x2   : > { %p139_p1 = scmp.lt.s32.totalorder %s424_s12, 3 }
   0x4   : > { %p140_p2 = pnand %p375_p0, %p139_p1 }
   0x5   : > { %v406_v0 = vld [vmem:[%s498_s1] sm:$0xff] (!%p140_p2)   ;;  %v426_v1 = vmov (!%p140_p2), 0   ;;  %s376_s16 = sshll.u32 (!%p140_p2), %s371_s13, 1  ;;  %v407_v2 = vld [vmem:[%s498_s1 + $0x8] sm:$0xff] (!%p140_p2)   ;;  %v408_v3 = vld [vmem:[%s498_s1 + $0x10] sm:$0xff] (!%p140_p2)   ;;  %vm268_vm0 = vcmask (!%p140_p2), 130048  }
   0x6   : > { %143 = sbr.rel (%p140_p2) target bundleno = 259 (0x103), region = 32  ;;  %272 = vmatprep.subr.bf16.mxu0 (!%p140_p2), %v426_v1  ;;  %p165_p3 = scmp.lt.s32.totalorder (!%p140_p2), %s376_s16, 3  ;;  %v409_v4 = vld [vmem:[%s498_s1 + $0x18] sm:$0xff] (!%p140_p2)   ;;  %v410_v6 = vld [vmem:[%s498_s1 + $0x20] sm:$0xff] (!%p140_p2)   ;;  %v411_v7 = vld [vmem:[%s498_s1 + $0x28] sm:$0xff] (!%p140_p2)  }
   0x7   : > { %273 = vmatpush1.bf16.msra.mxu0 (!%p140_p2), %v406_v0  ;;  %v412_v8 = vld [vmem:[%s498_s1 + $0x30] sm:$0xff] (!%p140_p2)   ;;  %v413_v9 = vld [vmem:[%s498_s1 + $0x38] sm:$0xff] (!%p140_p2)   ;;  %v414_v10 = vld [vmem:[%s498_s1 + $0x40] sm:$0xff] (!%p140_p2)  }
   0x8   : > { %274 = vmatprep.subr.bf16.mxu0 (!%p140_p2), %v426_v1  ;;  %v381_v12 = vld [vmem:[%s499_s2] ss:$0 sm:$0xff] (!%p140_p2) }
   0xb   : > { %275 = vmatpush1.bf16.msra.mxu0 (!%p140_p2), %v407_v2 }
   0xc   : > { %276 = vmatprep.subr.bf16.mxu0 (!%p140_p2), %v426_v1 }
   0xd   : > { %s502_s16 = smov (!%p165_p3, %s376_s16), 3 }
   0xe   : > { %s396_s21 = sshll.u32 %s502_s16, 3 }
   0xf   : > { %s169_s24 = scalar_lea.vmem %s497_s0, %s396_s21  ;;  %277 = vmatpush1.bf16.msra.mxu0 %v408_v3  ;;  %s175_s15 = scalar_lea.vmem %s500_s3, %s396_s21 }
  0x10   : > { %v417_v5 = vld [vmem:[%s169_s24 + $0x4] ss:$8 sps:$4 sm:$0xff]   ;;  %278 = vmatprep.subr.bf16.mxu0 %v426_v1  ;;  %v415_v11 = vld [vmem:[%s169_s24] ss:$8 sps:$4 sm:$0xff]  }
  0x11   : > { %393 = vmatprep.mubr.msk.bf16.mxu0 %vm268_vm0, %v417_v5 }
  0x13   : > { %279 = vmatpush1.bf16.msra.mxu0 %v409_v4 }
  0x14   : > { %280 = vmatprep.subr.bf16.mxu0 %v426_v1 }
  0x17   : > { %281 = vmatpush1.bf16.msra.mxu0 %v410_v6 }
  0x18   : > { %282 = vmatprep.subr.bf16.mxu0 %v426_v1 }
  0x1b   : > { %283 = vmatpush1.bf16.msra.mxu0 %v411_v7 }
  0x1c   : > { %284 = vmatprep.subr.bf16.mxu0 %v426_v1 }
  0x1f   : > { %285 = vmatpush1.bf16.msra.mxu0 %v412_v8 }
  0x20   : > { %286 = vmatprep.subr.bf16.mxu0 %v426_v1 }
  0x23   : > { %287 = vmatpush1.bf16.msra.mxu0 %v413_v9 }
  0x24   : > { %288 = vmatprep.subr.bf16.mxu0 %v426_v1 }
  0x27   : > { %289 = vmatpush1.bf16.msra.mxu0 %v414_v10 }
  0x2a   : > { %305 = vmatmul.mubr.bf16.vlgmr.msra.gmra.mrb[0].mxu0 %v415_v11 }
  0xfd   : > { %v306_v13 = vpop.f32.mrb[0].mxu0 }
  0xfe   : > { %v307_v14 = vadd.f32 %v381_v12, %v306_v13  ;;  %v308_v15 = vpop.f32.mrb[1].mxu0 }
  0xff   : > { %v309_v16 = vpop.f32.mrb[2].mxu0 }
 0x100   : > { %313 = vst [vmem:[%s175_s15] sm:$0xff] %v307_v14  ;;  %v310_v17 = vadd.f32 %v381_v12, %v309_v16  ;;  %v311_v18 = vpop.f32.mrb[3].mxu0 }
 0x102   : > { %314 = vst [vmem:[%s175_s15 + $0x8] sm:$0xff] %v310_v17 }
 0x103 PF: > { %s13_s12 = sadd.s32 1, %s424_s12  }
 0x104   : > { %p10_p4 = scmp.ge.s32.totalorder %s13_s12, 4  }
 0x106   :  { %12 = sbr.rel (!%p10_p4) target bundleno = 1 (0x1), region = 62 }

// kernel: net_forward.20
= control target key start
LH: loop header
LB: loop body
LE: loop exit
PB: predicated region body
PF: predicated region fallthrough
CT: control target
= control target key end

     0   :  { %s497_s12 = smov 0   ;;  %s570_s0 = inlined_call_operand.vmem [shape: bf16[32,216], index: 0, kind: input, shape index: {}]   ;;  %s571_s1 = inlined_call_operand.vmem [shape: bf16[216,128], index: 1, kind: input, shape index: {}]   ;;  %s572_s2 = inlined_call_operand.vmem [shape: f32[1,128], index: 2, kind: input, shape index: {}]   ;;  %s573_s3 = inlined_call_operand.vmem [shape: f32[32,128], index: 3, kind: output, shape index: {}]  }
   0x1 LB: > { %s411_s13 = sadd.s32 4294967295, %s474_s12   ;;  %p415_p0 = scmp.ge.s32.totalorder %s474_s12, 1  ;;  %s474_s12 = sphi %s497_s12, %s13_s12  }
   0x2   : > { %p139_p1 = scmp.lt.s32.totalorder %s474_s12, 3 }
   0x4   : > { %p140_p2 = pnand %p415_p0, %p139_p1 }
   0x5   : > { %v451_v0 = vld [vmem:[%s571_s1] sm:$0xff] (!%p140_p2)   ;;  %v476_v1 = vmov (!%p140_p2), 0   ;;  %v452_v2 = vld [vmem:[%s571_s1 + $0x8] sm:$0xff] (!%p140_p2)   ;;  %s416_s18 = sshll.u32 (!%p140_p2), %s411_s13, 1  ;;  %v453_v3 = vld [vmem:[%s571_s1 + $0x10] sm:$0xff] (!%p140_p2)   ;;  %vm304_vm0 = vcmask (!%p140_p2), 719872  }
   0x6   : > { %143 = sbr.rel (%p140_p2) target bundleno = 279 (0x117), region = 32  ;;  %312 = vmatprep.subr.bf16.mxu0 (!%p140_p2), %v476_v1  ;;  %p165_p3 = scmp.lt.s32.totalorder (!%p140_p2), %s416_s18, 3  ;;  %v454_v4 = vld [vmem:[%s571_s1 + $0x18] sm:$0xff] (!%p140_p2)   ;;  %v455_v5 = vld [vmem:[%s571_s1 + $0x20] sm:$0xff] (!%p140_p2)   ;;  %v456_v7 = vld [vmem:[%s571_s1 + $0x28] sm:$0xff] (!%p140_p2)   ;;  %vm308_vm1 = vcmask (!%p140_p2), 1043456  }
   0x7   : > { %313 = vmatpush1.bf16.msra.mxu0 (!%p140_p2), %v451_v0  ;;  %v457_v8 = vld [vmem:[%s571_s1 + $0x30] sm:$0xff] (!%p140_p2)   ;;  %v458_v9 = vld [vmem:[%s571_s1 + $0x38] sm:$0xff] (!%p140_p2)   ;;  %v459_v10 = vld [vmem:[%s571_s1 + $0x40] sm:$0xff] (!%p140_p2)  }
   0x8   : > { %314 = vmatprep.subr.bf16.mxu0 (!%p140_p2), %v476_v1  ;;  %v460_v11 = vld [vmem:[%s571_s1 + $0x48] sm:$0xff] (!%p140_p2)   ;;  %v461_v12 = vld [vmem:[%s571_s1 + $0x50] sm:$0xff] (!%p140_p2)   ;;  %v462_v13 = vld [vmem:[%s571_s1 + $0x58] sm:$0xff] (!%p140_p2)  }
   0x9   : > { %v463_v14 = vld [vmem:[%s571_s1 + $0x60] sm:$0xff] (!%p140_p2)   ;;  %v464_v15 = vld [vmem:[%s571_s1 + $0x68] ss:$0 sps:$4 sm:$0xff] (!%p140_p2)  }
   0xa   : > { %v310_v16 = vsel (!%p140_p2), %vm308_vm1, %v464_v15, 0  ;;  %v421_v18 = vld [vmem:[%s572_s2] ss:$0 sm:$0xff] (!%p140_p2) }
   0xb   : > { %315 = vmatpush1.bf16.msra.mxu0 (!%p140_p2), %v452_v2 }
   0xc   : > { %316 = vmatprep.subr.bf16.mxu0 (!%p140_p2), %v476_v1 }
   0xd   : > { %s575_s18 = smov (!%p165_p3, %s416_s18), 3 }
   0xe   : > { %s441_s21 = sshll.u32 %s575_s18, 3 }
   0xf   : > { %317 = vmatpush1.bf16.msra.mxu0 %v453_v3  ;;  %s525_s26 = scalar_lea.vmem %s570_s0, %s441_s21  ;;  %s175_s28 = scalar_lea.vmem %s573_s3, %s441_s21 }
  0x10   : > { %318 = vmatprep.subr.bf16.mxu0 %v476_v1  ;;  %v467_v6 = vld [vmem:[%s525_s26 + $0x4] ss:$8 sps:$4 sm:$0xff]   ;;  %v465_v17 = vld [vmem:[%s525_s26] ss:$8 sps:$4 sm:$0xff]  }
  0x11   : > { %438 = vmatprep.mubr.msk.bf16.mxu0 %vm304_vm0, %v467_v6 }
  0x13   : > { %319 = vmatpush1.bf16.msra.mxu0 %v454_v4 }
  0x14   : > { %320 = vmatprep.subr.bf16.mxu0 %v476_v1 }
  0x17   : > { %321 = vmatpush1.bf16.msra.mxu0 %v455_v5 }
  0x18   : > { %322 = vmatprep.subr.bf16.mxu0 %v476_v1 }
  0x1b   : > { %323 = vmatpush1.bf16.msra.mxu0 %v456_v7 }
  0x1c   : > { %324 = vmatprep.subr.bf16.mxu0 %v476_v1 }
  0x1f   : > { %325 = vmatpush1.bf16.msra.mxu0 %v457_v8 }
  0x20   : > { %326 = vmatprep.subr.bf16.mxu0 %v476_v1 }
  0x23   : > { %327 = vmatpush1.bf16.msra.mxu0 %v458_v9 }
  0x24   : > { %328 = vmatprep.subr.bf16.mxu0 %v476_v1 }
  0x27   : > { %329 = vmatpush1.bf16.msra.mxu0 %v459_v10 }
  0x28   : > { %330 = vmatprep.subr.bf16.mxu0 %v476_v1 }
  0x2b   : > { %331 = vmatpush1.bf16.msra.mxu0 %v460_v11 }
  0x2c   : > { %332 = vmatprep.subr.bf16.mxu0 %v476_v1 }
  0x2f   : > { %333 = vmatpush1.bf16.msra.mxu0 %v461_v12 }
  0x30   : > { %334 = vmatprep.subr.bf16.mxu0 %v476_v1 }
  0x33   : > { %335 = vmatpush1.bf16.msra.mxu0 %v462_v13 }
  0x34   : > { %336 = vmatprep.subr.bf16.mxu0 %v476_v1 }
  0x37   : > { %337 = vmatpush1.bf16.msra.mxu0 %v463_v14 }
  0x38   : > { %338 = vmatprep.subr.bf16.mxu0 %v476_v1 }
  0x3b   : > { %339 = vmatpush1.bf16.msra.mxu0 %v310_v16 }
  0x3e   : > { %345 = vmatmul.mubr.bf16.vlgmr.msra.gmra.mrb[0].mxu0 %v465_v17 }
 0x111   : > { %v346_v19 = vpop.f32.mrb[0].mxu0 }
 0x112   : > { %v347_v20 = vadd.f32 %v421_v18, %v346_v19  ;;  %v348_v21 = vpop.f32.mrb[1].mxu0 }
 0x113   : > { %v349_v22 = vpop.f32.mrb[2].mxu0 }
 0x114   : > { %353 = vst [vmem:[%s175_s28] sm:$0xff] %v347_v20  ;;  %v350_v23 = vadd.f32 %v421_v18, %v349_v22  ;;  %v351_v24 = vpop.f32.mrb[3].mxu0 }
 0x116   : > { %354 = vst [vmem:[%s175_s28 + $0x8] sm:$0xff] %v350_v23 }
 0x117 PF: > { %s13_s12 = sadd.s32 1, %s474_s12  }
 0x118   : > { %p10_p4 = scmp.ge.s32.totalorder %s13_s12, 4  }
 0x11a   :  { %12 = sbr.rel (!%p10_p4) target bundleno = 1 (0x1), region = 62 }

// kernel: net_forward.18
= control target key start
LH: loop header
LB: loop body
LE: loop exit
PB: predicated region body
PF: predicated region fallthrough
CT: control target
= control target key end

     0   :  { %s687_s12 = smov 0   ;;  %s795_s0 = inlined_call_operand.vmem [shape: bf16[32,400], index: 0, kind: input, shape index: {}]   ;;  %s796_s1 = inlined_call_operand.vmem [shape: bf16[400,128], index: 1, kind: input, shape index: {}]   ;;  %s797_s2 = inlined_call_operand.vmem [shape: f32[1,128], index: 2, kind: input, shape index: {}]   ;;  %s798_s3 = inlined_call_operand.vmem [shape: f32[32,128], index: 3, kind: output, shape index: {}]  }
   0x1 LB: > { %s552_s13 = sadd.s32 4294967295, %s664_s12   ;;  %p556_p0 = scmp.ge.s32.totalorder %s664_s12, 1  ;;  %s664_s12 = sphi %s687_s12, %s13_s12  }
   0x2   : > { %p139_p1 = scmp.lt.s32.totalorder %s664_s12, 3 }
   0x4   : > { %p140_p2 = pnand %p556_p0, %p139_p1 }
   0x5   : > { %v627_v0 = vld [vmem:[%s796_s1 + $0x40] sm:$0xff] (!%p140_p2)   ;;  %v666_v1 = vmov (!%p140_p2), 0   ;;  %v630_v4 = vld [vmem:[%s796_s1 + $0x48] sm:$0xff] (!%p140_p2)   ;;  %v633_v7 = vld [vmem:[%s796_s1 + $0x50] sm:$0xff] (!%p140_p2)   ;;  %s557_s5 = sshll.u32 (!%p140_p2), %s552_s13, 1  ;;  %vm408_vm0 = vcmask (!%p140_p2), 130048  }
   0x6   : > { %143 = sbr.rel (%p140_p2) target bundleno = 261 (0x105), region = 32  ;;  %453 = vmatprep.subr.bf16.mxu1 (!%p140_p2), %v666_v1  ;;  %v628_v2 = vld [vmem:[%s796_s1 + $0x80] sm:$0xff] (!%p140_p2)   ;;  %596 = vmatprep.subr.bf16.mxu0 (!%p140_p2), %v627_v0  ;;  %v631_v5 = vld [vmem:[%s796_s1 + $0x88] sm:$0xff] (!%p140_p2)   ;;  %v634_v8 = vld [vmem:[%s796_s1 + $0x90] sm:$0xff] (!%p140_p2)   ;;  %p165_p3 = scmp.lt.s32.totalorder (!%p140_p2), %s557_s5, 3 }
   0x7   : > { %v629_v3 = vld [vmem:[%s796_s1] sm:$0xff] (!%p140_p2)   ;;  %454 = vmatpush1.bf16.msra.mxu1 (!%p140_p2), %v628_v2  ;;  %v632_v6 = vld [vmem:[%s796_s1 + $0x8] sm:$0xff] (!%p140_p2)   ;;  %v635_v9 = vld [vmem:[%s796_s1 + $0x10] sm:$0xff] (!%p140_p2)  }
   0x8   : > { %597 = vmatpush3.bf16.msra.mxu0 (!%p140_p2), %v629_v3  ;;  %455 = vmatprep.subr.bf16.mxu1 (!%p140_p2), %v666_v1  ;;  %v636_v10 = vld [vmem:[%s796_s1 + $0x58] sm:$0xff] (!%p140_p2)   ;;  %v639_v13 = vld [vmem:[%s796_s1 + $0x60] sm:$0xff] (!%p140_p2)   ;;  %v642_v16 = vld [vmem:[%s796_s1 + $0x68] sm:$0xff] (!%p140_p2)  }
   0x9   : > { %598 = vmatprep.subr.bf16.mxu0 (!%p140_p2), %v630_v4  ;;  %v637_v11 = vld [vmem:[%s796_s1 + $0x98] sm:$0xff] (!%p140_p2)   ;;  %v640_v14 = vld [vmem:[%s796_s1 + $0xa0] sm:$0xff] (!%p140_p2)   ;;  %v643_v17 = vld [vmem:[%s796_s1 + $0xa8] sm:$0xff] (!%p140_p2)  }
   0xa   : > { %v638_v12 = vld [vmem:[%s796_s1 + $0x18] sm:$0xff] (!%p140_p2)   ;;  %v641_v15 = vld [vmem:[%s796_s1 + $0x20] sm:$0xff] (!%p140_p2)   ;;  %v644_v18 = vld [vmem:[%s796_s1 + $0x28] sm:$0xff] (!%p140_p2)  }
   0xb   : > { %456 = vmatpush1.bf16.msra.mxu1 (!%p140_p2), %v631_v5  ;;  %v645_v19 = vld [vmem:[%s796_s1 + $0x70] sm:$0xff] (!%p140_p2)   ;;  %v648_v22 = vld [vmem:[%s796_s1 + $0x78] sm:$0xff] (!%p140_p2)   ;;  %v654_v28 = vld [vmem:[%s796_s1 + $0xc0] sm:$0xff] (!%p140_p2)  }
   0xc   : > { %599 = vmatpush3.bf16.msra.mxu0 (!%p140_p2), %v632_v6  ;;  %457 = vmatprep.subr.bf16.mxu1 (!%p140_p2), %v666_v1  ;;  %v646_v20 = vld [vmem:[%s796_s1 + $0xb0] sm:$0xff] (!%p140_p2)   ;;  %v649_v24 = vld [vmem:[%s796_s1 + $0xb8] sm:$0xff] (!%p140_p2)   ;;  %v562_v32 = vld [vmem:[%s797_s2] ss:$0 sm:$0xff] (!%p140_p2) }
   0xd   : > { %600 = vmatprep.subr.bf16.mxu0 %v633_v7  ;;  %s800_s5 = smov (!%p165_p3, %s557_s5), 3  ;;  %v647_v21 = vld [vmem:[%s796_s1 + $0x30] sm:$0xff]   ;;  %v650_v26 = vld [vmem:[%s796_s1 + $0x38] sm:$0xff]  }
   0xe   : > { %s595_s23 = sshll.u32 %s800_s5, 4  ;;  %s561_s20 = sshll.u32 %s800_s5, 3 }
   0xf   : > { %458 = vmatpush1.bf16.msra.mxu1 %v634_v8  ;;  %s169_s6 = scalar_lea.vmem %s795_s0, %s595_s23  ;;  %s175_s23 = scalar_lea.vmem %s798_s3, %s561_s20 }
  0x10   : > { %601 = vmatpush3.bf16.msra.mxu0 %v635_v9  ;;  %459 = vmatprep.subr.bf16.mxu1 %v666_v1  ;;  %v653_v23 = vld [vmem:[%s169_s6 + $0x4] ss:$16 sps:$4 sm:$0xff]   ;;  %v657_v25 = vld [vmem:[%s169_s6 + $0xc] ss:$16 sps:$4 sm:$0xff]   ;;  %v651_v27 = vld [vmem:[%s169_s6] ss:$16 sps:$4 sm:$0xff]  }
  0x11   : > { %602 = vmatprep.subr.bf16.mxu0 %v636_v10  ;;  %444 = vmatprep.mubr.bf16.mxu0 %v653_v23  ;;  %v655_v29 = vld [vmem:[%s169_s6 + $0x8] ss:$16 sps:$4 sm:$0xff]  }
  0x12   : > { %592 = vmatprep.mubr.msk.bf16.mxu1 %vm408_vm0, %v657_v25 }
  0x13   : > { %460 = vmatpush1.bf16.msra.mxu1 %v637_v11 }
  0x14   : > { %603 = vmatpush3.bf16.msra.mxu0 %v638_v12  ;;  %461 = vmatprep.subr.bf16.mxu1 %v666_v1 }
  0x15   : > { %604 = vmatprep.subr.bf16.mxu0 %v639_v13 }
  0x17   : > { %462 = vmatpush1.bf16.msra.mxu1 %v640_v14 }
  0x18   : > { %605 = vmatpush3.bf16.msra.mxu0 %v641_v15  ;;  %463 = vmatprep.subr.bf16.mxu1 %v666_v1 }
  0x19   : > { %606 = vmatprep.subr.bf16.mxu0 %v642_v16 }
  0x1b   : > { %464 = vmatpush1.bf16.msra.mxu1 %v643_v17 }
  0x1c   : > { %607 = vmatpush3.bf16.msra.mxu0 %v644_v18  ;;  %465 = vmatprep.subr.bf16.mxu1 %v666_v1 }
  0x1d   : > { %608 = vmatprep.subr.bf16.mxu0 %v645_v19 }
  0x1f   : > { %466 = vmatpush1.bf16.msra.mxu1 %v646_v20 }
  0x20   : > { %609 = vmatpush3.bf16.msra.mxu0 %v647_v21  ;;  %467 = vmatprep.subr.bf16.mxu1 %v666_v1 }
  0x21   : > { %610 = vmatprep.subr.bf16.mxu0 %v648_v22 }
  0x23   : > { %468 = vmatpush1.bf16.msra.mxu1 %v649_v24 }
  0x24   : > { %611 = vmatpush3.bf16.msra.mxu0 %v650_v26  ;;  %469 = vmatprep.subr.bf16.mxu1 %v666_v1 }
  0x27   : > { %445 = vmatmul.mubr.bf16.vlgmr.msra.gmra.mrb[0].mxu0 %v651_v27  ;;  %470 = vmatpush1.bf16.msra.mxu1 %v654_v28 }
  0x2a   : > { %486 = vmatmul.mubr.bf16.vlgmr.msra.gmra.mrb[0].mxu1 %v655_v29 }
  0xfa   : > { %v612_v30 = vpop.f32.mrb[0].mxu0 }
  0xfb   : > { %v613_v31 = vpop.f32.mrb[1].mxu0 }
  0xfc   : > { %v614_v33 = vadd.f32 %v613_v31, %v612_v30  ;;  %v615_v34 = vpop.f32.mrb[2].mxu0 }
  0xfd   : > { %v616_v35 = vpop.f32.mrb[3].mxu0  ;;  %v487_v36 = vpop.f32.mrb[0].mxu1 }
  0xfe   : > { %v617_v37 = vadd.f32 %v616_v35, %v615_v34  ;;  %v447_v38 = vadd.f32 %v614_v33, %v562_v32  ;;  %v489_v39 = vpop.f32.mrb[1].mxu1 }
  0xff   : > { %v490_v40 = vpop.f32.mrb[2].mxu1 }
 0x100   : > { %v488_v41 = vadd.f32 %v487_v36, %v447_v38  ;;  %v450_v42 = vadd.f32 %v617_v37, %v562_v32  ;;  %v492_v43 = vpop.f32.mrb[3].mxu1 }
 0x102   : > { %494 = vst [vmem:[%s175_s23] sm:$0xff] %v488_v41  ;;  %v491_v44 = vadd.f32 %v490_v40, %v450_v42 }
 0x104   : > { %495 = vst [vmem:[%s175_s23 + $0x8] sm:$0xff] %v491_v44 }
 0x105 PF: > { %s13_s12 = sadd.s32 1, %s664_s12  }
 0x106   : > { %p10_p4 = scmp.ge.s32.totalorder %s13_s12, 4  }
 0x108   :  { %12 = sbr.rel (!%p10_p4) target bundleno = 1 (0x1), region = 62 }

// kernel: net_forward.21
= control target key start
LH: loop header
LB: loop body
LE: loop exit
PB: predicated region body
PF: predicated region fallthrough
CT: control target
= control target key end

     0   :  { %vm1375_vm0 = vmmov 0   ;;  %s1684_s1 = inlined_call_operand.vmem [shape: bf16[1408,128], index: 1, kind: input, shape index: {}]   ;;  %s1685_s0 = inlined_call_operand.vmem [shape: bf16[8,1408], index: 0, kind: input, shape index: {}]   ;;  %s1686_s2 = inlined_call_operand.vmem [shape: f32[1,128], index: 2, kind: input, shape index: {}]   ;;  %s1687_s3 = inlined_call_operand.vmem [shape: f32[8,128], index: 3, kind: output, shape index: {}]  }
   0x1   :  { %v1271_v0 = vld [vmem:[%s1684_s1 + $0x40] sm:$0xff]   ;;  %v1275_v4 = vld [vmem:[%s1684_s1 + $0x48] sm:$0xff]   ;;  %v1279_v8 = vld [vmem:[%s1684_s1 + $0x50] sm:$0xff]  }
   0x2   :  { %v1272_v1 = vld [vmem:[%s1684_s1] sm:$0xff]   ;;  %1130 = vmatprep.subr.bf16.mxu0 %v1271_v0  ;;  %v1276_v5 = vld [vmem:[%s1684_s1 + $0x8] sm:$0xff]   ;;  %v1280_v9 = vld [vmem:[%s1684_s1 + $0x10] sm:$0xff]  }
   0x3   :  { %v1273_v2 = vld [vmem:[%s1684_s1 + $0xc0] sm:$0xff]   ;;  %1131 = vmatpush3.bf16.msra.mxu0 %v1272_v1  ;;  %v1277_v6 = vld [vmem:[%s1684_s1 + $0xc8] sm:$0xff]   ;;  %v1281_v10 = vld [vmem:[%s1684_s1 + $0xd0] sm:$0xff]  }
   0x4   :  { %v1274_v3 = vld [vmem:[%s1684_s1 + $0x80] sm:$0xff]   ;;  %1152 = vmatprep.subr.bf16.mxu1 %v1273_v2  ;;  %1132 = vmatprep.subr.bf16.mxu0 %v1275_v4  ;;  %v1278_v7 = vld [vmem:[%s1684_s1 + $0x88] sm:$0xff]   ;;  %v1282_v11 = vld [vmem:[%s1684_s1 + $0x90] sm:$0xff]  }
   0x5   :  { %1153 = vmatpush3.bf16.msra.mxu1 %v1274_v3  ;;  %v1283_v12 = vld [vmem:[%s1684_s1 + $0x58] sm:$0xff]   ;;  %v1287_v16 = vld [vmem:[%s1684_s1 + $0x60] sm:$0xff]   ;;  %v1291_v20 = vld [vmem:[%s1684_s1 + $0x68] sm:$0xff]  }
   0x6   :  { %1154 = vmatprep.subr.bf16.mxu1 %v1277_v6  ;;  %v1284_v13 = vld [vmem:[%s1684_s1 + $0x18] sm:$0xff]   ;;  %v1288_v17 = vld [vmem:[%s1684_s1 + $0x20] sm:$0xff]   ;;  %v1292_v21 = vld [vmem:[%s1684_s1 + $0x28] sm:$0xff]  }
   0x7   :  { %1133 = vmatpush3.bf16.msra.mxu0 %v1276_v5  ;;  %v1285_v14 = vld [vmem:[%s1684_s1 + $0xd8] sm:$0xff]   ;;  %v1289_v18 = vld [vmem:[%s1684_s1 + $0xe0] sm:$0xff]   ;;  %v1293_v22 = vld [vmem:[%s1684_s1 + $0xe8] sm:$0xff]  }
   0x8   :  { %1134 = vmatprep.subr.bf16.mxu0 %v1279_v8  ;;  %v1286_v15 = vld [vmem:[%s1684_s1 + $0x98] sm:$0xff]   ;;  %v1290_v19 = vld [vmem:[%s1684_s1 + $0xa0] sm:$0xff]   ;;  %v1294_v23 = vld [vmem:[%s1684_s1 + $0xa8] sm:$0xff]  }
   0x9   :  { %1155 = vmatpush3.bf16.msra.mxu1 %v1278_v7  ;;  %v1295_v24 = vld [vmem:[%s1684_s1 + $0x70] sm:$0xff]   ;;  %v1299_v28 = vld [vmem:[%s1684_s1 + $0x78] sm:$0xff]   ;;  %v15_v31 = vld [vmem:[%s1685_s0] sm:$0xff] }
   0xa   :  { %1156 = vmatprep.subr.bf16.mxu1 %v1281_v10  ;;  %v1296_v25 = vld [vmem:[%s1684_s1 + $0x30] sm:$0xff]   ;;  %v1300_v29 = vld [vmem:[%s1684_s1 + $0x38] sm:$0xff]   ;;  %v1031_v32 = vcombine.low %v15_v31, %v15_v31  ;;  %v1032_v33 = vcombine.high %v15_v31, %v15_v31  ;;  %v1305_v35 = vld [vmem:[%s1684_s1 + $0x140] sm:$0xff]  }
   0xb   :  { %1135 = vmatpush3.bf16.msra.mxu0 %v1280_v9  ;;  %v1297_v26 = vld [vmem:[%s1684_s1 + $0xf0] sm:$0xff]   ;;  %v1301_v30 = vld [vmem:[%s1684_s1 + $0xf8] sm:$0xff]   ;;  %v16_v36 = vld [vmem:[%s1685_s0 + $0x8] sm:$0xff] }
   0xc   :  { %1136 = vmatprep.subr.bf16.mxu0 %v1283_v12  ;;  %v1298_v27 = vld [vmem:[%s1684_s1 + $0xb0] sm:$0xff]   ;;  %v1304_v34 = vld [vmem:[%s1684_s1 + $0xb8] sm:$0xff]   ;;  %803 = vmatprep.mubr.bf16.mxu0 %v1032_v33  ;;  %v1033_v37 = vcombine.low %v16_v36, %v16_v36  ;;  %v1034_v38 = vcombine.high %v16_v36, %v16_v36  ;;  %v1308_v39 = vld [vmem:[%s1684_s1 + $0x100] sm:$0xff]  }
   0xd   :  { %1157 = vmatpush3.bf16.msra.mxu1 %v1282_v11  ;;  %v1309_v40 = vld [vmem:[%s1684_s1 + $0x1c0] sm:$0xff]   ;;  %v1311_v42 = vld [vmem:[%s1684_s1 + $0x148] sm:$0xff]   ;;  %v1315_v46 = vld [vmem:[%s1684_s1 + $0x150] sm:$0xff]  }
   0xe   :  { %1158 = vmatprep.subr.bf16.mxu1 %v1285_v14  ;;  %843 = vmatprep.mubr.bf16.mxu1 %v1034_v38  ;;  %v1310_v41 = vld [vmem:[%s1684_s1 + $0x180] sm:$0xff]   ;;  %v1312_v43 = vld [vmem:[%s1684_s1 + $0x108] sm:$0xff]   ;;  %v1316_v47 = vld [vmem:[%s1684_s1 + $0x110] sm:$0xff]   ;;  %v1374_v14 = vmov 0.0  }
   0xf   :  { %1137 = vmatpush3.bf16.msra.mxu0 %v1284_v13  ;;  %v1313_v44 = vld [vmem:[%s1684_s1 + $0x1c8] sm:$0xff]   ;;  %v1317_v48 = vld [vmem:[%s1684_s1 + $0x1d0] sm:$0xff]   ;;  %v1319_v50 = vld [vmem:[%s1684_s1 + $0x158] sm:$0xff]  }
  0x10   :  { %1138 = vmatprep.subr.bf16.mxu0 %v1287_v16  ;;  %v1314_v45 = vld [vmem:[%s1684_s1 + $0x188] sm:$0xff]   ;;  %v1318_v49 = vld [vmem:[%s1684_s1 + $0x190] sm:$0xff]   ;;  %v1320_v51 = vld [vmem:[%s1684_s1 + $0x118] sm:$0xff]  }
  0x11   :  { %1159 = vmatpush3.bf16.msra.mxu1 %v1286_v15  ;;  %v1321_v52 = vld [vmem:[%s1684_s1 + $0x1d8] sm:$0xff]   ;;  %v1323_v54 = vld [vmem:[%s1684_s1 + $0x160] sm:$0xff]   ;;  %v1327_v58 = vld [vmem:[%s1684_s1 + $0x168] sm:$0xff]  }
  0x12   :  { %1160 = vmatprep.subr.bf16.mxu1 %v1289_v18  ;;  %v1322_v53 = vld [vmem:[%s1684_s1 + $0x198] sm:$0xff]   ;;  %v1324_v55 = vld [vmem:[%s1684_s1 + $0x120] sm:$0xff]   ;;  %v1328_v59 = vld [vmem:[%s1684_s1 + $0x128] sm:$0xff]  }
  0x13   :  { %1139 = vmatpush3.bf16.msra.mxu0 %v1288_v17  ;;  %v1325_v56 = vld [vmem:[%s1684_s1 + $0x1e0] sm:$0xff]   ;;  %v1329_v60 = vld [vmem:[%s1684_s1 + $0x1e8] sm:$0xff]   ;;  %v1331_v62 = vld [vmem:[%s1684_s1 + $0x170] sm:$0xff]  }
  0x14   :  { %1140 = vmatprep.subr.bf16.mxu0 %v1291_v20  ;;  %v1326_v57 = vld [vmem:[%s1684_s1 + $0x1a0] sm:$0xff]   ;;  %v1330_v61 = vld [vmem:[%s1684_s1 + $0x1a8] sm:$0xff]   ;;  %v1332_v63 = vld [vmem:[%s1684_s1 + $0x130] sm:$0xff]  }
  0x15   :  { %1161 = vmatpush3.bf16.msra.mxu1 %v1290_v19  ;;  %v1333_v0 = vld [vmem:[%s1684_s1 + $0x1f0] sm:$0xff]   ;;  %v1335_v2 = vld [vmem:[%s1684_s1 + $0x178] sm:$0xff]   ;;  %v1341_v9 = vld [vmem:[%s1684_s1 + $0x240] sm:$0xff]  }
  0x16   :  { %1162 = vmatprep.subr.bf16.mxu1 %v1293_v22  ;;  %v1334_v1 = vld [vmem:[%s1684_s1 + $0x1b0] sm:$0xff]   ;;  %v1336_v3 = vld [vmem:[%s1684_s1 + $0x138] sm:$0xff]   ;;  %v1344_v13 = vld [vmem:[%s1684_s1 + $0x200] sm:$0xff]  }
  0x17   :  { %1141 = vmatpush3.bf16.msra.mxu0 %v1292_v21  ;;  %v1337_v4 = vld [vmem:[%s1684_s1 + $0x1f8] sm:$0xff]   ;;  %v17_v5 = vld [vmem:[%s1685_s0 + $0x10] sm:$0xff]  ;;  %v1345_v15 = vld [vmem:[%s1684_s1 + $0x280] sm:$0xff]  }
  0x18   :  { %1142 = vmatprep.subr.bf16.mxu0 %v1295_v24  ;;  %v1035_v6 = vcombine.low %v17_v5, %v17_v5  ;;  %v1036_v7 = vcombine.high %v17_v5, %v17_v5  ;;  %v1340_v8 = vld [vmem:[%s1684_s1 + $0x1b8] sm:$0xff]   ;;  %v1346_v16 = vld [vmem:[%s1684_s1 + $0x248] sm:$0xff]   ;;  %v1349_v19 = vld [vmem:[%s1684_s1 + $0x250] sm:$0xff]  }
  0x19   :  { %1163 = vmatpush3.bf16.msra.mxu1 %v1294_v23  ;;  %v18_v10 = vld [vmem:[%s1685_s0 + $0x18] sm:$0xff]  ;;  %v1347_v17 = vld [vmem:[%s1684_s1 + $0x208] sm:$0xff]   ;;  %v1350_v20 = vld [vmem:[%s1684_s1 + $0x210] sm:$0xff]  }
  0x1a   :  { %1164 = vmatprep.subr.bf16.mxu1 %v1297_v26  ;;  %v1037_v11 = vcombine.low %v18_v10, %v18_v10  ;;  %v1038_v12 = vcombine.high %v18_v10, %v18_v10  ;;  %v1348_v18 = vld [vmem:[%s1684_s1 + $0x288] sm:$0xff]   ;;  %v1351_v21 = vld [vmem:[%s1684_s1 + $0x290] sm:$0xff]   ;;  %v1352_v22 = vld [vmem:[%s1684_s1 + $0x258] sm:$0xff]  }
  0x1b   :  { %1143 = vmatpush3.bf16.msra.mxu0 %v1296_v25  ;;  %v1353_v23 = vld [vmem:[%s1684_s1 + $0x218] sm:$0xff]   ;;  %v1355_v24 = vld [vmem:[%s1684_s1 + $0x260] sm:$0xff]   ;;  %v1360_v31 = vld [vmem:[%s1684_s1 + $0x2a8] sm:$0xff]  }
  0x1c   :  { %1144 = vmatprep.subr.bf16.mxu0 %v1299_v28  ;;  %v1354_v25 = vld [vmem:[%s1684_s1 + $0x298] sm:$0xff]   ;;  %v1356_v26 = vld [vmem:[%s1684_s1 + $0x220] sm:$0xff]   ;;  %v1362_v33 = vld [vmem:[%s1684_s1 + $0x230] sm:$0xff]  }
  0x1d   :  { %1165 = vmatpush3.bf16.msra.mxu1 %v1298_v27  ;;  %v1358_v27 = vld [vmem:[%s1684_s1 + $0x268] sm:$0xff]   ;;  %v1357_v28 = vld [vmem:[%s1684_s1 + $0x2a0] sm:$0xff]   ;;  %v1363_v36 = vld [vmem:[%s1684_s1 + $0x2b0] sm:$0xff]  }
  0x1e   :  { %1166 = vmatprep.subr.bf16.mxu1 %v1301_v30  ;;  %v1361_v30 = vld [vmem:[%s1684_s1 + $0x270] sm:$0xff]   ;;  %v1368_v38 = vld [vmem:[%s1684_s1 + $0x2b8] sm:$0xff]  }
  0x1f   :  { %1145 = vmatpush3.bf16.msra.mxu0 %v1300_v29  ;;  %v1359_v29 = vld [vmem:[%s1684_s1 + $0x228] sm:$0xff]  }
  0x20   :  { %1174 = vmatprep.subr.bf16.mxu0 %v1305_v35  ;;  %v1364_v35 = vld [vmem:[%s1684_s1 + $0x278] sm:$0xff]  }
  0x21   :  { %1167 = vmatpush3.bf16.msra.mxu1 %v1304_v34 }
  0x22   :  { %804 = vmatmul.mubr.bf16.vlgmr.msra.gmra.mrb[0].mxu0 %v1031_v32  ;;  %1196 = vmatprep.subr.bf16.mxu1 %v1309_v40  ;;  %v19_v32 = vld [vmem:[%s1685_s0 + $0x20] sm:$0xff]  ;;  %v1369_v40 = vld [vmem:[%s1685_s0 + $0x28] ss:$0 sps:$4 sm:$0xff]  }
  0x23   :  { %1175 = vmatpush3.bf16.msra.mxu0 %v1308_v39  ;;  %883 = vmatprep.mubr.bf16.mxu0 %v1036_v7  ;;  %v1040_v34 = vcombine.high %v19_v32, %v19_v32  ;;  %v1039_v39 = vcombine.low %v19_v32, %v19_v32 }
  0x24   :  { %844 = vmatmul.mubr.bf16.vlgmr.msra.gmra.mrb[0].mxu1 %v1033_v37  ;;  %1176 = vmatprep.subr.bf16.mxu0 %v1311_v42  ;;  %v1365_v37 = vld [vmem:[%s1684_s1 + $0x238] sm:$0xff]   ;;  %v1030_v42 = vld [vmem:[%s1686_s2] ss:$0 sm:$0xff] }
  0x25   :  { %1197 = vmatpush3.bf16.msra.mxu1 %v1310_v41  ;;  %923 = vmatprep.mubr.bf16.mxu1 %v1038_v12 }
  0x26   :  { %1198 = vmatprep.subr.bf16.mxu1 %v1313_v44 }
  0x27   :  { %1177 = vmatpush3.bf16.msra.mxu0 %v1312_v43 }
  0x28   :  { %1178 = vmatprep.subr.bf16.mxu0 %v1315_v46 }
  0x29   :  { %1199 = vmatpush3.bf16.msra.mxu1 %v1314_v45 }
  0x2a   :  { %1200 = vmatprep.subr.bf16.mxu1 %v1317_v48 }
  0x2b   :  { %1179 = vmatpush3.bf16.msra.mxu0 %v1316_v47 }
  0x2c   :  { %1180 = vmatprep.subr.bf16.mxu0 %v1319_v50 }
  0x2d   :  { %1201 = vmatpush3.bf16.msra.mxu1 %v1318_v49 }
  0x2e   :  { %1202 = vmatprep.subr.bf16.mxu1 %v1321_v52 }
  0x2f   :  { %1181 = vmatpush3.bf16.msra.mxu0 %v1320_v51 }
  0x30   :  { %1182 = vmatprep.subr.bf16.mxu0 %v1323_v54 }
  0x31   :  { %1203 = vmatpush3.bf16.msra.mxu1 %v1322_v53 }
  0x32   :  { %1204 = vmatprep.subr.bf16.mxu1 %v1325_v56 }
  0x33   :  { %1183 = vmatpush3.bf16.msra.mxu0 %v1324_v55 }
  0x34   :  { %1184 = vmatprep.subr.bf16.mxu0 %v1327_v58 }
  0x35   :  { %1205 = vmatpush3.bf16.msra.mxu1 %v1326_v57 }
  0x36   :  { %1206 = vmatprep.subr.bf16.mxu1 %v1329_v60 }
  0x37   :  { %1185 = vmatpush3.bf16.msra.mxu0 %v1328_v59 }
  0x38   :  { %1186 = vmatprep.subr.bf16.mxu0 %v1331_v62 }
  0x39   :  { %1207 = vmatpush3.bf16.msra.mxu1 %v1330_v61 }
  0x3a   :  { %1208 = vmatprep.subr.bf16.mxu1 %v1333_v0 }
  0x3b   :  { %1187 = vmatpush3.bf16.msra.mxu0 %v1332_v63 }
  0x3c   :  { %1188 = vmatprep.subr.bf16.mxu0 %v1335_v2  ;;  %v1011_v2 = vlaneseq }
  0x3d   :  { %1209 = vmatpush3.bf16.msra.mxu1 %v1334_v1 }
  0x3e   :  { %1210 = vmatprep.subr.bf16.mxu1 %v1337_v4  ;;  %v1012_v5 = vand.u32 127, %v1011_v2 }
  0x3f   :  { %1189 = vmatpush3.bf16.msra.mxu0 %v1336_v3 }
  0x40   :  { %1218 = vmatprep.subr.bf16.mxu0 %v1341_v9  ;;  %vm1013_vm1 = vcmp.lt.s32.totalorder %v1012_v5, 10 }
  0x41   :  { %1211 = vmatpush3.bf16.msra.mxu1 %v1340_v8 }
  0x42   :  { %884 = vmatmul.mubr.bf16.vlgmr.msra.gmra.mrb[4].mxu0 %v1035_v6  ;;  %1249 = vmatprep.subr.bf16.mxu1 %v1374_v14 }
  0x43   :  { %1219 = vmatpush3.bf16.msra.mxu0 %v1344_v13  ;;  %963 = vmatprep.mubr.bf16.mxu0 %v1040_v34 }
  0x44   :  { %924 = vmatmul.mubr.bf16.vlgmr.msra.gmra.mrb[4].mxu1 %v1037_v11  ;;  %1220 = vmatprep.subr.bf16.mxu0 %v1346_v16 }
  0x45   :  { %1250 = vmatpush3.bf16.msra.mxu1 %v1345_v15  ;;  %1265 = vmatprep.mubr.msk.bf16.mxu1 %vm1375_vm0, %v1374_v14 }
  0x46   :  { %1251 = vmatprep.subr.bf16.mxu1 %v1374_v14 }
  0x47   :  { %1221 = vmatpush3.bf16.msra.mxu0 %v1347_v17 }
  0x48   :  { %1222 = vmatprep.subr.bf16.mxu0 %v1349_v19 }
  0x49   :  { %1252 = vmatpush3.bf16.msra.mxu1 %v1348_v18 }
  0x4a   :  { %1253 = vmatprep.subr.bf16.mxu1 %v1374_v14 }
  0x4b   :  { %1223 = vmatpush3.bf16.msra.mxu0 %v1350_v20 }
  0x4c   :  { %1224 = vmatprep.subr.bf16.mxu0 %v1352_v22 }
  0x4d   :  { %1254 = vmatpush3.bf16.msra.mxu1 %v1351_v21 }
  0x4e   :  { %1255 = vmatprep.subr.bf16.mxu1 %v1374_v14 }
  0x4f   :  { %1225 = vmatpush3.bf16.msra.mxu0 %v1353_v23 }
  0x50   :  { %1226 = vmatprep.subr.bf16.mxu0 %v1355_v24 }
  0x51   :  { %1256 = vmatpush3.bf16.msra.mxu1 %v1354_v25 }
  0x52   :  { %1257 = vmatprep.subr.bf16.mxu1 %v1374_v14 }
  0x53   :  { %1227 = vmatpush3.bf16.msra.mxu0 %v1356_v26 }
  0x54   :  { %1228 = vmatprep.subr.bf16.mxu0 %v1358_v27 }
  0x55   :  { %1258 = vmatpush3.bf16.msra.mxu1 %v1357_v28 }
  0x56   :  { %1259 = vmatprep.subr.bf16.mxu1 %v1374_v14 }
  0x57   :  { %1229 = vmatpush3.bf16.msra.mxu0 %v1359_v29 }
  0x58   :  { %1230 = vmatprep.subr.bf16.mxu0 %v1361_v30 }
  0x59   :  { %1260 = vmatpush3.bf16.msra.mxu1 %v1360_v31 }
  0x5a   :  { %1261 = vmatprep.subr.bf16.mxu1 %v1374_v14 }
  0x5b   :  { %1231 = vmatpush3.bf16.msra.mxu0 %v1362_v33 }
  0x5c   :  { %1232 = vmatprep.subr.bf16.mxu0 %v1364_v35 }
  0x5d   :  { %1262 = vmatpush3.bf16.msra.mxu1 %v1363_v36 }
  0x5e   :  { %1263 = vmatprep.subr.bf16.mxu1 %v1374_v14 }
  0x5f   :  { %1233 = vmatpush3.bf16.msra.mxu0 %v1365_v37 }
  0x61   :  { %1264 = vmatpush3.bf16.msra.mxu1 %v1368_v38 }
  0x62   :  { %964 = vmatmul.mubr.bf16.vlgmr.msra.gmra.mrb[8].mxu0 %v1039_v39 }
  0x64   :  { %1266 = vmatmul.mubr.bf16.vlgmr.msra.gmra.mrb[8].mxu1 %v1369_v40 }
  0xf5   :  { %v1146_v41 = vpop.f32.mrb[0].mxu0 }
  0xf6   :  { %v1147_v43 = vpop.f32.mrb[1].mxu0 }
  0xf7   :  { %v1148_v44 = vadd.f32 %v1147_v43, %v1146_v41  ;;  %v1149_v45 = vpop.f32.mrb[2].mxu0  ;;  %v1168_v46 = vpop.f32.mrb[0].mxu1 }
  0xf8   :  { %v1150_v47 = vpop.f32.mrb[3].mxu0  ;;  %v1169_v48 = vpop.f32.mrb[1].mxu1 }
  0xf9   :  { %v806_v49 = vadd.f32 %v1148_v44, %v1030_v42  ;;  %v1170_v50 = vadd.f32 %v1169_v48, %v1168_v46  ;;  %v1171_v51 = vpop.f32.mrb[2].mxu1 }
  0xfa   :  { %v1172_v52 = vpop.f32.mrb[3].mxu1 }
  0xfb   :  { %v846_v53 = vadd.f32 %v1170_v50, %v806_v49 }
 0x115   :  { %v1190_v54 = vpop.f32.mrb[4].mxu0 }
 0x116   :  { %v1191_v55 = vpop.f32.mrb[5].mxu0 }
 0x117   :  { %v1192_v56 = vadd.f32 %v1191_v55, %v1190_v54  ;;  %v1193_v57 = vpop.f32.mrb[6].mxu0  ;;  %v1212_v58 = vpop.f32.mrb[4].mxu1 }
 0x118   :  { %v1194_v59 = vpop.f32.mrb[7].mxu0  ;;  %v1213_v61 = vpop.f32.mrb[5].mxu1 }
 0x119   :  { %v886_v60 = vadd.f32 %v1192_v56, %v846_v53  ;;  %v1214_v62 = vadd.f32 %v1213_v61, %v1212_v58  ;;  %v1215_v63 = vpop.f32.mrb[6].mxu1 }
 0x11a   :  { %v1216_v0 = vpop.f32.mrb[7].mxu1 }
 0x11b   :  { %v926_v1 = vadd.f32 %v1214_v62, %v886_v60 }
 0x135   :  { %v1234_v3 = vpop.f32.mrb[8].mxu0 }
 0x136   :  { %v1235_v4 = vpop.f32.mrb[9].mxu0 }
 0x137   :  { %v1236_v6 = vadd.f32 %v1235_v4, %v1234_v3  ;;  %v1237_v7 = vpop.f32.mrb[10].mxu0  ;;  %v1005_v8 = vpop.f32.mrb[8].mxu1 }
 0x138   :  { %v1238_v9 = vpop.f32.mrb[11].mxu0  ;;  %v1267_v10 = vpop.f32.mrb[9].mxu1 }
 0x139   :  { %v966_v11 = vadd.f32 %v1236_v6, %v926_v1  ;;  %v1008_v12 = vpop.f32.mrb[10].mxu1 }
 0x13a   :  { %v1268_v13 = vpop.f32.mrb[11].mxu1 }
 0x13b   :  { %v1006_v14 = vadd.f32 %v1005_v8, %v966_v11 }
 0x13d   :  { %v1014_v15 = vsel %vm1013_vm1, %v1006_v14, -1e+30 }
 0x13e   :  { %1015 = vmax.xlane.f32.xlu0 %v1014_v15 }
 0x1cb   :  { %v1016_v16 = vpop.xlane.xlu0 %1015 }
 0x1cc   :  { %v1017_v17 = vsub.f32 %v1014_v15, %v1016_v16 }
 0x1ce   :  { %v1018_v18 = vmul.f32 1.442695, %v1017_v17 }
 0x1d0   :  { %1370 = vpow2.f32 %v1018_v18 }
 0x1da   :  { %v1371_v19 = vpop.eup %1370 }
 0x1db   :  { %1020 = vadd.xlane.f32.xlu0 %v1371_v19 }
 0x268   :  { %v1021_v20 = vpop.xlane.xlu0 %1020 }
 0x269   :  { %1372 = vlog2.f32 %v1021_v20 }
 0x273   :  { %v1373_v21 = vpop.eup %1372 }
 0x274   :  { %v1023_v22 = vmul.f32 0.6931472, %v1373_v21 }
 0x276   :  { %v1024_v23 = vsub.f32 %v1017_v17, %v1023_v22 }
 0x278   :  { %1025 = vst [vmem:[%s1687_s3] sm:$0xff] %v1024_v23 }

</bundles_post_ra>
